<compile_context>
chip_gen: v7x
topology: tpu7x:2x2x1
jax: 0.10.0
libtpu: 0.0.40
codegen_flags: <defaults>
</compile_context>

<pallas_src>
import jax
import jax.numpy as jnp
from jax import lax
from jax.experimental import pallas as pl
from jax.experimental.pallas import tpu as pltpu


def _encoder_kernel(x_ref, w1_ref, b1_ref, w2t_ref, b2_ref, o_ref,
                    xp_s, y1p_s, p1_s, p2_s):
    # x_ref  : (1, H, W, 1)         one batch element, Cin = 1
    # w1_ref : (9, C)               conv1 weights, im2col (tap-major)
    # b1_ref : (1, C)
    # w2t_ref: (C, 9*C)             conv2 weights, im2col, out-channel major
    # b2_ref : (C, 1)
    # o_ref  : (1, C, H*W)          lane-dense output == flattened NCHW
    # scratch: xp_s  (H+2, W+2, 1)  zero-padded input
    #          y1p_s (H+2, W+2, C)  zero-padded conv1 activation
    #          p1_s  (H*W, 9)       conv1 im2col patches
    #          p2_s  (H*W, 9*C)     conv2 im2col patches
    _, H, W, _ = x_ref.shape
    C = o_ref.shape[1]
    HW = H * W

    # ---- 'same' padding of the input, entirely in VMEM ---------------------
    xp_s[...] = jnp.zeros_like(xp_s)
    xp_s[1:H + 1, 1:W + 1, :] = x_ref[0]

    # ---- conv1: build (H*W, 9) patches in VMEM, one MXU matmul -------------
    for kh in range(3):
        for kw in range(3):
            t = kh * 3 + kw
            p1_s[:, t:t + 1] = xp_s[kh:kh + H, kw:kw + W, :].reshape(HW, 1)
    y1 = jnp.dot(p1_s[...], w1_ref[...], preferred_element_type=jnp.float32)
    y1 = jnp.maximum(y1 + b1_ref[...], 0.0)                       # (H*W, C)

    # ---- pad the intermediate in VMEM (border stays zero) ------------------
    y1p_s[...] = jnp.zeros_like(y1p_s)
    y1p_s[1:H + 1, 1:W + 1, :] = y1.reshape(H, W, C)

    # ---- conv2: build (H*W, 9C) patches in VMEM, one matmul that directly --
    # ---- produces the channel-major (C, H*W) result (lane-dense store) -----
    for kh in range(3):
        for kw in range(3):
            t = kh * 3 + kw
            p2_s[:, t * C:(t + 1) * C] = (
                y1p_s[kh:kh + H, kw:kw + W, :].reshape(HW, C))
    # out[c, m] = sum_k w2t[c, k] * p2[m, k]   (contract both minor dims)
    y2t = lax.dot_general(w2t_ref[...], p2_s[...],
                          dimension_numbers=(((1,), (1,)), ((), ())),
                          preferred_element_type=jnp.float32)     # (C, H*W)
    y2t = jnp.maximum(y2t + b2_ref[...], 0.0)
    o_ref[0] = y2t.astype(o_ref.dtype)


def encoder_forward_pallas(x_nchw, params):
    """Fused ENCODER.forward. Input/output NCHW like the PyTorch module."""
    w1, b1, w2, b2 = params                       # HWIO weights
    B, cin, H, W = x_nchw.shape
    assert cin == 1
    C = w1.shape[-1]

    # Cin == 1: NCHW -> NHWC is a pure (free) reshape, no data movement.
    x = x_nchw.reshape(B, H, W, 1)
    # Tiny one-off weight re-layouts for the im2col matmuls.
    w1f = w1.reshape(9, C)                        # (9, 32)   tap-major
    w2t = jnp.transpose(w2.reshape(9 * C, C))     # (32, 288) out-channel major
    b1r = b1.reshape(1, C)
    b2r = b2.reshape(C, 1)

    out_flat = pl.pallas_call(
        _encoder_kernel,
        out_shape=jax.ShapeDtypeStruct((B, C, H * W), x_nchw.dtype),
        grid=(B,),
        in_specs=[
            pl.BlockSpec((1, H, W, 1), lambda b: (b, 0, 0, 0)),
            pl.BlockSpec((9, C), lambda b: (0, 0)),
            pl.BlockSpec((1, C), lambda b: (0, 0)),
            pl.BlockSpec((C, 9 * C), lambda b: (0, 0)),
            pl.BlockSpec((C, 1), lambda b: (0, 0)),
        ],
        out_specs=pl.BlockSpec((1, C, H * W), lambda b: (b, 0, 0)),
        scratch_shapes=[
            pltpu.VMEM((H + 2, W + 2, 1), jnp.float32),
            pltpu.VMEM((H + 2, W + 2, C), jnp.float32),
            pltpu.VMEM((H * W, 9), jnp.float32),
            pltpu.VMEM((H * W, 9 * C), jnp.float32),
        ],
        compiler_params=pltpu.CompilerParams(
            dimension_semantics=("parallel",)),
    )(x, w1f, b1r, w2t, b2r)

    # (B, C, H*W) -> (B, C, H, W): already NCHW, reshape is free.
    return out_flat.reshape(B, C, H, W)


def init_encoder_params(key):
    """Deterministic init matching PyTorch Conv2d shapes (kaiming-uniform bound)."""
    k1, k2, k3, k4 = jax.random.split(key, 4)
    bound1 = 1.0 / (1 * 3 * 3) ** 0.5
    bound2 = 1.0 / (32 * 3 * 3) ** 0.5
    w1 = jax.random.uniform(k1, (3, 3, 1, 32), jnp.float32, -bound1, bound1)
    b1 = jax.random.uniform(k2, (32,), jnp.float32, -bound1, bound1)
    w2 = jax.random.uniform(k3, (3, 3, 32, 32), jnp.float32, -bound2, bound2)
    b2 = jax.random.uniform(k4, (32,), jnp.float32, -bound2, bound2)
    return (w1, b1, w2, b2)


@jax.jit
def encoder_forward(x_nchw, params):
    return encoder_forward_pallas(x_nchw, params)


def _reference_forward(x_nchw, params):
    """Pure-JAX reference (lax conv) for a sanity check."""
    w1, b1, w2, b2 = params
    x = jnp.transpose(x_nchw, (0, 2, 3, 1))
    dn = jax.lax.conv_dimension_numbers(x.shape, w1.shape, ("NHWC", "HWIO", "NHWC"))
    x = jax.nn.relu(jax.lax.conv_general_dilated(x, w1, (1, 1), "SAME",
                                                 dimension_numbers=dn) + b1)
    x = jax.nn.relu(jax.lax.conv_general_dilated(x, w2, (1, 1), "SAME",
                                                 dimension_numbers=dn) + b2)
    return jnp.transpose(x, (0, 3, 1, 2))


if __name__ == "__main__":
    key = jax.random.PRNGKey(0)
    kx, kp = jax.random.split(key)
    x = jax.random.normal(kx, (2, 1, 16, 16), jnp.float32)   # NCHW, like PyTorch
    params = init_encoder_params(kp)

    out = jax.block_until_ready(encoder_forward(x, params))
    assert out.shape == (2, 32, 16, 16), out.shape

    ref = jax.block_until_ready(_reference_forward(x, params))
    assert jnp.allclose(out, ref, rtol=1e-4, atol=1e-4), "mismatch vs lax reference"

    print("KERNEL_OK")
</pallas_src>

<mosaic_0001>
module attributes {stable_mosaic.version = 11 : i64} {
  func.func @_encoder_kernel(%arg0: i32, %arg1: memref<1x16x16x1xf32, #tpu.memory_space<vmem>>, %arg2: memref<9x32xf32, #tpu.memory_space<vmem>>, %arg3: memref<1x32xf32, #tpu.memory_space<vmem>>, %arg4: memref<32x288xf32, #tpu.memory_space<vmem>>, %arg5: memref<32x1xf32, #tpu.memory_space<vmem>>, %arg6: memref<1x32x256xf32, #tpu.memory_space<vmem>>, %arg7: memref<18x18x1xf32, #tpu.memory_space<vmem>>, %arg8: memref<18x18x32xf32, #tpu.memory_space<vmem>>, %arg9: memref<256x9xf32, #tpu.memory_space<vmem>>, %arg10: memref<256x288xf32, #tpu.memory_space<vmem>>) attributes {dimension_semantics = [#tpu.dimension_semantics<parallel>], iteration_bounds = array<i64: 2>, scalar_prefetch = 0 : i64, scratch_operands = 4 : i64, tpu.core_type = #tpu.core_type<tc>, window_params = [{transform_indices = @transform_0, window_bounds = array<i64: 1, 16, 16, 1>}, {pipeline_mode = #tpu.pipeline_mode<synchronous>, transform_indices = @transform_1, window_bounds = array<i64: 9, 32>}, {pipeline_mode = #tpu.pipeline_mode<synchronous>, transform_indices = @transform_2, window_bounds = array<i64: 1, 32>}, {pipeline_mode = #tpu.pipeline_mode<synchronous>, transform_indices = @transform_3, window_bounds = array<i64: 32, 288>}, {pipeline_mode = #tpu.pipeline_mode<synchronous>, transform_indices = @transform_4, window_bounds = array<i64: 32, 1>}, {transform_indices = @transform_5, window_bounds = array<i64: 1, 32, 256>}]} {
    %cst = arith.constant 0.000000e+00 : f32
    %0 = vector.broadcast %cst : f32 to vector<18x18x1xf32>
    %c0 = arith.constant 0 : index
    %c0_0 = arith.constant 0 : index
    %c0_1 = arith.constant 0 : index
    %1 = vector.load %arg7[%c0, %c0_0, %c0_1] : memref<18x18x1xf32, #tpu.memory_space<vmem>>, vector<18x18x1xf32>
    tpu.vector_store %arg7[%c0, %c0_0, %c0_1], %0 {strides = array<i32>} : memref<18x18x1xf32, #tpu.memory_space<vmem>>, vector<18x18x1xf32>,
    %c0_2 = arith.constant 0 : index
    %c0_3 = arith.constant 0 : index
    %c0_4 = arith.constant 0 : index
    %c0_5 = arith.constant 0 : index
    %2 = vector.load %arg1[%c0_2, %c0_3, %c0_4, %c0_5] : memref<1x16x16x1xf32, #tpu.memory_space<vmem>>, vector<1x16x16x1xf32>
    %3 = vector.shape_cast %2 : vector<1x16x16x1xf32> to vector<16x16x1xf32>
    %c1 = arith.constant 1 : index
    %c1_6 = arith.constant 1 : index
    %c0_7 = arith.constant 0 : index
    %4 = vector.load %arg7[%c1, %c1_6, %c0_7] : memref<18x18x1xf32, #tpu.memory_space<vmem>>, vector<16x16x1xf32>
    tpu.vector_store %arg7[%c1, %c1_6, %c0_7], %3 {strides = array<i32>} : memref<18x18x1xf32, #tpu.memory_space<vmem>>, vector<16x16x1xf32>,
    %c0_8 = arith.constant 0 : index
    %c0_9 = arith.constant 0 : index
    %c0_10 = arith.constant 0 : index
    %5 = vector.load %arg7[%c0_8, %c0_9, %c0_10] : memref<18x18x1xf32, #tpu.memory_space<vmem>>, vector<16x16x1xf32>
    %6 = vector.shape_cast %5 : vector<16x16x1xf32> to vector<256x1xf32>
    %c0_11 = arith.constant 0 : index
    %c0_12 = arith.constant 0 : index
    %7 = vector.load %arg9[%c0_11, %c0_12] : memref<256x9xf32, #tpu.memory_space<vmem>>, vector<256x1xf32>
    tpu.vector_store %arg9[%c0_11, %c0_12], %6 {strides = array<i32>} : memref<256x9xf32, #tpu.memory_space<vmem>>, vector<256x1xf32>,
    %c0_13 = arith.constant 0 : index
    %c1_14 = arith.constant 1 : index
    %c0_15 = arith.constant 0 : index
    %8 = vector.load %arg7[%c0_13, %c1_14, %c0_15] : memref<18x18x1xf32, #tpu.memory_space<vmem>>, vector<16x16x1xf32>
    %9 = vector.shape_cast %8 : vector<16x16x1xf32> to vector<256x1xf32>
    %c0_16 = arith.constant 0 : index
    %c1_17 = arith.constant 1 : index
    %10 = vector.load %arg9[%c0_16, %c1_17] : memref<256x9xf32, #tpu.memory_space<vmem>>, vector<256x1xf32>
    tpu.vector_store %arg9[%c0_16, %c1_17], %9 {strides = array<i32>} : memref<256x9xf32, #tpu.memory_space<vmem>>, vector<256x1xf32>,
    %c0_18 = arith.constant 0 : index
    %c2 = arith.constant 2 : index
    %c0_19 = arith.constant 0 : index
    %11 = vector.load %arg7[%c0_18, %c2, %c0_19] : memref<18x18x1xf32, #tpu.memory_space<vmem>>, vector<16x16x1xf32>
    %12 = vector.shape_cast %11 : vector<16x16x1xf32> to vector<256x1xf32>
    %c0_20 = arith.constant 0 : index
    %c2_21 = arith.constant 2 : index
    %13 = vector.load %arg9[%c0_20, %c2_21] : memref<256x9xf32, #tpu.memory_space<vmem>>, vector<256x1xf32>
    tpu.vector_store %arg9[%c0_20, %c2_21], %12 {strides = array<i32>} : memref<256x9xf32, #tpu.memory_space<vmem>>, vector<256x1xf32>,
    %c1_22 = arith.constant 1 : index
    %c0_23 = arith.constant 0 : index
    %c0_24 = arith.constant 0 : index
    %14 = vector.load %arg7[%c1_22, %c0_23, %c0_24] : memref<18x18x1xf32, #tpu.memory_space<vmem>>, vector<16x16x1xf32>
    %15 = vector.shape_cast %14 : vector<16x16x1xf32> to vector<256x1xf32>
    %c0_25 = arith.constant 0 : index
    %c3 = arith.constant 3 : index
    %16 = vector.load %arg9[%c0_25, %c3] : memref<256x9xf32, #tpu.memory_space<vmem>>, vector<256x1xf32>
    tpu.vector_store %arg9[%c0_25, %c3], %15 {strides = array<i32>} : memref<256x9xf32, #tpu.memory_space<vmem>>, vector<256x1xf32>,
    %c1_26 = arith.constant 1 : index
    %c1_27 = arith.constant 1 : index
    %c0_28 = arith.constant 0 : index
    %17 = vector.load %arg7[%c1_26, %c1_27, %c0_28] : memref<18x18x1xf32, #tpu.memory_space<vmem>>, vector<16x16x1xf32>
    %18 = vector.shape_cast %17 : vector<16x16x1xf32> to vector<256x1xf32>
    %c0_29 = arith.constant 0 : index
    %c4 = arith.constant 4 : index
    %19 = vector.load %arg9[%c0_29, %c4] : memref<256x9xf32, #tpu.memory_space<vmem>>, vector<256x1xf32>
    tpu.vector_store %arg9[%c0_29, %c4], %18 {strides = array<i32>} : memref<256x9xf32, #tpu.memory_space<vmem>>, vector<256x1xf32>,
    %c1_30 = arith.constant 1 : index
    %c2_31 = arith.constant 2 : index
    %c0_32 = arith.constant 0 : index
    %20 = vector.load %arg7[%c1_30, %c2_31, %c0_32] : memref<18x18x1xf32, #tpu.memory_space<vmem>>, vector<16x16x1xf32>
    %21 = vector.shape_cast %20 : vector<16x16x1xf32> to vector<256x1xf32>
    %c0_33 = arith.constant 0 : index
    %c5 = arith.constant 5 : index
    %22 = vector.load %arg9[%c0_33, %c5] : memref<256x9xf32, #tpu.memory_space<vmem>>, vector<256x1xf32>
    tpu.vector_store %arg9[%c0_33, %c5], %21 {strides = array<i32>} : memref<256x9xf32, #tpu.memory_space<vmem>>, vector<256x1xf32>,
    %c2_34 = arith.constant 2 : index
    %c0_35 = arith.constant 0 : index
    %c0_36 = arith.constant 0 : index
    %23 = vector.load %arg7[%c2_34, %c0_35, %c0_36] : memref<18x18x1xf32, #tpu.memory_space<vmem>>, vector<16x16x1xf32>
    %24 = vector.shape_cast %23 : vector<16x16x1xf32> to vector<256x1xf32>
    %c0_37 = arith.constant 0 : index
    %c6 = arith.constant 6 : index
    %25 = vector.load %arg9[%c0_37, %c6] : memref<256x9xf32, #tpu.memory_space<vmem>>, vector<256x1xf32>
    tpu.vector_store %arg9[%c0_37, %c6], %24 {strides = array<i32>} : memref<256x9xf32, #tpu.memory_space<vmem>>, vector<256x1xf32>,
    %c2_38 = arith.constant 2 : index
    %c1_39 = arith.constant 1 : index
    %c0_40 = arith.constant 0 : index
    %26 = vector.load %arg7[%c2_38, %c1_39, %c0_40] : memref<18x18x1xf32, #tpu.memory_space<vmem>>, vector<16x16x1xf32>
    %27 = vector.shape_cast %26 : vector<16x16x1xf32> to vector<256x1xf32>
    %c0_41 = arith.constant 0 : index
    %c7 = arith.constant 7 : index
    %28 = vector.load %arg9[%c0_41, %c7] : memref<256x9xf32, #tpu.memory_space<vmem>>, vector<256x1xf32>
    tpu.vector_store %arg9[%c0_41, %c7], %27 {strides = array<i32>} : memref<256x9xf32, #tpu.memory_space<vmem>>, vector<256x1xf32>,
    %c2_42 = arith.constant 2 : index
    %c2_43 = arith.constant 2 : index
    %c0_44 = arith.constant 0 : index
    %29 = vector.load %arg7[%c2_42, %c2_43, %c0_44] : memref<18x18x1xf32, #tpu.memory_space<vmem>>, vector<16x16x1xf32>
    %30 = vector.shape_cast %29 : vector<16x16x1xf32> to vector<256x1xf32>
    %c0_45 = arith.constant 0 : index
    %c8 = arith.constant 8 : index
    %31 = vector.load %arg9[%c0_45, %c8] : memref<256x9xf32, #tpu.memory_space<vmem>>, vector<256x1xf32>
    tpu.vector_store %arg9[%c0_45, %c8], %30 {strides = array<i32>} : memref<256x9xf32, #tpu.memory_space<vmem>>, vector<256x1xf32>,
    %c0_46 = arith.constant 0 : index
    %c0_47 = arith.constant 0 : index
    %32 = vector.load %arg9[%c0_46, %c0_47] : memref<256x9xf32, #tpu.memory_space<vmem>>, vector<256x9xf32>
    %c0_48 = arith.constant 0 : index
    %c0_49 = arith.constant 0 : index
    %33 = vector.load %arg2[%c0_48, %c0_49] : memref<9x32xf32, #tpu.memory_space<vmem>>, vector<9x32xf32>
    %cst_50 = arith.constant dense<0.000000e+00> : vector<256x32xf32>
    %34 = tpu.matmul %32, %33, %cst_50 {dimension_numbers = #tpu.dot_dimension_numbers<[1], [0], [0], [1], [0, 0, 1, 1], [], []>} : vector<256x9xf32>, vector<9x32xf32>, vector<256x32xf32> -> vector<256x32xf32>
    %c0_51 = arith.constant 0 : index
    %c0_52 = arith.constant 0 : index
    %35 = vector.load %arg3[%c0_51, %c0_52] : memref<1x32xf32, #tpu.memory_space<vmem>>, vector<1x32xf32>
    %36 = vector.broadcast %35 : vector<1x32xf32> to vector<256x32xf32>
    %37 = arith.addf %34, %36 : vector<256x32xf32>
    %cst_53 = arith.constant 0.000000e+00 : f32
    %38 = vector.broadcast %cst_53 : f32 to vector<256x32xf32>
    %39 = arith.maximumf %37, %38 : vector<256x32xf32>
    %cst_54 = arith.constant 0.000000e+00 : f32
    %40 = vector.broadcast %cst_54 : f32 to vector<18x18x32xf32>
    %c0_55 = arith.constant 0 : index
    %c0_56 = arith.constant 0 : index
    %c0_57 = arith.constant 0 : index
    %41 = vector.load %arg8[%c0_55, %c0_56, %c0_57] : memref<18x18x32xf32, #tpu.memory_space<vmem>>, vector<18x18x32xf32>
    tpu.vector_store %arg8[%c0_55, %c0_56, %c0_57], %40 {strides = array<i32>} : memref<18x18x32xf32, #tpu.memory_space<vmem>>, vector<18x18x32xf32>,
    %42 = vector.shape_cast %39 : vector<256x32xf32> to vector<16x16x32xf32>
    %c1_58 = arith.constant 1 : index
    %c1_59 = arith.constant 1 : index
    %c0_60 = arith.constant 0 : index
    %43 = vector.load %arg8[%c1_58, %c1_59, %c0_60] : memref<18x18x32xf32, #tpu.memory_space<vmem>>, vector<16x16x32xf32>
    tpu.vector_store %arg8[%c1_58, %c1_59, %c0_60], %42 {strides = array<i32>} : memref<18x18x32xf32, #tpu.memory_space<vmem>>, vector<16x16x32xf32>,
    %c0_61 = arith.constant 0 : index
    %c0_62 = arith.constant 0 : index
    %c0_63 = arith.constant 0 : index
    %44 = vector.load %arg8[%c0_61, %c0_62, %c0_63] : memref<18x18x32xf32, #tpu.memory_space<vmem>>, vector<16x16x32xf32>
    %45 = vector.shape_cast %44 : vector<16x16x32xf32> to vector<256x32xf32>
    %c0_64 = arith.constant 0 : index
    %c0_65 = arith.constant 0 : index
    %46 = vector.load %arg10[%c0_64, %c0_65] : memref<256x288xf32, #tpu.memory_space<vmem>>, vector<256x32xf32>
    tpu.vector_store %arg10[%c0_64, %c0_65], %45 {strides = array<i32>} : memref<256x288xf32, #tpu.memory_space<vmem>>, vector<256x32xf32>,
    %c0_66 = arith.constant 0 : index
    %c1_67 = arith.constant 1 : index
    %c0_68 = arith.constant 0 : index
    %47 = vector.load %arg8[%c0_66, %c1_67, %c0_68] : memref<18x18x32xf32, #tpu.memory_space<vmem>>, vector<16x16x32xf32>
    %48 = vector.shape_cast %47 : vector<16x16x32xf32> to vector<256x32xf32>
    %c0_69 = arith.constant 0 : index
    %c32 = arith.constant 32 : index
    %49 = vector.load %arg10[%c0_69, %c32] : memref<256x288xf32, #tpu.memory_space<vmem>>, vector<256x32xf32>
    tpu.vector_store %arg10[%c0_69, %c32], %48 {strides = array<i32>} : memref<256x288xf32, #tpu.memory_space<vmem>>, vector<256x32xf32>,
    %c0_70 = arith.constant 0 : index
    %c2_71 = arith.constant 2 : index
    %c0_72 = arith.constant 0 : index
    %50 = vector.load %arg8[%c0_70, %c2_71, %c0_72] : memref<18x18x32xf32, #tpu.memory_space<vmem>>, vector<16x16x32xf32>
    %51 = vector.shape_cast %50 : vector<16x16x32xf32> to vector<256x32xf32>
    %c0_73 = arith.constant 0 : index
    %c64 = arith.constant 64 : index
    %52 = vector.load %arg10[%c0_73, %c64] : memref<256x288xf32, #tpu.memory_space<vmem>>, vector<256x32xf32>
    tpu.vector_store %arg10[%c0_73, %c64], %51 {strides = array<i32>} : memref<256x288xf32, #tpu.memory_space<vmem>>, vector<256x32xf32>,
    %c1_74 = arith.constant 1 : index
    %c0_75 = arith.constant 0 : index
    %c0_76 = arith.constant 0 : index
    %53 = vector.load %arg8[%c1_74, %c0_75, %c0_76] : memref<18x18x32xf32, #tpu.memory_space<vmem>>, vector<16x16x32xf32>
    %54 = vector.shape_cast %53 : vector<16x16x32xf32> to vector<256x32xf32>
    %c0_77 = arith.constant 0 : index
    %c96 = arith.constant 96 : index
    %55 = vector.load %arg10[%c0_77, %c96] : memref<256x288xf32, #tpu.memory_space<vmem>>, vector<256x32xf32>
    tpu.vector_store %arg10[%c0_77, %c96], %54 {strides = array<i32>} : memref<256x288xf32, #tpu.memory_space<vmem>>, vector<256x32xf32>,
    %c1_78 = arith.constant 1 : index
    %c1_79 = arith.constant 1 : index
    %c0_80 = arith.constant 0 : index
    %56 = vector.load %arg8[%c1_78, %c1_79, %c0_80] : memref<18x18x32xf32, #tpu.memory_space<vmem>>, vector<16x16x32xf32>
    %57 = vector.shape_cast %56 : vector<16x16x32xf32> to vector<256x32xf32>
    %c0_81 = arith.constant 0 : index
    %c128 = arith.constant 128 : index
    %58 = vector.load %arg10[%c0_81, %c128] : memref<256x288xf32, #tpu.memory_space<vmem>>, vector<256x32xf32>
    tpu.vector_store %arg10[%c0_81, %c128], %57 {strides = array<i32>} : memref<256x288xf32, #tpu.memory_space<vmem>>, vector<256x32xf32>,
    %c1_82 = arith.constant 1 : index
    %c2_83 = arith.constant 2 : index
    %c0_84 = arith.constant 0 : index
    %59 = vector.load %arg8[%c1_82, %c2_83, %c0_84] : memref<18x18x32xf32, #tpu.memory_space<vmem>>, vector<16x16x32xf32>
    %60 = vector.shape_cast %59 : vector<16x16x32xf32> to vector<256x32xf32>
    %c0_85 = arith.constant 0 : index
    %c160 = arith.constant 160 : index
    %61 = vector.load %arg10[%c0_85, %c160] : memref<256x288xf32, #tpu.memory_space<vmem>>, vector<256x32xf32>
    tpu.vector_store %arg10[%c0_85, %c160], %60 {strides = array<i32>} : memref<256x288xf32, #tpu.memory_space<vmem>>, vector<256x32xf32>,
    %c2_86 = arith.constant 2 : index
    %c0_87 = arith.constant 0 : index
    %c0_88 = arith.constant 0 : index
    %62 = vector.load %arg8[%c2_86, %c0_87, %c0_88] : memref<18x18x32xf32, #tpu.memory_space<vmem>>, vector<16x16x32xf32>
    %63 = vector.shape_cast %62 : vector<16x16x32xf32> to vector<256x32xf32>
    %c0_89 = arith.constant 0 : index
    %c192 = arith.constant 192 : index
    %64 = vector.load %arg10[%c0_89, %c192] : memref<256x288xf32, #tpu.memory_space<vmem>>, vector<256x32xf32>
    tpu.vector_store %arg10[%c0_89, %c192], %63 {strides = array<i32>} : memref<256x288xf32, #tpu.memory_space<vmem>>, vector<256x32xf32>,
    %c2_90 = arith.constant 2 : index
    %c1_91 = arith.constant 1 : index
    %c0_92 = arith.constant 0 : index
    %65 = vector.load %arg8[%c2_90, %c1_91, %c0_92] : memref<18x18x32xf32, #tpu.memory_space<vmem>>, vector<16x16x32xf32>
    %66 = vector.shape_cast %65 : vector<16x16x32xf32> to vector<256x32xf32>
    %c0_93 = arith.constant 0 : index
    %c224 = arith.constant 224 : index
    %67 = vector.load %arg10[%c0_93, %c224] : memref<256x288xf32, #tpu.memory_space<vmem>>, vector<256x32xf32>
    tpu.vector_store %arg10[%c0_93, %c224], %66 {strides = array<i32>} : memref<256x288xf32, #tpu.memory_space<vmem>>, vector<256x32xf32>,
    %c2_94 = arith.constant 2 : index
    %c2_95 = arith.constant 2 : index
    %c0_96 = arith.constant 0 : index
    %68 = vector.load %arg8[%c2_94, %c2_95, %c0_96] : memref<18x18x32xf32, #tpu.memory_space<vmem>>, vector<16x16x32xf32>
    %69 = vector.shape_cast %68 : vector<16x16x32xf32> to vector<256x32xf32>
    %c0_97 = arith.constant 0 : index
    %c256 = arith.constant 256 : index
    %70 = vector.load %arg10[%c0_97, %c256] : memref<256x288xf32, #tpu.memory_space<vmem>>, vector<256x32xf32>
    tpu.vector_store %arg10[%c0_97, %c256], %69 {strides = array<i32>} : memref<256x288xf32, #tpu.memory_space<vmem>>, vector<256x32xf32>,
    %c0_98 = arith.constant 0 : index
    %c0_99 = arith.constant 0 : index
    %71 = vector.load %arg4[%c0_98, %c0_99] : memref<32x288xf32, #tpu.memory_space<vmem>>, vector<32x288xf32>
    %c0_100 = arith.constant 0 : index
    %c0_101 = arith.constant 0 : index
    %72 = vector.load %arg10[%c0_100, %c0_101] : memref<256x288xf32, #tpu.memory_space<vmem>>, vector<256x288xf32>
    %cst_102 = arith.constant dense<0.000000e+00> : vector<32x256xf32>
    %73 = tpu.matmul %71, %72, %cst_102 {dimension_numbers = #tpu.dot_dimension_numbers<[1], [1], [0], [0], [0, 0, 1, 0], [], []>} : vector<32x288xf32>, vector<256x288xf32>, vector<32x256xf32> -> vector<32x256xf32>
    %c0_103 = arith.constant 0 : index
    %c0_104 = arith.constant 0 : index
    %74 = vector.load %arg5[%c0_103, %c0_104] : memref<32x1xf32, #tpu.memory_space<vmem>>, vector<32x1xf32>
    %75 = vector.broadcast %74 : vector<32x1xf32> to vector<32x256xf32>
    %76 = arith.addf %73, %75 : vector<32x256xf32>
    %cst_105 = arith.constant 0.000000e+00 : f32
    %77 = vector.broadcast %cst_105 : f32 to vector<32x256xf32>
    %78 = arith.maximumf %76, %77 : vector<32x256xf32>
    %c0_106 = arith.constant 0 : index
    %c0_107 = arith.constant 0 : index
    %c0_108 = arith.constant 0 : index
    %79 = vector.load %arg6[%c0_106, %c0_107, %c0_108] : memref<1x32x256xf32, #tpu.memory_space<vmem>>, vector<1x32x256xf32>
    %80 = vector.shape_cast %79 : vector<1x32x256xf32> to vector<32x256xf32>
    %81 = vector.shape_cast %78 : vector<32x256xf32> to vector<1x32x256xf32>
    tpu.vector_store %arg6[%c0_106, %c0_107, %c0_108], %81 {strides = array<i32>} : memref<1x32x256xf32, #tpu.memory_space<vmem>>, vector<1x32x256xf32>,
    return
  }
  func.func @transform_0(%arg0: i32) -> (i32, i32, i32, i32) {
    %c0_i32 = arith.constant 0 : i32
    %c0_i32_0 = arith.constant 0 : i32
    %c0_i32_1 = arith.constant 0 : i32
    %c0_i32_2 = arith.constant 0 : i32
    return %arg0, %c0_i32, %c0_i32_0, %c0_i32_1 : i32, i32, i32, i32
  }
  func.func @transform_1(%arg0: i32) -> (i32, i32) {
    %c0_i32 = arith.constant 0 : i32
    %c0_i32_0 = arith.constant 0 : i32
    %c0_i32_1 = arith.constant 0 : i32
    return %c0_i32, %c0_i32_0 : i32, i32
  }
  func.func @transform_2(%arg0: i32) -> (i32, i32) {
    %c0_i32 = arith.constant 0 : i32
    %c0_i32_0 = arith.constant 0 : i32
    %c0_i32_1 = arith.constant 0 : i32
    return %c0_i32, %c0_i32_0 : i32, i32
  }
  func.func @transform_3(%arg0: i32) -> (i32, i32) {
    %c0_i32 = arith.constant 0 : i32
    %c0_i32_0 = arith.constant 0 : i32
    %c0_i32_1 = arith.constant 0 : i32
    return %c0_i32, %c0_i32_0 : i32, i32
  }
  func.func @transform_4(%arg0: i32) -> (i32, i32) {
    %c0_i32 = arith.constant 0 : i32
    %c0_i32_0 = arith.constant 0 : i32
    %c0_i32_1 = arith.constant 0 : i32
    return %c0_i32, %c0_i32_0 : i32, i32
  }
  func.func @transform_5(%arg0: i32) -> (i32, i32, i32) {
    %c0_i32 = arith.constant 0 : i32
    %c0_i32_0 = arith.constant 0 : i32
    %c0_i32_1 = arith.constant 0 : i32
    return %arg0, %c0_i32, %c0_i32_0 : i32, i32, i32
  }
}

</mosaic_0001>

<bundles_post_ra>
// kernel: encoder_forward.1
= control target key start
LH: loop header
LB: loop body
LE: loop exit
PB: predicated region body
PF: predicated region fallthrough
CT: control target
= control target key end

     0   :  { %s4700_s18 = smov 0   ;;  %s6976_s0 = inlined_call_operand.vmem [shape: f32[2,16,16,1], index: 0, kind: input, shape index: {}]   ;;  %s6977_s1 = inlined_call_operand.vmem [shape: f32[9,32], index: 1, kind: input, shape index: {}]   ;;  %s6978_s2 = inlined_call_operand.vmem [shape: f32[1,32], index: 2, kind: input, shape index: {}]   ;;  %s6979_s3 = inlined_call_operand.vmem [shape: f32[32,288], index: 3, kind: input, shape index: {}]   ;;  %s6980_s4 = inlined_call_operand.vmem [shape: f32[32,1], index: 4, kind: input, shape index: {}]   ;;  %s6981_s5 = inlined_call_operand.vmem [shape: f32[2,32,256], index: 5, kind: output, shape index: {}]  }
   0x1 LB: > { %s4280_s19 = sadd.s32 4294967295, %s4654_s18   ;;  %p4284_p0 = scmp.ge.s32.totalorder %s4654_s18, 1  ;;  %s4654_s18 = sphi %s4700_s18, %s15_s18  }
   0x2   : > { %p187_p1 = scmp.lt.s32.totalorder %s4654_s18, 3 }
   0x4   : > { %p188_p2 = pnand %p4284_p0, %p187_p1 }
   0x5   : > { %vm225_vm0 = vcmask (!%p188_p2), 7168   ;;  %p4710_p3 = scmp.lt.s32.totalorder (!%p188_p2), %s4280_s19, 1  ;;  %vm228_vm1 = vcmask (!%p188_p2), 1024   ;;  %v4656_v0 = vmov (!%p188_p2), 0.0   ;;  %s4657_s25 = smov (!%p188_p2), 1   ;;  %vm570_vm2 = vcmask (!%p188_p2), 15368  }
   0x6   : > { %191 = sbr.rel (%p188_p2) target bundleno = 1347 (0x543), region = 40  ;;  %226 = vst.msk [vmem:[#allocation2] sm:$0xff] (!%p188_p2), %vm225_vm0, %v4656_v0  ;;  %227 = vst.msk [vmem:[#allocation2 + $0x8] sm:$0xff] (!%p188_p2), %vm225_vm0, %v4656_v0  ;;  %s4658_s26 = smov (!%p188_p2), 2   ;;  %vm763_vm3 = vcmask (!%p188_p2), 23568   ;;  %vm2093_vm4 = vcmask (!%p188_p2), 1040384  }
   0x7   : > { %230 = vst.msk [vmem:[#allocation2 + $0x18] sm:$0xff] (!%p188_p2), %vm225_vm0, %v4656_v0  ;;  %231 = vst.msk [vmem:[#allocation2 + $0x20] sm:$0xff] (!%p188_p2), %vm225_vm0, %v4656_v0  ;;  %s4659_s27 = smov (!%p188_p2), 3   ;;  %s4660_s28 = smov (!%p188_p2), 4   ;;  %vm4664_vm5 = vmmov (!%p188_p2), 1   ;;  %vm956_vm7 = vcmask (!%p188_p2), 31768  }
   0x8   : > { %233 = vst.msk [vmem:[#allocation2 + $0x30] sm:$0xff] (!%p188_p2), %vm225_vm0, %v4656_v0  ;;  %234 = vst.msk [vmem:[#allocation2 + $0x38] sm:$0xff] (!%p188_p2), %vm225_vm0, %v4656_v0  ;;  %s4661_s29 = smov (!%p188_p2), 5   ;;  %s4662_s30 = smov (!%p188_p2), 6   ;;  %vm1149_vm8 = vcmask (!%p188_p2), 39968   ;;  %vm1342_vm9 = vcmask (!%p188_p2), 48168  }
   0x9   : > { %236 = vst.msk [vmem:[#allocation2 + $0x48] sm:$0xff] (!%p188_p2), %vm225_vm0, %v4656_v0  ;;  %237 = vst.msk [vmem:[#allocation2 + $0x50] sm:$0xff] (!%p188_p2), %vm225_vm0, %v4656_v0  ;;  %s4663_s6 = smov (!%p188_p2), 7   ;;  %s4665_s11 = smov (!%p188_p2), 8   ;;  %vm1536_vm10 = vcmask (!%p188_p2), 56368   ;;  %vm1729_vm11 = vcmask (!%p188_p2), 64568  }
   0xa   : > { %239 = vst.msk [vmem:[#allocation2 + $0x60] sm:$0xff] (!%p188_p2), %vm225_vm0, %v4656_v0  ;;  %240 = vst.msk [vmem:[#allocation2 + $0x68] sm:$0xff] (!%p188_p2), %vm225_vm0, %v4656_v0  ;;  %vm1922_vm12 = vcmask (!%p188_p2), 72768   ;;  %vm1996_vm13 = vcmask (!%p188_p2), 72704   ;;  %vm2354_vm14 = vcmask (!%p188_p2), 261120   ;;  %vm2357_vm15 = vcmask (!%p188_p2), 254976  }
   0xb   : > { %242 = vst.msk [vmem:[#allocation2 + $0x78] sm:$0xff] (!%p188_p2), %vm225_vm0, %v4656_v0  ;;  %243 = vst.msk [vmem:[#allocation2 + $0x80] sm:$0xff] (!%p188_p2), %vm225_vm0, %v4656_v0  ;;  %s4666_s14 = smov (!%p188_p2), 32   ;;  %s4667_s15 = smov (!%p188_p2), 64  }
   0xc   : > { %245 = vst.msk [vmem:[#allocation2 + $0x90] sm:$0xff] (!%p188_p2), %vm225_vm0, %v4656_v0  ;;  %246 = vst.msk [vmem:[#allocation2 + $0x98] sm:$0xff] (!%p188_p2), %vm225_vm0, %v4656_v0  ;;  %s4668_s16 = smov (!%p188_p2), 96  }
   0xd   : > { %248 = vst.msk [vmem:[#allocation2 + $0xa8] sm:$0xff] %vm225_vm0, %v4656_v0  ;;  %249 = vst.msk [vmem:[#allocation2 + $0xb0] sm:$0xff] %vm225_vm0, %v4656_v0  ;;  %s6986_s19 = smov (!%p4710_p3, %s4280_s19), 1  ;;  %v410_v7 = vld [vmem:[#allocation2 + $0x1] sm:$0xff] }
   0xe   : > { %251 = vst.msk [vmem:[#allocation2 + $0xc0] sm:$0xff] %vm225_vm0, %v4656_v0  ;;  %252 = vst.msk [vmem:[#allocation2 + $0xc8] sm:$0xff] %vm225_vm0, %v4656_v0  ;;  %s4361_s21 = sshll.u32 %s6986_s19, 8  ;;  %474 = vrot.lane.b32.xlu0 %v410_v7, %s4657_s25  ;;  %v346_v45 = vld [vmem:[#allocation2] sm:$0xff]  ;;  %v347_v48 = vld [vmem:[#allocation2 + $0x8] sm:$0xff] }
   0xf   : > { %254 = vst.msk [vmem:[#allocation2 + $0xd8] sm:$0xff] %vm225_vm0, %v4656_v0  ;;  %255 = vst.msk [vmem:[#allocation2 + $0xe0] sm:$0xff] %vm225_vm0, %v4656_v0  ;;  %s4832_s24 = scalar_lea.vmem %s6976_s0, %s4361_s21 }
  0x10   : > { %257 = vst.msk [vmem:[#allocation2 + $0xf0] sm:$0xff] %vm225_vm0, %v4656_v0  ;;  %258 = vst.msk [vmem:[#allocation2 + $0xf8] sm:$0xff] %vm225_vm0, %v4656_v0  ;;  %v281_v1 = vld [vmem:[%s4832_s24] sm:$0xff]  ;;  %v282_v2 = vld [vmem:[%s4832_s24 + $0x8] sm:$0xff] }
  0x11   : > { %260 = vst.msk [vmem:[#allocation2 + $0x108] sm:$0xff] %vm225_vm0, %v4656_v0  ;;  %261 = vst.msk [vmem:[#allocation2 + $0x110] sm:$0xff] %vm225_vm0, %v4656_v0  ;;  %v283_v3 = vld [vmem:[%s4832_s24 + $0x10] sm:$0xff]  ;;  %v284_v4 = vld [vmem:[%s4832_s24 + $0x18] sm:$0xff] }
  0x12   : > { %263 = vst.msk [vmem:[#allocation2 + $0x120] sm:$0xff] %vm225_vm0, %v4656_v0  ;;  %264 = vst.msk [vmem:[#allocation2 + $0x128] sm:$0xff] %vm225_vm0, %v4656_v0  ;;  %v285_v5 = vld [vmem:[%s4832_s24 + $0x20] sm:$0xff]  ;;  %v286_v6 = vld [vmem:[%s4832_s24 + $0x28] sm:$0xff] }
  0x13   : > { %266 = vst.msk [vmem:[#allocation2 + $0x138] sm:$0xff] %vm225_vm0, %v4656_v0  ;;  %267 = vst.msk [vmem:[#allocation2 + $0x140] sm:$0xff] %vm225_vm0, %v4656_v0  ;;  %v287_v9 = vld [vmem:[%s4832_s24 + $0x30] sm:$0xff]  ;;  %v288_v10 = vld [vmem:[%s4832_s24 + $0x38] sm:$0xff] }
  0x14   : > { %269 = vst.msk [vmem:[#allocation2 + $0x150] sm:$0xff] %vm225_vm0, %v4656_v0  ;;  %270 = vst.msk [vmem:[#allocation2 + $0x158] sm:$0xff] %vm225_vm0, %v4656_v0  ;;  %v289_v11 = vld [vmem:[%s4832_s24 + $0x40] sm:$0xff]  ;;  %v290_v12 = vld [vmem:[%s4832_s24 + $0x48] sm:$0xff] }
  0x15   : > { %272 = vst.msk [vmem:[#allocation2 + $0x168] sm:$0xff] %vm225_vm0, %v4656_v0  ;;  %273 = vst.msk [vmem:[#allocation2 + $0x170] sm:$0xff] %vm225_vm0, %v4656_v0  ;;  %v291_v13 = vld [vmem:[%s4832_s24 + $0x50] sm:$0xff]  ;;  %v292_v14 = vld [vmem:[%s4832_s24 + $0x58] sm:$0xff] }
  0x16   : > { %275 = vst.msk [vmem:[#allocation2 + $0x180] sm:$0xff] %vm225_vm0, %v4656_v0  ;;  %276 = vst.msk [vmem:[#allocation2 + $0x188] sm:$0xff] %vm225_vm0, %v4656_v0  ;;  %v293_v15 = vld [vmem:[%s4832_s24 + $0x60] sm:$0xff]  ;;  %v294_v16 = vld [vmem:[%s4832_s24 + $0x68] sm:$0xff] }
  0x17   : > { %278 = vst.msk [vmem:[#allocation2 + $0x198] sm:$0xff] %vm225_vm0, %v4656_v0  ;;  %279 = vst.msk [vmem:[#allocation2 + $0x1a0] sm:$0xff] %vm225_vm0, %v4656_v0  ;;  %v295_v17 = vld [vmem:[%s4832_s24 + $0x70] sm:$0xff]  ;;  %v296_v18 = vld [vmem:[%s4832_s24 + $0x78] sm:$0xff] }
  0x18   : > { %229 = vst.msk [vmem:[#allocation2 + $0x10] sm:$0x3] %vm228_vm1, %v4656_v0  ;;  %232 = vst.msk [vmem:[#allocation2 + $0x28] sm:$0x3] %vm228_vm1, %v4656_v0  ;;  %v297_v19 = vld [vmem:[%s4832_s24 + $0x80] sm:$0xff]  ;;  %v298_v20 = vld [vmem:[%s4832_s24 + $0x88] sm:$0xff] }
  0x19   : > { %235 = vst.msk [vmem:[#allocation2 + $0x40] sm:$0x3] %vm228_vm1, %v4656_v0  ;;  %238 = vst.msk [vmem:[#allocation2 + $0x58] sm:$0x3] %vm228_vm1, %v4656_v0  ;;  %v299_v21 = vld [vmem:[%s4832_s24 + $0x90] sm:$0xff]  ;;  %v300_v22 = vld [vmem:[%s4832_s24 + $0x98] sm:$0xff] }
  0x1a   : > { %241 = vst.msk [vmem:[#allocation2 + $0x70] sm:$0x3] %vm228_vm1, %v4656_v0  ;;  %244 = vst.msk [vmem:[#allocation2 + $0x88] sm:$0x3] %vm228_vm1, %v4656_v0  ;;  %v301_v23 = vld [vmem:[%s4832_s24 + $0xa0] sm:$0xff]  ;;  %v302_v24 = vld [vmem:[%s4832_s24 + $0xa8] sm:$0xff] }
  0x1b   : > { %247 = vst.msk [vmem:[#allocation2 + $0xa0] sm:$0x3] %vm228_vm1, %v4656_v0  ;;  %250 = vst.msk [vmem:[#allocation2 + $0xb8] sm:$0x3] %vm228_vm1, %v4656_v0  ;;  %v303_v28 = vld [vmem:[%s4832_s24 + $0xb0] sm:$0xff]  ;;  %v304_v29 = vld [vmem:[%s4832_s24 + $0xb8] sm:$0xff] }
  0x1c   : > { %253 = vst.msk [vmem:[#allocation2 + $0xd0] sm:$0x3] %vm228_vm1, %v4656_v0  ;;  %256 = vst.msk [vmem:[#allocation2 + $0xe8] sm:$0x3] %vm228_vm1, %v4656_v0  ;;  %v305_v33 = vld [vmem:[%s4832_s24 + $0xc0] sm:$0xff]  ;;  %v306_v34 = vld [vmem:[%s4832_s24 + $0xc8] sm:$0xff] }
  0x1d   : > { %259 = vst.msk [vmem:[#allocation2 + $0x100] sm:$0x3] %vm228_vm1, %v4656_v0  ;;  %262 = vst.msk [vmem:[#allocation2 + $0x118] sm:$0x3] %vm228_vm1, %v4656_v0  ;;  %v307_v35 = vld [vmem:[%s4832_s24 + $0xd0] sm:$0xff]  ;;  %v308_v36 = vld [vmem:[%s4832_s24 + $0xd8] sm:$0xff] }
  0x1e   : > { %265 = vst.msk [vmem:[#allocation2 + $0x130] sm:$0x3] %vm228_vm1, %v4656_v0  ;;  %268 = vst.msk [vmem:[#allocation2 + $0x148] sm:$0x3] %vm228_vm1, %v4656_v0  ;;  %v309_v37 = vld [vmem:[%s4832_s24 + $0xe0] sm:$0xff]  ;;  %v310_v38 = vld [vmem:[%s4832_s24 + $0xe8] sm:$0xff] }
  0x1f   : > { %271 = vst.msk [vmem:[#allocation2 + $0x160] sm:$0x3] %vm228_vm1, %v4656_v0  ;;  %274 = vst.msk [vmem:[#allocation2 + $0x178] sm:$0x3] %vm228_vm1, %v4656_v0  ;;  %v411_v8 = vld [vmem:[#allocation2 + $0x9] sm:$0xff] }
  0x20   : > { %277 = vst.msk [vmem:[#allocation2 + $0x190] sm:$0x3] %vm228_vm1, %v4656_v0  ;;  %280 = vst.msk [vmem:[#allocation2 + $0x1a8] sm:$0x3] %vm228_vm1, %v4656_v0  ;;  %476 = vrot.lane.b32.xlu0 %v411_v8, %s4657_s25  ;;  %vm2860_vm1 = vcmask 785920  }
  0x21   : > { %314 = vst.msk [vmem:[#allocation2 + $0x19] sm:$0xff] %vm225_vm0, %v281_v1  ;;  %315 = vst.msk [vmem:[#allocation2 + $0x21] sm:$0xff] %vm225_vm0, %v282_v2 }
  0x22   : > { %316 = vst.msk [vmem:[#allocation2 + $0x31] sm:$0xff] %vm225_vm0, %v283_v3  ;;  %317 = vst.msk [vmem:[#allocation2 + $0x39] sm:$0xff] %vm225_vm0, %v284_v4 }
  0x23   : > { %318 = vst.msk [vmem:[#allocation2 + $0x49] sm:$0xff] %vm225_vm0, %v285_v5  ;;  %319 = vst.msk [vmem:[#allocation2 + $0x51] sm:$0xff] %vm225_vm0, %v286_v6 }
  0x24   : > { %320 = vst.msk [vmem:[#allocation2 + $0x61] sm:$0xff] %vm225_vm0, %v287_v9  ;;  %321 = vst.msk [vmem:[#allocation2 + $0x69] sm:$0xff] %vm225_vm0, %v288_v10 }
  0x25   : > { %322 = vst.msk [vmem:[#allocation2 + $0x79] sm:$0xff] %vm225_vm0, %v289_v11  ;;  %323 = vst.msk [vmem:[#allocation2 + $0x81] sm:$0xff] %vm225_vm0, %v290_v12 }
  0x26   : > { %324 = vst.msk [vmem:[#allocation2 + $0x91] sm:$0xff] %vm225_vm0, %v291_v13  ;;  %325 = vst.msk [vmem:[#allocation2 + $0x99] sm:$0xff] %vm225_vm0, %v292_v14 }
  0x27   : > { %326 = vst.msk [vmem:[#allocation2 + $0xa9] sm:$0xff] %vm225_vm0, %v293_v15  ;;  %327 = vst.msk [vmem:[#allocation2 + $0xb1] sm:$0xff] %vm225_vm0, %v294_v16 }
  0x28   : > { %328 = vst.msk [vmem:[#allocation2 + $0xc1] sm:$0xff] %vm225_vm0, %v295_v17  ;;  %329 = vst.msk [vmem:[#allocation2 + $0xc9] sm:$0xff] %vm225_vm0, %v296_v18  ;;  %v4877_v25 = vld [vmem:[#allocation2 + $0x19] sm:$0xff]  ;;  %v4886_v27 = vld [vmem:[#allocation2 + $0x21] sm:$0xff] }
  0x29   : > { %330 = vst.msk [vmem:[#allocation2 + $0xd9] sm:$0xff] %vm225_vm0, %v297_v19  ;;  %331 = vst.msk [vmem:[#allocation2 + $0xe1] sm:$0xff] %vm225_vm0, %v298_v20  ;;  %v4879_v26 = vld [vmem:[#allocation2 + $0x31] sm:$0xff]  ;;  %478 = vrot.lane.b32.xlu1 %v4877_v25, %s4657_s25  ;;  %v4898_v31 = vld [vmem:[#allocation2 + $0x39] sm:$0xff] }
  0x2a   : > { %332 = vst.msk [vmem:[#allocation2 + $0xf1] sm:$0xff] %vm225_vm0, %v299_v21  ;;  %333 = vst.msk [vmem:[#allocation2 + $0xf9] sm:$0xff] %vm225_vm0, %v300_v22  ;;  %482 = vrot.lane.b32.xlu0 %v4879_v26, %s4657_s25  ;;  %v4894_v30 = vld [vmem:[#allocation2 + $0x49] sm:$0xff]  ;;  %v4915_v39 = vld [vmem:[#allocation2 + $0x51] sm:$0xff] }
  0x2b   : > { %334 = vst.msk [vmem:[#allocation2 + $0x109] sm:$0xff] %vm225_vm0, %v301_v23  ;;  %335 = vst.msk [vmem:[#allocation2 + $0x111] sm:$0xff] %vm225_vm0, %v302_v24  ;;  %v4902_v32 = vld [vmem:[#allocation2 + $0x61] sm:$0xff]  ;;  %v4926_v41 = vld [vmem:[#allocation2 + $0x69] sm:$0xff] }
  0x2c   : > { %336 = vst.msk [vmem:[#allocation2 + $0x121] sm:$0xff] %vm225_vm0, %v303_v28  ;;  %337 = vst.msk [vmem:[#allocation2 + $0x129] sm:$0xff] %vm225_vm0, %v304_v29  ;;  %v4922_v40 = vld [vmem:[#allocation2 + $0x79] sm:$0xff]  ;;  %v4932_v43 = vld [vmem:[#allocation2 + $0x81] sm:$0xff] }
  0x2d   : > { %480 = vrot.lane.b32.xlu1 %v4886_v27, %s4657_s25  ;;  %338 = vst.msk [vmem:[#allocation2 + $0x139] sm:$0xff] %vm225_vm0, %v305_v33  ;;  %339 = vst.msk [vmem:[#allocation2 + $0x141] sm:$0xff] %vm225_vm0, %v306_v34  ;;  %v422_v42 = vld [vmem:[#allocation2 + $0x91] sm:$0xff]  ;;  %v423_v46 = vld [vmem:[#allocation2 + $0x99] sm:$0xff] }
  0x2e   : > { %486 = vrot.lane.b32.xlu0 %v4894_v30, %s4657_s25  ;;  %340 = vst.msk [vmem:[#allocation2 + $0x151] sm:$0xff] %vm225_vm0, %v307_v35  ;;  %341 = vst.msk [vmem:[#allocation2 + $0x159] sm:$0xff] %vm225_vm0, %v308_v36  ;;  %v424_v44 = vld [vmem:[#allocation2 + $0xa9] sm:$0xff]  ;;  %v4938_v47 = vld [vmem:[#allocation2 + $0x18] sm:$0xff] }
  0x2f   : > { %342 = vst.msk [vmem:[#allocation2 + $0x169] sm:$0xff] %vm225_vm0, %v309_v37  ;;  %343 = vst.msk [vmem:[#allocation2 + $0x171] sm:$0xff] %vm225_vm0, %v310_v38  ;;  %v4944_v49 = vld [vmem:[#allocation2 + $0x20] sm:$0xff]  ;;  %v4946_v50 = vld [vmem:[#allocation2 + $0x30] sm:$0xff] }
  0x30   : > { %378 = vst.msk [vmem:[#allocation4] sm:$0xff] %vm225_vm0, %v346_v45  ;;  %380 = vst.msk [vmem:[#allocation4 + $0x10] sm:$0xff] %vm225_vm0, %v4938_v47  ;;  %v426_v51 = vld [vmem:[#allocation2 + $0xc1] sm:$0xff]  ;;  %v4952_v52 = vld [vmem:[#allocation2 + $0x38] sm:$0xff] }
  0x31   : > { %484 = vrot.lane.b32.xlu1 %v4898_v31, %s4657_s25  ;;  %379 = vst.msk [vmem:[#allocation4 + $0x8] sm:$0xff] %vm225_vm0, %v347_v48  ;;  %381 = vst.msk [vmem:[#allocation4 + $0x18] sm:$0xff] %vm225_vm0, %v4944_v49  ;;  %v425_v53 = vld [vmem:[#allocation2 + $0xb1] sm:$0xff]  ;;  %v4957_v54 = vld [vmem:[#allocation2 + $0x48] sm:$0xff] }
  0x32   : > { %490 = vrot.lane.b32.xlu0 %v4902_v32, %s4657_s25  ;;  %382 = vst.msk [vmem:[#allocation4 + $0x20] sm:$0xff] %vm225_vm0, %v4946_v50  ;;  %383 = vst.msk [vmem:[#allocation4 + $0x28] sm:$0xff] %vm225_vm0, %v4952_v52  ;;  %v4959_v55 = vld [vmem:[#allocation2 + $0x50] sm:$0xff]  ;;  %v428_v56 = vld [vmem:[#allocation2 + $0xd9] sm:$0xff] }
  0x33   : > { %384 = vst.msk [vmem:[#allocation4 + $0x30] sm:$0xff] %vm225_vm0, %v4957_v54  ;;  %385 = vst.msk [vmem:[#allocation4 + $0x38] sm:$0xff] %vm225_vm0, %v4959_v55  ;;  %v4965_v57 = vld [vmem:[#allocation2 + $0x60] sm:$0xff]  ;;  %v4967_v58 = vld [vmem:[#allocation2 + $0x68] sm:$0xff] }
  0x34   : > { %v4969_v59 = vld [vmem:[#allocation2 + $0x78] sm:$0xff]  ;;  %386 = vst.msk [vmem:[#allocation4 + $0x40] sm:$0xff] %vm225_vm0, %v4965_v57  ;;  %387 = vst.msk [vmem:[#allocation4 + $0x48] sm:$0xff] %vm225_vm0, %v4967_v58  ;;  %v4978_v60 = vld [vmem:[#allocation2 + $0x80] sm:$0xff] }
  0x35   : > { %488 = vrot.lane.b32.xlu1 %v4915_v39, %s4657_s25  ;;  %388 = vst.msk [vmem:[#allocation4 + $0x50] sm:$0xff] %vm225_vm0, %v4969_v59  ;;  %v4980_v61 = vld [vmem:[#allocation2 + $0x90] sm:$0xff]  ;;  %v4982_v62 = vld [vmem:[#allocation2 + $0x98] sm:$0xff]  ;;  %389 = vst.msk [vmem:[#allocation4 + $0x58] sm:$0xff] %vm225_vm0, %v4978_v60 }
  0x36   : > { %494 = vrot.lane.b32.xlu0 %v4922_v40, %s4657_s25  ;;  %v427_v63 = vld [vmem:[#allocation2 + $0xc9] sm:$0xff]  ;;  %390 = vst.msk [vmem:[#allocation4 + $0x60] sm:$0xff] %vm225_vm0, %v4980_v61  ;;  %391 = vst.msk [vmem:[#allocation4 + $0x68] sm:$0xff] %vm225_vm0, %v4982_v62  ;;  %v4994_v3 = vld [vmem:[#allocation2 + $0xc0] sm:$0xff] }
  0x37   : > { %v4990_v1 = vld [vmem:[#allocation2 + $0xa8] sm:$0xff]  ;;  %v4992_v2 = vld [vmem:[#allocation2 + $0xb0] sm:$0xff]  ;;  %394 = vst.msk [vmem:[#allocation4 + $0x80] sm:$0xff] %vm225_vm0, %v4994_v3  ;;  %v5005_v5 = vld [vmem:[#allocation2 + $0xd8] sm:$0xff] }
  0x38   : > { %392 = vst.msk [vmem:[#allocation4 + $0x70] sm:$0xff] %vm225_vm0, %v4990_v1  ;;  %393 = vst.msk [vmem:[#allocation4 + $0x78] sm:$0xff] %vm225_vm0, %v4992_v2  ;;  %v5003_v4 = vld [vmem:[#allocation2 + $0xc8] sm:$0xff]  ;;  %v5007_v6 = vld [vmem:[#allocation2 + $0xe0] sm:$0xff] }
  0x39   : > { %492 = vrot.lane.b32.xlu1 %v4926_v41, %s4657_s25  ;;  %395 = vst.msk [vmem:[#allocation4 + $0x88] sm:$0xff] %vm225_vm0, %v5003_v4  ;;  %396 = vst.msk [vmem:[#allocation4 + $0x90] sm:$0xff] %vm225_vm0, %v5005_v5  ;;  %v5015_v7 = vld [vmem:[#allocation2 + $0xf0] sm:$0xff]  ;;  %v5017_v8 = vld [vmem:[#allocation2 + $0xf8] sm:$0xff] }
  0x3a   : > { %498 = vrot.lane.b32.xlu0 %v422_v42, %s4657_s25  ;;  %397 = vst.msk [vmem:[#allocation4 + $0x98] sm:$0xff] %vm225_vm0, %v5007_v6  ;;  %v5019_v9 = vld [vmem:[#allocation2 + $0x108] sm:$0xff]  ;;  %398 = vst.msk [vmem:[#allocation4 + $0xa0] sm:$0xff] %vm225_vm0, %v5015_v7  ;;  %v5028_v10 = vld [vmem:[#allocation2 + $0x110] sm:$0xff] }
  0x3b   : > { %399 = vst.msk [vmem:[#allocation4 + $0xa8] sm:$0xff] %vm225_vm0, %v5017_v8  ;;  %400 = vst.msk [vmem:[#allocation4 + $0xb0] sm:$0xff] %vm225_vm0, %v5019_v9  ;;  %v430_v11 = vld [vmem:[#allocation2 + $0xf1] sm:$0xff]  ;;  %v5032_v12 = vld [vmem:[#allocation2 + $0x120] sm:$0xff] }
  0x3c   : > { %401 = vst.msk [vmem:[#allocation4 + $0xb8] sm:$0xff] %vm225_vm0, %v5028_v10  ;;  %402 = vst.msk [vmem:[#allocation4 + $0xc0] sm:$0xff] %vm225_vm0, %v5032_v12  ;;  %v5037_v13 = vld [vmem:[#allocation2 + $0x128] sm:$0xff]  ;;  %v5042_v16 = vld [vmem:[#allocation2 + $0x138] sm:$0xff] }
  0x3d   : > { %496 = vrot.lane.b32.xlu1 %v4932_v43, %s4657_s25  ;;  %v429_v14 = vld [vmem:[#allocation2 + $0xe1] sm:$0xff]  ;;  %403 = vst.msk [vmem:[#allocation4 + $0xc8] sm:$0xff] %vm225_vm0, %v5037_v13  ;;  %v432_v15 = vld [vmem:[#allocation2 + $0x109] sm:$0xff]  ;;  %404 = vst.msk [vmem:[#allocation4 + $0xd0] sm:$0xff] %vm225_vm0, %v5042_v16 }
  0x3e   : > { %502 = vrot.lane.b32.xlu0 %v424_v44, %s4657_s25  ;;  %v5047_v17 = vld [vmem:[#allocation2 + $0x140] sm:$0xff]  ;;  %v5052_v20 = vld [vmem:[#allocation2 + $0x150] sm:$0xff]  ;;  %v5057_v21 = vld [vmem:[#allocation2 + $0x158] sm:$0xff]  ;;  %2360 = vst.msk [vmem:[#allocation3 + $0x20] sm:$0xff] %vm2354_vm14, %v4656_v0 }
  0x3f   : > { %v431_v18 = vld [vmem:[#allocation2 + $0xf9] sm:$0xff]  ;;  %405 = vst.msk [vmem:[#allocation4 + $0xd8] sm:$0xff] %vm225_vm0, %v5047_v17  ;;  %v434_v19 = vld [vmem:[#allocation2 + $0x121] sm:$0xff]  ;;  %406 = vst.msk [vmem:[#allocation4 + $0xe0] sm:$0xff] %vm225_vm0, %v5052_v20 }
  0x40   : > { %v433_v22 = vld [vmem:[#allocation2 + $0x111] sm:$0xff]  ;;  %407 = vst.msk [vmem:[#allocation4 + $0xe8] sm:$0xff] %vm225_vm0, %v5057_v21  ;;  %v436_v23 = vld [vmem:[#allocation2 + $0x139] sm:$0xff]  ;;  %v376_v24 = vld [vmem:[#allocation2 + $0x168] sm:$0xff] }
  0x41   : > { %500 = vrot.lane.b32.xlu1 %v423_v46, %s4657_s25  ;;  %408 = vst.msk [vmem:[#allocation4 + $0xf0] sm:$0xff] %vm225_vm0, %v376_v24  ;;  %v377_v28 = vld [vmem:[#allocation2 + $0x170] sm:$0xff]  ;;  %v437_v34 = vld [vmem:[#allocation2 + $0x141] sm:$0xff]  ;;  %v439_v36 = vld [vmem:[#allocation2 + $0x159] sm:$0xff] }
  0x42   : > { %506 = vrot.lane.b32.xlu0 %v426_v51, %s4657_s25  ;;  %v435_v29 = vld [vmem:[#allocation2 + $0x129] sm:$0xff]  ;;  %409 = vst.msk [vmem:[#allocation4 + $0xf8] sm:$0xff] %vm225_vm0, %v377_v28  ;;  %v438_v33 = vld [vmem:[#allocation2 + $0x151] sm:$0xff]  ;;  %v5072_v42 = vld [vmem:[#allocation2 + $0x1a] sm:$0xff] }
  0x43   : > { %v440_v35 = vld [vmem:[#allocation2 + $0x169] sm:$0xff]  ;;  %v441_v38 = vld [vmem:[#allocation2 + $0x171] sm:$0xff]  ;;  %v5088_v51 = vld [vmem:[#allocation2 + $0x3a] sm:$0xff]  ;;  %2361 = vst.msk [vmem:[#allocation3 + $0x28] sm:$0x3] %vm2357_vm15, %v4656_v0 }
  0x44   : > { %v603_v37 = vld [vmem:[#allocation2 + $0x2] sm:$0xff]  ;;  %v604_v44 = vld [vmem:[#allocation2 + $0xa] sm:$0xff]  ;;  %v5077_v45 = vld [vmem:[#allocation2 + $0x32] sm:$0xff]  ;;  %2355 = vst.msk [vmem:[#allocation3] sm:$0xff] %vm2354_vm14, %v4656_v0 }
  0x45   : > { %504 = vrot.lane.b32.xlu1 %v425_v53, %s4657_s25  ;;  %v5080_v46 = vld [vmem:[#allocation2 + $0x22] sm:$0xff]  ;;  %v5084_v48 = vld [vmem:[#allocation2 + $0x4a] sm:$0xff]  ;;  %v621_v24 = vld [vmem:[#allocation2 + $0xda] sm:$0xff]  ;;  %2356 = vst.msk [vmem:[#allocation3 + $0x8] sm:$0xff] %vm2354_vm14, %v4656_v0 }
  0x46   : > { %510 = vrot.lane.b32.xlu0 %v428_v56, %s4657_s25  ;;  %v5092_v53 = vld [vmem:[#allocation2 + $0x62] sm:$0xff]  ;;  %v5096_v56 = vld [vmem:[#allocation2 + $0x52] sm:$0xff]  ;;  %v5134_v28 = vld [vmem:[#allocation2 + $0xca] sm:$0xff]  ;;  %2358 = vst.msk [vmem:[#allocation3 + $0x10] sm:$0x3] %vm2357_vm15, %v4656_v0 }
  0x47   : > { %vm4490_vm6 = vmpackc.low %vm2093_vm4, %vm4664_vm5  ;;  %2359 = vst.msk [vmem:[#allocation3 + $0x18] sm:$0xff] %vm2354_vm14, %v4656_v0 }
  0x48   : > { %2362 = vst.msk [vmem:[#allocation3 + $0x30] sm:$0xff] %vm2354_vm14, %v4656_v0  ;;  %2363 = vst.msk [vmem:[#allocation3 + $0x38] sm:$0xff] %vm2354_vm14, %v4656_v0 }
  0x49   : > { %508 = vrot.lane.b32.xlu1 %v427_v63, %s4657_s25  ;;  %v5100_v63 = vld [vmem:[#allocation2 + $0x7a] sm:$0xff]  ;;  %2364 = vst.msk [vmem:[#allocation3 + $0x40] sm:$0x3] %vm2357_vm15, %v4656_v0  ;;  %2367 = vst.msk [vmem:[#allocation3 + $0x58] sm:$0x3] %vm2357_vm15, %v4656_v0 }
  0x4a   : > { %514 = vrot.lane.b32.xlu0 %v430_v11, %s4657_s25  ;;  %v5104_v11 = vld [vmem:[#allocation2 + $0x6a] sm:$0xff]  ;;  %2365 = vst.msk [vmem:[#allocation3 + $0x48] sm:$0xff] %vm2354_vm14, %v4656_v0  ;;  %2366 = vst.msk [vmem:[#allocation3 + $0x50] sm:$0xff] %vm2354_vm14, %v4656_v0 }
  0x4b   : > { %2368 = vst.msk [vmem:[#allocation3 + $0x60] sm:$0xff] %vm2354_vm14, %v4656_v0  ;;  %2369 = vst.msk [vmem:[#allocation3 + $0x68] sm:$0xff] %vm2354_vm14, %v4656_v0 }
  0x4c   : > { %2370 = vst.msk [vmem:[#allocation3 + $0x70] sm:$0x3] %vm2357_vm15, %v4656_v0  ;;  %2373 = vst.msk [vmem:[#allocation3 + $0x88] sm:$0x3] %vm2357_vm15, %v4656_v0 }
  0x4d   : > { %512 = vrot.lane.b32.xlu1 %v429_v14, %s4657_s25  ;;  %v5108_v14 = vld [vmem:[#allocation2 + $0x92] sm:$0xff]  ;;  %2371 = vst.msk [vmem:[#allocation3 + $0x78] sm:$0xff] %vm2354_vm14, %v4656_v0  ;;  %2372 = vst.msk [vmem:[#allocation3 + $0x80] sm:$0xff] %vm2354_vm14, %v4656_v0 }
  0x4e   : > { %518 = vrot.lane.b32.xlu0 %v432_v15, %s4657_s25  ;;  %v5112_v15 = vld [vmem:[#allocation2 + $0x82] sm:$0xff]  ;;  %2374 = vst.msk [vmem:[#allocation3 + $0x90] sm:$0xff] %vm2354_vm14, %v4656_v0  ;;  %2375 = vst.msk [vmem:[#allocation3 + $0x98] sm:$0xff] %vm2354_vm14, %v4656_v0 }
  0x4f   : > { %2376 = vst.msk [vmem:[#allocation3 + $0xa0] sm:$0x3] %vm2357_vm15, %v4656_v0  ;;  %2379 = vst.msk [vmem:[#allocation3 + $0xb8] sm:$0x3] %vm2357_vm15, %v4656_v0 }
  0x50   : > { %2377 = vst.msk [vmem:[#allocation3 + $0xa8] sm:$0xff] %vm2354_vm14, %v4656_v0  ;;  %2378 = vst.msk [vmem:[#allocation3 + $0xb0] sm:$0xff] %vm2354_vm14, %v4656_v0 }
  0x51   : > { %516 = vrot.lane.b32.xlu1 %v431_v18, %s4657_s25  ;;  %v5116_v18 = vld [vmem:[#allocation2 + $0xaa] sm:$0xff]  ;;  %2380 = vst.msk [vmem:[#allocation3 + $0xc0] sm:$0xff] %vm2354_vm14, %v4656_v0  ;;  %2381 = vst.msk [vmem:[#allocation3 + $0xc8] sm:$0xff] %vm2354_vm14, %v4656_v0 }
  0x52   : > { %522 = vrot.lane.b32.xlu0 %v434_v19, %s4657_s25  ;;  %v5120_v19 = vld [vmem:[#allocation2 + $0x9a] sm:$0xff]  ;;  %2382 = vst.msk [vmem:[#allocation3 + $0xd0] sm:$0x3] %vm2357_vm15, %v4656_v0  ;;  %2385 = vst.msk [vmem:[#allocation3 + $0xe8] sm:$0x3] %vm2357_vm15, %v4656_v0 }
  0x53   : > { %2383 = vst.msk [vmem:[#allocation3 + $0xd8] sm:$0xff] %vm2354_vm14, %v4656_v0  ;;  %2384 = vst.msk [vmem:[#allocation3 + $0xe0] sm:$0xff] %vm2354_vm14, %v4656_v0 }
  0x54   : > { %2386 = vst.msk [vmem:[#allocation3 + $0xf0] sm:$0xff] %vm2354_vm14, %v4656_v0  ;;  %2387 = vst.msk [vmem:[#allocation3 + $0xf8] sm:$0xff] %vm2354_vm14, %v4656_v0 }
  0x55   : > { %520 = vrot.lane.b32.xlu1 %v433_v22, %s4657_s25  ;;  %v5124_v22 = vld [vmem:[#allocation2 + $0xc2] sm:$0xff]  ;;  %2388 = vst.msk [vmem:[#allocation3 + $0x100] sm:$0x3] %vm2357_vm15, %v4656_v0  ;;  %2391 = vst.msk [vmem:[#allocation3 + $0x118] sm:$0x3] %vm2357_vm15, %v4656_v0 }
  0x56   : > { %526 = vrot.lane.b32.xlu0 %v436_v23, %s4657_s25  ;;  %v5128_v23 = vld [vmem:[#allocation2 + $0xb2] sm:$0xff]  ;;  %2389 = vst.msk [vmem:[#allocation3 + $0x108] sm:$0xff] %vm2354_vm14, %v4656_v0  ;;  %2390 = vst.msk [vmem:[#allocation3 + $0x110] sm:$0xff] %vm2354_vm14, %v4656_v0 }
  0x57   : > { %2392 = vst.msk [vmem:[#allocation3 + $0x120] sm:$0xff] %vm2354_vm14, %v4656_v0  ;;  %2393 = vst.msk [vmem:[#allocation3 + $0x128] sm:$0xff] %vm2354_vm14, %v4656_v0 }
  0x58   : > { %2394 = vst.msk [vmem:[#allocation3 + $0x130] sm:$0x3] %vm2357_vm15, %v4656_v0  ;;  %2397 = vst.msk [vmem:[#allocation3 + $0x148] sm:$0x3] %vm2357_vm15, %v4656_v0 }
  0x59   : > { %524 = vrot.lane.b32.xlu1 %v435_v29, %s4657_s25  ;;  %v623_v29 = vld [vmem:[#allocation2 + $0xf2] sm:$0xff]  ;;  %2395 = vst.msk [vmem:[#allocation3 + $0x138] sm:$0xff] %vm2354_vm14, %v4656_v0  ;;  %2396 = vst.msk [vmem:[#allocation3 + $0x140] sm:$0xff] %vm2354_vm14, %v4656_v0 }
  0x5a   : > { %530 = vrot.lane.b32.xlu0 %v438_v33, %s4657_s25  ;;  %v622_v33 = vld [vmem:[#allocation2 + $0xe2] sm:$0xff]  ;;  %2398 = vst.msk [vmem:[#allocation3 + $0x150] sm:$0xff] %vm2354_vm14, %v4656_v0  ;;  %2399 = vst.msk [vmem:[#allocation3 + $0x158] sm:$0xff] %vm2354_vm14, %v4656_v0 }
  0x5b   : > { %2400 = vst.msk [vmem:[#allocation3 + $0x160] sm:$0x3] %vm2357_vm15, %v4656_v0  ;;  %2403 = vst.msk [vmem:[#allocation3 + $0x178] sm:$0x3] %vm2357_vm15, %v4656_v0 }
  0x5c   : > { %2401 = vst.msk [vmem:[#allocation3 + $0x168] sm:$0xff] %vm2354_vm14, %v4656_v0  ;;  %2402 = vst.msk [vmem:[#allocation3 + $0x170] sm:$0xff] %vm2354_vm14, %v4656_v0 }
  0x5d   : > { %528 = vrot.lane.b32.xlu1 %v437_v34, %s4657_s25  ;;  %v625_v34 = vld [vmem:[#allocation2 + $0x10a] sm:$0xff]  ;;  %2404 = vst.msk [vmem:[#allocation3 + $0x180] sm:$0xff] %vm2354_vm14, %v4656_v0  ;;  %2405 = vst.msk [vmem:[#allocation3 + $0x188] sm:$0xff] %vm2354_vm14, %v4656_v0 }
  0x5e   : > { %534 = vrot.lane.b32.xlu0 %v440_v35, %s4657_s25  ;;  %v624_v35 = vld [vmem:[#allocation2 + $0xfa] sm:$0xff]  ;;  %2406 = vst.msk [vmem:[#allocation3 + $0x190] sm:$0x3] %vm2357_vm15, %v4656_v0  ;;  %2409 = vst.msk [vmem:[#allocation3 + $0x1a8] sm:$0x3] %vm2357_vm15, %v4656_v0 }
  0x5f   : > { %2407 = vst.msk [vmem:[#allocation3 + $0x198] sm:$0xff] %vm2354_vm14, %v4656_v0  ;;  %2408 = vst.msk [vmem:[#allocation3 + $0x1a0] sm:$0xff] %vm2354_vm14, %v4656_v0 }
  0x61   : > { %532 = vrot.lane.b32.xlu1 %v439_v36, %s4657_s25  ;;  %v627_v36 = vld [vmem:[#allocation2 + $0x122] sm:$0xff] }
  0x62   : > { %667 = vrot.lane.b32.xlu0 %v603_v37, %s4658_s26  ;;  %v626_v37 = vld [vmem:[#allocation2 + $0x112] sm:$0xff] }
  0x65   : > { %536 = vrot.lane.b32.xlu1 %v441_v38, %s4657_s25  ;;  %v629_v38 = vld [vmem:[#allocation2 + $0x13a] sm:$0xff] }
  0x66   : > { %671 = vrot.lane.b32.xlu0 %v5072_v42, %s4658_s26 }
  0x69   : > { %669 = vrot.lane.b32.xlu1 %v604_v44, %s4658_s26 }
  0x6a   : > { %675 = vrot.lane.b32.xlu0 %v5077_v45, %s4658_s26 }
  0x6d   : > { %673 = vrot.lane.b32.xlu1 %v5080_v46, %s4658_s26 }
  0x6e   : > { %679 = vrot.lane.b32.xlu0 %v5084_v48, %s4658_s26 }
  0x71   : > { %677 = vrot.lane.b32.xlu1 %v5088_v51, %s4658_s26 }
  0x72   : > { %683 = vrot.lane.b32.xlu0 %v5092_v53, %s4658_s26 }
  0x75   : > { %681 = vrot.lane.b32.xlu1 %v5096_v56, %s4658_s26 }
  0x76   : > { %687 = vrot.lane.b32.xlu0 %v5100_v63, %s4658_s26 }
  0x79   : > { %685 = vrot.lane.b32.xlu1 %v5104_v11, %s4658_s26 }
  0x7a   : > { %691 = vrot.lane.b32.xlu0 %v5108_v14, %s4658_s26 }
  0x7d   : > { %689 = vrot.lane.b32.xlu1 %v5112_v15, %s4658_s26 }
  0x7e   : > { %695 = vrot.lane.b32.xlu0 %v5116_v18, %s4658_s26 }
  0x80   : > { %v475_v44 = vpop.permute.xlu0 %474 }
  0x81   : > { %693 = vrot.lane.b32.xlu1 %v5120_v19, %s4658_s26  ;;  %571 = vst.msk [vmem:[#allocation4] sm:$0xff] %vm570_vm2, %v475_v44  ;;  %v632_v44 = vld [vmem:[#allocation2 + $0x15a] sm:$0xff] }
  0x82   : > { %699 = vrot.lane.b32.xlu0 %v5124_v22, %s4658_s26 }
  0x85   : > { %697 = vrot.lane.b32.xlu1 %v5128_v23, %s4658_s26 }
  0x86   : > { %703 = vrot.lane.b32.xlu0 %v621_v24, %s4658_s26  ;;  %v628_v24 = vld [vmem:[#allocation2 + $0x12a] sm:$0xff] }
  0x89   : > { %701 = vrot.lane.b32.xlu1 %v5134_v28, %s4658_s26 }
  0x8a   : > { %707 = vrot.lane.b32.xlu0 %v623_v29, %s4658_s26  ;;  %v631_v29 = vld [vmem:[#allocation2 + $0x152] sm:$0xff] }
  0x8d   : > { %705 = vrot.lane.b32.xlu1 %v622_v33, %s4658_s26 }
  0x8e   : > { %711 = vrot.lane.b32.xlu0 %v625_v34, %s4658_s26  ;;  %v630_v34 = vld [vmem:[#allocation2 + $0x142] sm:$0xff] }
  0x91   : > { %709 = vrot.lane.b32.xlu1 %v624_v35, %s4658_s26 }
  0x92   : > { %715 = vrot.lane.b32.xlu0 %v627_v36, %s4658_s26  ;;  %v477_v33 = vpop.permute.xlu0 %476  ;;  %v633_v36 = vld [vmem:[#allocation2 + $0x16a] sm:$0xff] }
  0x93   : > { %572 = vst.msk [vmem:[#allocation4 + $0x8] sm:$0xff] %vm570_vm2, %v477_v33 }
  0x95   : > { %713 = vrot.lane.b32.xlu1 %v626_v37, %s4658_s26 }
  0x96   : > { %719 = vrot.lane.b32.xlu0 %v629_v38, %s4658_s26 }
  0x99   : > { %717 = vrot.lane.b32.xlu1 %v628_v24, %s4658_s26 }
  0x9a   : > { %723 = vrot.lane.b32.xlu0 %v631_v29, %s4658_s26  ;;  %v634_v29 = vld [vmem:[#allocation2 + $0x172] sm:$0xff] }
  0x9b   : > { %v479_v35 = vpop.permute.xlu1 %478 }
  0x9c   : > { %573 = vst.msk [vmem:[#allocation4 + $0x10] sm:$0xff] %vm570_vm2, %v479_v35  ;;  %v483_v37 = vpop.permute.xlu0 %482 }
  0x9d   : > { %721 = vrot.lane.b32.xlu1 %v630_v34, %s4658_s26  ;;  %575 = vst.msk [vmem:[#allocation4 + $0x20] sm:$0xff] %vm570_vm2, %v483_v37 }
  0x9e   : > { %727 = vrot.lane.b32.xlu0 %v633_v36, %s4658_s26 }
  0x9f   : > { %v481_v38 = vpop.permute.xlu1 %480 }
  0xa0   : > { %574 = vst.msk [vmem:[#allocation4 + $0x18] sm:$0xff] %vm570_vm2, %v481_v38  ;;  %v487_v24 = vpop.permute.xlu0 %486 }
  0xa1   : > { %725 = vrot.lane.b32.xlu1 %v632_v44, %s4658_s26  ;;  %577 = vst.msk [vmem:[#allocation4 + $0x30] sm:$0xff] %vm570_vm2, %v487_v24 }
  0xa2   : > { %860 = vrot.lane.b32.xlu0 %v4938_v47, %s4659_s27 }
  0xa3   : > { %v485_v33 = vpop.permute.xlu1 %484 }
  0xa4   : > { %576 = vst.msk [vmem:[#allocation4 + $0x28] sm:$0xff] %vm570_vm2, %v485_v33  ;;  %v491_v34 = vpop.permute.xlu0 %490 }
  0xa5   : > { %729 = vrot.lane.b32.xlu1 %v634_v29, %s4658_s26  ;;  %579 = vst.msk [vmem:[#allocation4 + $0x40] sm:$0xff] %vm570_vm2, %v491_v34 }
  0xa6   : > { %864 = vrot.lane.b32.xlu0 %v4946_v50, %s4659_s27 }
  0xa7   : > { %v489_v35 = vpop.permute.xlu1 %488 }
  0xa8   : > { %578 = vst.msk [vmem:[#allocation4 + $0x38] sm:$0xff] %vm570_vm2, %v489_v35  ;;  %v495_v36 = vpop.permute.xlu0 %494 }
  0xa9   : > { %862 = vrot.lane.b32.xlu1 %v4944_v49, %s4659_s27  ;;  %581 = vst.msk [vmem:[#allocation4 + $0x50] sm:$0xff] %vm570_vm2, %v495_v36 }
  0xaa   : > { %868 = vrot.lane.b32.xlu0 %v4957_v54, %s4659_s27 }
  0xab   : > { %v493_v47 = vpop.permute.xlu1 %492 }
  0xac   : > { %580 = vst.msk [vmem:[#allocation4 + $0x48] sm:$0xff] %vm570_vm2, %v493_v47  ;;  %v499_v37 = vpop.permute.xlu0 %498 }
  0xad   : > { %866 = vrot.lane.b32.xlu1 %v4952_v52, %s4659_s27  ;;  %583 = vst.msk [vmem:[#allocation4 + $0x60] sm:$0xff] %vm570_vm2, %v499_v37 }
  0xae   : > { %872 = vrot.lane.b32.xlu0 %v4965_v57, %s4659_s27 }
  0xaf   : > { %v497_v44 = vpop.permute.xlu1 %496 }
  0xb0   : > { %582 = vst.msk [vmem:[#allocation4 + $0x58] sm:$0xff] %vm570_vm2, %v497_v44  ;;  %v503_v49 = vpop.permute.xlu0 %502 }
  0xb1   : > { %870 = vrot.lane.b32.xlu1 %v4959_v55, %s4659_s27  ;;  %585 = vst.msk [vmem:[#allocation4 + $0x70] sm:$0xff] %vm570_vm2, %v503_v49 }
  0xb2   : > { %876 = vrot.lane.b32.xlu0 %v4969_v59, %s4659_s27 }
  0xb3   : > { %v501_v38 = vpop.permute.xlu1 %500 }
  0xb4   : > { %584 = vst.msk [vmem:[#allocation4 + $0x68] sm:$0xff] %vm570_vm2, %v501_v38  ;;  %v507_v24 = vpop.permute.xlu0 %506 }
  0xb5   : > { %874 = vrot.lane.b32.xlu1 %v4967_v58, %s4659_s27  ;;  %587 = vst.msk [vmem:[#allocation4 + $0x80] sm:$0xff] %vm570_vm2, %v507_v24 }
  0xb6   : > { %880 = vrot.lane.b32.xlu0 %v4980_v61, %s4659_s27 }
  0xb7   : > { %v505_v29 = vpop.permute.xlu1 %504 }
  0xb8   : > { %586 = vst.msk [vmem:[#allocation4 + $0x78] sm:$0xff] %vm570_vm2, %v505_v29  ;;  %v511_v33 = vpop.permute.xlu0 %510 }
  0xb9   : > { %878 = vrot.lane.b32.xlu1 %v4978_v60, %s4659_s27  ;;  %589 = vst.msk [vmem:[#allocation4 + $0x90] sm:$0xff] %vm570_vm2, %v511_v33 }
  0xba   : > { %884 = vrot.lane.b32.xlu0 %v4990_v1, %s4659_s27 }
  0xbb   : > { %v509_v34 = vpop.permute.xlu1 %508 }
  0xbc   : > { %588 = vst.msk [vmem:[#allocation4 + $0x88] sm:$0xff] %vm570_vm2, %v509_v34  ;;  %v515_v35 = vpop.permute.xlu0 %514 }
  0xbd   : > { %882 = vrot.lane.b32.xlu1 %v4982_v62, %s4659_s27  ;;  %591 = vst.msk [vmem:[#allocation4 + $0xa0] sm:$0xff] %vm570_vm2, %v515_v35 }
  0xbe   : > { %888 = vrot.lane.b32.xlu0 %v4994_v3, %s4659_s27 }
  0xbf   : > { %v513_v36 = vpop.permute.xlu1 %512 }
  0xc0   : > { %590 = vst.msk [vmem:[#allocation4 + $0x98] sm:$0xff] %vm570_vm2, %v513_v36  ;;  %v519_v47 = vpop.permute.xlu0 %518 }
  0xc1   : > { %886 = vrot.lane.b32.xlu1 %v4992_v2, %s4659_s27  ;;  %593 = vst.msk [vmem:[#allocation4 + $0xb0] sm:$0xff] %vm570_vm2, %v519_v47 }
  0xc2   : > { %892 = vrot.lane.b32.xlu0 %v5005_v5, %s4659_s27 }
  0xc3   : > { %v517_v37 = vpop.permute.xlu1 %516 }
  0xc4   : > { %592 = vst.msk [vmem:[#allocation4 + $0xa8] sm:$0xff] %vm570_vm2, %v517_v37  ;;  %v523_v44 = vpop.permute.xlu0 %522 }
  0xc5   : > { %890 = vrot.lane.b32.xlu1 %v5003_v4, %s4659_s27  ;;  %595 = vst.msk [vmem:[#allocation4 + $0xc0] sm:$0xff] %vm570_vm2, %v523_v44  ;;  %v1988_v44 = vld [vmem:[%s6977_s1 + $0x8] sm:$0x1] }
  0xc6   : > { %896 = vrot.lane.b32.xlu0 %v5015_v7, %s4659_s27 }
  0xc7   : > { %v521_v49 = vpop.permute.xlu1 %520 }
  0xc8   : > { %594 = vst.msk [vmem:[#allocation4 + $0xb8] sm:$0xff] %vm570_vm2, %v521_v49  ;;  %v527_v38 = vpop.permute.xlu0 %526 }
  0xc9   : > { %894 = vrot.lane.b32.xlu1 %v5007_v6, %s4659_s27  ;;  %597 = vst.msk [vmem:[#allocation4 + $0xd0] sm:$0xff] %vm570_vm2, %v527_v38 }
  0xca   : > { %900 = vrot.lane.b32.xlu0 %v5019_v9, %s4659_s27 }
  0xcb   : > { %v525_v24 = vpop.permute.xlu1 %524 }
  0xcc   : > { %596 = vst.msk [vmem:[#allocation4 + $0xc8] sm:$0xff] %vm570_vm2, %v525_v24  ;;  %v531_v29 = vpop.permute.xlu0 %530 }
  0xcd   : > { %898 = vrot.lane.b32.xlu1 %v5017_v8, %s4659_s27  ;;  %599 = vst.msk [vmem:[#allocation4 + $0xe0] sm:$0xff] %vm570_vm2, %v531_v29 }
  0xce   : > { %904 = vrot.lane.b32.xlu0 %v5032_v12, %s4659_s27 }
  0xcf   : > { %v529_v33 = vpop.permute.xlu1 %528 }
  0xd0   : > { %598 = vst.msk [vmem:[#allocation4 + $0xd8] sm:$0xff] %vm570_vm2, %v529_v33  ;;  %v535_v34 = vpop.permute.xlu0 %534 }
  0xd1   : > { %902 = vrot.lane.b32.xlu1 %v5028_v10, %s4659_s27  ;;  %601 = vst.msk [vmem:[#allocation4 + $0xf0] sm:$0xff] %vm570_vm2, %v535_v34 }
  0xd2   : > { %908 = vrot.lane.b32.xlu0 %v5042_v16, %s4659_s27 }
  0xd3   : > { %v533_v35 = vpop.permute.xlu1 %532 }
  0xd4   : > { %600 = vst.msk [vmem:[#allocation4 + $0xe8] sm:$0xff] %vm570_vm2, %v533_v35  ;;  %v668_v36 = vpop.permute.xlu0 %667 }
  0xd5   : > { %906 = vrot.lane.b32.xlu1 %v5037_v13, %s4659_s27  ;;  %764 = vst.msk [vmem:[#allocation4] sm:$0xff] %vm763_vm3, %v668_v36 }
  0xd6   : > { %912 = vrot.lane.b32.xlu0 %v5052_v20, %s4659_s27 }
  0xd7   : > { %v537_v12 = vpop.permute.xlu1 %536 }
  0xd8   : > { %602 = vst.msk [vmem:[#allocation4 + $0xf8] sm:$0xff] %vm570_vm2, %v537_v12  ;;  %v672_v47 = vpop.permute.xlu0 %671  ;;  %vm3053_vm2 = vcmask 1048320  }
  0xd9   : > { %910 = vrot.lane.b32.xlu1 %v5047_v17, %s4659_s27  ;;  %766 = vst.msk [vmem:[#allocation4 + $0x10] sm:$0xff] %vm763_vm3, %v672_v47 }
  0xda   : > { %1053 = vrot.lane.b32.xlu0 %v4877_v25, %s4660_s28 }
  0xdb   : > { %v670_v16 = vpop.permute.xlu1 %669 }
  0xdc   : > { %765 = vst.msk [vmem:[#allocation4 + $0x8] sm:$0xff] %vm763_vm3, %v670_v16  ;;  %v676_v37 = vpop.permute.xlu0 %675 }
  0xdd   : > { %914 = vrot.lane.b32.xlu1 %v5057_v21, %s4659_s27  ;;  %768 = vst.msk [vmem:[#allocation4 + $0x20] sm:$0xff] %vm763_vm3, %v676_v37 }
  0xde   : > { %1246 = vrot.lane.b32.xlu0 %v5072_v42, %s4661_s29 }
  0xdf   : > { %v674_v20 = vpop.permute.xlu1 %673 }
  0xe0   : > { %767 = vst.msk [vmem:[#allocation4 + $0x18] sm:$0xff] %vm763_vm3, %v674_v20  ;;  %v680_v17 = vpop.permute.xlu0 %679 }
  0xe1   : > { %1055 = vrot.lane.b32.xlu1 %v4886_v27, %s4660_s28  ;;  %770 = vst.msk [vmem:[#allocation4 + $0x30] sm:$0xff] %vm763_vm3, %v680_v17 }
  0xe2   : > { %1440 = vrot.lane.b32.xlu0 %v4946_v50, %s4662_s30 }
  0xe3   : > { %v678_v25 = vpop.permute.xlu1 %677 }
  0xe4   : > { %769 = vst.msk [vmem:[#allocation4 + $0x28] sm:$0xff] %vm763_vm3, %v678_v25  ;;  %v684_v21 = vpop.permute.xlu0 %683 }
  0xe5   : > { %1248 = vrot.lane.b32.xlu1 %v5080_v46, %s4661_s29  ;;  %772 = vst.msk [vmem:[#allocation4 + $0x40] sm:$0xff] %vm763_vm3, %v684_v21  ;;  %v1987_v46 = vld [vmem:[%s6977_s1] sm:$0xff] }
  0xe6   : > { %1633 = vrot.lane.b32.xlu0 %v4879_v26, %s4663_s6  ;;  %v4489_v49 = vpack.c.bf16 %v1988_v44, %v1987_v46 }
  0xe7   : > { %v682_v42 = vpop.permute.xlu1 %681 }
  0xe8   : > { %771 = vst.msk [vmem:[#allocation4 + $0x38] sm:$0xff] %vm763_vm3, %v682_v42  ;;  %v688_v27 = vpop.permute.xlu0 %687  ;;  %4491 = vmatprep.subr.msk.bf16.mxu0 %vm4490_vm6, %v4489_v49 }
  0xe9   : > { %1442 = vrot.lane.b32.xlu1 %v4952_v52, %s4662_s30  ;;  %774 = vst.msk [vmem:[#allocation4 + $0x50] sm:$0xff] %vm763_vm3, %v688_v27  ;;  %4494 = vmatpush3.bf16.msk.msra.mxu0 %vm4490_vm6, %v4489_v49  ;;  %v1577_v27 = vld [vmem:[#allocation2 + $0x91] sm:$0xff] }
  0xea   : > { %1635 = vrot.lane.b32.xlu0 %v4898_v31, %s4663_s6 }
  0xeb   : > { %v686_v50 = vpop.permute.xlu1 %685 }
  0xec   : > { %773 = vst.msk [vmem:[#allocation4 + $0x48] sm:$0xff] %vm763_vm3, %v686_v50  ;;  %v692_v52 = vpop.permute.xlu0 %691 }
  0xed   : > { %1057 = vrot.lane.b32.xlu1 %v4879_v26, %s4660_s28  ;;  %776 = vst.msk [vmem:[#allocation4 + $0x60] sm:$0xff] %vm763_vm3, %v692_v52 }
  0xee   : > { %1059 = vrot.lane.b32.xlu0 %v4898_v31, %s4660_s28 }
  0xef   : > { %v690_v38 = vpop.permute.xlu1 %689 }
  0xf0   : > { %775 = vst.msk [vmem:[#allocation4 + $0x58] sm:$0xff] %vm763_vm3, %v690_v38  ;;  %v696_v24 = vpop.permute.xlu0 %695 }
  0xf1   : > { %1826 = vrot.lane.b32.xlu1 %v5077_v45, %s4665_s11  ;;  %778 = vst.msk [vmem:[#allocation4 + $0x70] sm:$0xff] %vm763_vm3, %v696_v24  ;;  %v1579_v24 = vld [vmem:[#allocation2 + $0xa9] sm:$0xff] }
  0xf2   : > { %1828 = vrot.lane.b32.xlu0 %v5088_v51, %s4665_s11 }
  0xf3   : > { %v694_v26 = vpop.permute.xlu1 %693 }
  0xf4   : > { %777 = vst.msk [vmem:[#allocation4 + $0x68] sm:$0xff] %vm763_vm3, %v694_v26  ;;  %v700_v31 = vpop.permute.xlu0 %699 }
  0xf5   : > { %1250 = vrot.lane.b32.xlu1 %v5077_v45, %s4661_s29  ;;  %780 = vst.msk [vmem:[#allocation4 + $0x80] sm:$0xff] %vm763_vm3, %v700_v31 }
  0xf6   : > { %1444 = vrot.lane.b32.xlu0 %v4957_v54, %s4662_s30 }
  0xf7   : > { %v698_v29 = vpop.permute.xlu1 %697 }
  0xf8   : > { %779 = vst.msk [vmem:[#allocation4 + $0x78] sm:$0xff] %vm763_vm3, %v698_v29  ;;  %v704_v33 = vpop.permute.xlu0 %703 }
  0xf9   : > { %1252 = vrot.lane.b32.xlu1 %v5088_v51, %s4661_s29  ;;  %782 = vst.msk [vmem:[#allocation4 + $0x90] sm:$0xff] %vm763_vm3, %v704_v33 }
  0xfa   : > { %1637 = vrot.lane.b32.xlu0 %v4894_v30, %s4663_s6 }
  0xfb   : > { %v702_v34 = vpop.permute.xlu1 %701 }
  0xfc   : > { %781 = vst.msk [vmem:[#allocation4 + $0x88] sm:$0xff] %vm763_vm3, %v702_v34  ;;  %v708_v45 = vpop.permute.xlu0 %707 }
  0xfd   : > { %1446 = vrot.lane.b32.xlu1 %v4959_v55, %s4662_s30  ;;  %784 = vst.msk [vmem:[#allocation4 + $0xa0] sm:$0xff] %vm763_vm3, %v708_v45 }
  0xfe   : > { %1830 = vrot.lane.b32.xlu0 %v5084_v48, %s4665_s11 }
  0xff   : > { %v706_v54 = vpop.permute.xlu1 %705 }
 0x100   : > { %783 = vst.msk [vmem:[#allocation4 + $0x98] sm:$0xff] %vm763_vm3, %v706_v54  ;;  %v712_v51 = vpop.permute.xlu0 %711 }
 0x101   : > { %1639 = vrot.lane.b32.xlu1 %v4915_v39, %s4663_s6  ;;  %786 = vst.msk [vmem:[#allocation4 + $0xb0] sm:$0xff] %vm763_vm3, %v712_v51  ;;  %v1581_v51 = vld [vmem:[#allocation2 + $0xc1] sm:$0xff] }
 0x102   : > { %1061 = vrot.lane.b32.xlu0 %v4894_v30, %s4660_s28 }
 0x103   : > { %v710_v35 = vpop.permute.xlu1 %709 }
 0x104   : > { %785 = vst.msk [vmem:[#allocation4 + $0xa8] sm:$0xff] %vm763_vm3, %v710_v35  ;;  %v716_v55 = vpop.permute.xlu0 %715 }
 0x105   : > { %1832 = vrot.lane.b32.xlu1 %v5096_v56, %s4665_s11  ;;  %788 = vst.msk [vmem:[#allocation4 + $0xc0] sm:$0xff] %vm763_vm3, %v716_v55 }
 0x106   : > { %1254 = vrot.lane.b32.xlu0 %v5084_v48, %s4661_s29 }
 0x107   : > { %v714_v36 = vpop.permute.xlu1 %713 }
 0x108   : > { %787 = vst.msk [vmem:[#allocation4 + $0xb8] sm:$0xff] %vm763_vm3, %v714_v36  ;;  %v720_v12 = vpop.permute.xlu0 %719 }
 0x109   : > { %1063 = vrot.lane.b32.xlu1 %v4915_v39, %s4660_s28  ;;  %790 = vst.msk [vmem:[#allocation4 + $0xd0] sm:$0xff] %vm763_vm3, %v720_v12 }
 0x10a   : > { %1448 = vrot.lane.b32.xlu0 %v4965_v57, %s4662_s30 }
 0x10b   : > { %v718_v30 = vpop.permute.xlu1 %717 }
 0x10c   : > { %789 = vst.msk [vmem:[#allocation4 + $0xc8] sm:$0xff] %vm763_vm3, %v718_v30  ;;  %v724_v47 = vpop.permute.xlu0 %723 }
 0x10d   : > { %1256 = vrot.lane.b32.xlu1 %v5096_v56, %s4661_s29  ;;  %792 = vst.msk [vmem:[#allocation4 + $0xe0] sm:$0xff] %vm763_vm3, %v724_v47 }
 0x10e   : > { %1641 = vrot.lane.b32.xlu0 %v4902_v32, %s4663_s6 }
 0x10f   : > { %v722_v48 = vpop.permute.xlu1 %721 }
 0x110   : > { %791 = vst.msk [vmem:[#allocation4 + $0xd8] sm:$0xff] %vm763_vm3, %v722_v48  ;;  %v728_v39 = vpop.permute.xlu0 %727 }
 0x111   : > { %1450 = vrot.lane.b32.xlu1 %v4967_v58, %s4662_s30  ;;  %794 = vst.msk [vmem:[#allocation4 + $0xf0] sm:$0xff] %vm763_vm3, %v728_v39 }
 0x112   : > { %1834 = vrot.lane.b32.xlu0 %v5092_v53, %s4665_s11 }
 0x113   : > { %v726_v57 = vpop.permute.xlu1 %725 }
 0x114   : > { %793 = vst.msk [vmem:[#allocation4 + $0xe8] sm:$0xff] %vm763_vm3, %v726_v57  ;;  %v861_v56 = vpop.permute.xlu0 %860  ;;  %v1197_v57 = vld [vmem:[#allocation2 + $0xca] sm:$0xff] }
 0x115   : > { %1643 = vrot.lane.b32.xlu1 %v4926_v41, %s4663_s6  ;;  %957 = vst.msk [vmem:[#allocation4] sm:$0xff] %vm956_vm7, %v861_v56  ;;  %v1583_v56 = vld [vmem:[#allocation2 + $0xd9] sm:$0xff] }
 0x116   : > { %1065 = vrot.lane.b32.xlu0 %v4902_v32, %s4660_s28 }
 0x117   : > { %v730_v16 = vpop.permute.xlu1 %729 }
 0x118   : > { %795 = vst.msk [vmem:[#allocation4 + $0xf8] sm:$0xff] %vm763_vm3, %v730_v16  ;;  %v865_v58 = vpop.permute.xlu0 %864  ;;  %vm6328_vm3 = vmpackc.low %vm2354_vm14, %vm2354_vm14 }
 0x119   : > { %1836 = vrot.lane.b32.xlu1 %v5104_v11, %s4665_s11  ;;  %959 = vst.msk [vmem:[#allocation4 + $0x10] sm:$0xff] %vm956_vm7, %v865_v58 }
 0x11a   : > { %1258 = vrot.lane.b32.xlu0 %v5092_v53, %s4661_s29 }
 0x11b   : > { %v863_v37 = vpop.permute.xlu1 %862 }
 0x11c   : > { %958 = vst.msk [vmem:[#allocation4 + $0x8] sm:$0xff] %vm956_vm7, %v863_v37  ;;  %v869_v20 = vpop.permute.xlu0 %868  ;;  %v1776_v37 = vld [vmem:[#allocation2 + $0xda] sm:$0xff] }
 0x11d   : > { %1067 = vrot.lane.b32.xlu1 %v4926_v41, %s4660_s28  ;;  %961 = vst.msk [vmem:[#allocation4 + $0x20] sm:$0xff] %vm956_vm7, %v869_v20 }
 0x11e   : > { %1452 = vrot.lane.b32.xlu0 %v4969_v59, %s4662_s30 }
 0x11f   : > { %v867_v32 = vpop.permute.xlu1 %866 }
 0x120   : > { %960 = vst.msk [vmem:[#allocation4 + $0x18] sm:$0xff] %vm956_vm7, %v867_v32  ;;  %v873_v17 = vpop.permute.xlu0 %872 }
 0x121   : > { %1260 = vrot.lane.b32.xlu1 %v5104_v11, %s4661_s29  ;;  %963 = vst.msk [vmem:[#allocation4 + $0x30] sm:$0xff] %vm956_vm7, %v873_v17 }
 0x122   : > { %1645 = vrot.lane.b32.xlu0 %v4922_v40, %s4663_s6 }
 0x123   : > { %v871_v53 = vpop.permute.xlu1 %870 }
 0x124   : > { %962 = vst.msk [vmem:[#allocation4 + $0x28] sm:$0xff] %vm956_vm7, %v871_v53  ;;  %v877_v41 = vpop.permute.xlu0 %876 }
 0x125   : > { %1454 = vrot.lane.b32.xlu1 %v4978_v60, %s4662_s30  ;;  %965 = vst.msk [vmem:[#allocation4 + $0x40] sm:$0xff] %vm956_vm7, %v877_v41  ;;  %v1777_v41 = vld [vmem:[#allocation2 + $0xe2] sm:$0xff] }
 0x126   : > { %1838 = vrot.lane.b32.xlu0 %v5100_v63, %s4665_s11 }
 0x127   : > { %v875_v59 = vpop.permute.xlu1 %874 }
 0x128   : > { %964 = vst.msk [vmem:[#allocation4 + $0x38] sm:$0xff] %vm956_vm7, %v875_v59  ;;  %v881_v11 = vpop.permute.xlu0 %880  ;;  %v311_v59 = vld [vmem:[%s4832_s24 + $0xf0] sm:$0xff] }
 0x129   : > { %1647 = vrot.lane.b32.xlu1 %v4932_v43, %s4663_s6  ;;  %967 = vst.msk [vmem:[#allocation4 + $0x50] sm:$0xff] %vm956_vm7, %v881_v11  ;;  %v312_v11 = vld [vmem:[%s4832_s24 + $0xf8] sm:$0xff] }
 0x12a   : > { %1069 = vrot.lane.b32.xlu0 %v4922_v40, %s4660_s28  ;;  %344 = vst.msk [vmem:[#allocation2 + $0x181] sm:$0xff] %vm225_vm0, %v311_v59  ;;  %345 = vst.msk [vmem:[#allocation2 + $0x189] sm:$0xff] %vm225_vm0, %v312_v11  ;;  %v1592_v59 = vld [vmem:[#allocation2 + $0x141] sm:$0xff]  ;;  %vm2667_vm0 = vcmask 523520  }
 0x12b   : > { %v879_v25 = vpop.permute.xlu1 %878 }
 0x12c   : > { %966 = vst.msk [vmem:[#allocation4 + $0x48] sm:$0xff] %vm956_vm7, %v879_v25  ;;  %v885_v60 = vpop.permute.xlu0 %884 }
 0x12d   : > { %1840 = vrot.lane.b32.xlu1 %v5112_v15, %s4665_s11  ;;  %969 = vst.msk [vmem:[#allocation4 + $0x60] sm:$0xff] %vm956_vm7, %v885_v60 }
 0x12e   : > { %1262 = vrot.lane.b32.xlu0 %v5100_v63, %s4661_s29 }
 0x12f   : > { %v883_v21 = vpop.permute.xlu1 %882 }
 0x130   : > { %968 = vst.msk [vmem:[#allocation4 + $0x58] sm:$0xff] %vm956_vm7, %v883_v21  ;;  %v889_v42 = vpop.permute.xlu0 %888 }
 0x131   : > { %1071 = vrot.lane.b32.xlu1 %v4932_v43, %s4660_s28  ;;  %971 = vst.msk [vmem:[#allocation4 + $0x70] sm:$0xff] %vm956_vm7, %v889_v42 }
 0x132   : > { %1456 = vrot.lane.b32.xlu0 %v4980_v61, %s4662_s30  ;;  %v1578_v61 = vld [vmem:[#allocation2 + $0x99] sm:$0xff] }
 0x133   : > { %v887_v40 = vpop.permute.xlu1 %886 }
 0x134   : > { %970 = vst.msk [vmem:[#allocation4 + $0x68] sm:$0xff] %vm956_vm7, %v887_v40  ;;  %v893_v50 = vpop.permute.xlu0 %892 }
 0x135   : > { %1264 = vrot.lane.b32.xlu1 %v5112_v15, %s4661_s29  ;;  %973 = vst.msk [vmem:[#allocation4 + $0x80] sm:$0xff] %vm956_vm7, %v893_v50 }
 0x136   : > { %1649 = vrot.lane.b32.xlu0 %v1577_v27, %s4663_s6 }
 0x137   : > { %v891_v63 = vpop.permute.xlu1 %890 }
 0x138   : > { %972 = vst.msk [vmem:[#allocation4 + $0x78] sm:$0xff] %vm956_vm7, %v891_v63  ;;  %v897_v43 = vpop.permute.xlu0 %896 }
 0x139   : > { %1458 = vrot.lane.b32.xlu1 %v4982_v62, %s4662_s30  ;;  %975 = vst.msk [vmem:[#allocation4 + $0x90] sm:$0xff] %vm956_vm7, %v897_v43  ;;  %v1778_v43 = vld [vmem:[#allocation2 + $0xf2] sm:$0xff] }
 0x13a   : > { %1842 = vrot.lane.b32.xlu0 %v5108_v14, %s4665_s11 }
 0x13b   : > { %v895_v46 = vpop.permute.xlu1 %894 }
 0x13c   : > { %974 = vst.msk [vmem:[#allocation4 + $0x88] sm:$0xff] %vm956_vm7, %v895_v46  ;;  %v901_v15 = vpop.permute.xlu0 %900  ;;  %v1586_v46 = vld [vmem:[#allocation2 + $0xf9] sm:$0xff] }
 0x13d   : > { %1651 = vrot.lane.b32.xlu1 %v1578_v61, %s4663_s6  ;;  %977 = vst.msk [vmem:[#allocation4 + $0xa0] sm:$0xff] %vm956_vm7, %v901_v15 }
 0x13e   : > { %1073 = vrot.lane.b32.xlu0 %v1577_v27, %s4660_s28  ;;  %v1585_v27 = vld [vmem:[#allocation2 + $0xf1] sm:$0xff] }
 0x13f   : > { %v899_v44 = vpop.permute.xlu1 %898 }
 0x140   : > { %976 = vst.msk [vmem:[#allocation4 + $0x98] sm:$0xff] %vm956_vm7, %v899_v44  ;;  %v905_v62 = vpop.permute.xlu0 %904 }
 0x141   : > { %1844 = vrot.lane.b32.xlu1 %v5120_v19, %s4665_s11  ;;  %979 = vst.msk [vmem:[#allocation4 + $0xb0] sm:$0xff] %vm956_vm7, %v905_v62  ;;  %v1779_v62 = vld [vmem:[#allocation2 + $0xfa] sm:$0xff] }
 0x142   : > { %1266 = vrot.lane.b32.xlu0 %v5108_v14, %s4661_s29 }
 0x143   : > { %v903_v49 = vpop.permute.xlu1 %902 }
 0x144   : > { %978 = vst.msk [vmem:[#allocation4 + $0xa8] sm:$0xff] %vm956_vm7, %v903_v49  ;;  %v909_v52 = vpop.permute.xlu0 %908 }
 0x145   : > { %1075 = vrot.lane.b32.xlu1 %v1578_v61, %s4660_s28  ;;  %981 = vst.msk [vmem:[#allocation4 + $0xc0] sm:$0xff] %vm956_vm7, %v909_v52 }
 0x146   : > { %1460 = vrot.lane.b32.xlu0 %v4990_v1, %s4662_s30  ;;  %v1580_v1 = vld [vmem:[#allocation2 + $0xb1] sm:$0xff] }
 0x147   : > { %v907_v38 = vpop.permute.xlu1 %906 }
 0x148   : > { %980 = vst.msk [vmem:[#allocation4 + $0xb8] sm:$0xff] %vm956_vm7, %v907_v38  ;;  %v913_v26 = vpop.permute.xlu0 %912 }
 0x149   : > { %1268 = vrot.lane.b32.xlu1 %v5120_v19, %s4661_s29  ;;  %983 = vst.msk [vmem:[#allocation4 + $0xd0] sm:$0xff] %vm956_vm7, %v913_v26 }
 0x14a   : > { %1653 = vrot.lane.b32.xlu0 %v1579_v24, %s4663_s6 }
 0x14b   : > { %v911_v14 = vpop.permute.xlu1 %910 }
 0x14c   : > { %982 = vst.msk [vmem:[#allocation4 + $0xc8] sm:$0xff] %vm956_vm7, %v911_v14  ;;  %v1054_v31 = vpop.permute.xlu0 %1053  ;;  %v1587_v14 = vld [vmem:[#allocation2 + $0x109] sm:$0xff] }
 0x14d   : > { %1462 = vrot.lane.b32.xlu1 %v4992_v2, %s4662_s30  ;;  %1150 = vst.msk [vmem:[#allocation4] sm:$0xff] %vm1149_vm8, %v1054_v31 }
 0x14e   : > { %1846 = vrot.lane.b32.xlu0 %v5116_v18, %s4665_s11 }
 0x14f   : > { %v915_v29 = vpop.permute.xlu1 %914 }
 0x150   : > { %984 = vst.msk [vmem:[#allocation4 + $0xd8] sm:$0xff] %vm956_vm7, %v915_v29  ;;  %v1247_v19 = vpop.permute.xlu0 %1246  ;;  %v1780_v29 = vld [vmem:[#allocation2 + $0x10a] sm:$0xff] }
 0x151   : > { %1655 = vrot.lane.b32.xlu1 %v1580_v1, %s4663_s6  ;;  %1343 = vst.msk [vmem:[#allocation4] sm:$0xff] %vm1342_vm9, %v1247_v19 }
 0x152   : > { %1077 = vrot.lane.b32.xlu0 %v1579_v24, %s4660_s28 }
 0x153   : > { %v1056_v33 = vpop.permute.xlu1 %1055 }
 0x154   : > { %1151 = vst.msk [vmem:[#allocation4 + $0x8] sm:$0xff] %vm1149_vm8, %v1056_v33  ;;  %v1441_v2 = vpop.permute.xlu0 %1440  ;;  %v1588_v33 = vld [vmem:[#allocation2 + $0x111] sm:$0xff] }
 0x155   : > { %1848 = vrot.lane.b32.xlu1 %v5128_v23, %s4665_s11  ;;  %1537 = vst.msk [vmem:[#allocation4] sm:$0xff] %vm1536_vm10, %v1441_v2 }
 0x156   : > { %1270 = vrot.lane.b32.xlu0 %v5116_v18, %s4661_s29 }
 0x157   : > { %v1249_v34 = vpop.permute.xlu1 %1248 }
 0x158   : > { %1344 = vst.msk [vmem:[#allocation4 + $0x8] sm:$0xff] %vm1342_vm9, %v1249_v34  ;;  %v1634_v45 = vpop.permute.xlu0 %1633 }
 0x159   : > { %1079 = vrot.lane.b32.xlu1 %v1580_v1, %s4660_s28  ;;  %1730 = vst.msk [vmem:[#allocation4] sm:$0xff] %vm1729_vm11, %v1634_v45  ;;  %v1781_v45 = vld [vmem:[#allocation2 + $0x112] sm:$0xff] }
 0x15a   : > { %1464 = vrot.lane.b32.xlu0 %v4994_v3, %s4662_s30  ;;  %v1582_v3 = vld [vmem:[#allocation2 + $0xc9] sm:$0xff] }
 0x15b   : > { %v1443_v54 = vpop.permute.xlu1 %1442 }
 0x15c   : > { %1538 = vst.msk [vmem:[#allocation4 + $0x8] sm:$0xff] %vm1536_vm10, %v1443_v54  ;;  %v1636_v35 = vpop.permute.xlu0 %1635 }
 0x15d   : > { %1272 = vrot.lane.b32.xlu1 %v5128_v23, %s4661_s29  ;;  %1731 = vst.msk [vmem:[#allocation4 + $0x8] sm:$0xff] %vm1729_vm11, %v1636_v35 }
 0x15e   : > { %1657 = vrot.lane.b32.xlu0 %v1581_v51, %s4663_s6 }
 0x15f   : > { %v1058_v18 = vpop.permute.xlu1 %1057 }
 0x160   : > { %1152 = vst.msk [vmem:[#allocation4 + $0x10] sm:$0xff] %vm1149_vm8, %v1058_v18  ;;  %v1060_v55 = vpop.permute.xlu0 %1059  ;;  %v1396_v18 = vld [vmem:[#allocation2 + $0x120] sm:$0xff] }
 0x161   : > { %1466 = vrot.lane.b32.xlu1 %v5003_v4, %s4662_s30  ;;  %1153 = vst.msk [vmem:[#allocation4 + $0x18] sm:$0xff] %vm1149_vm8, %v1060_v55  ;;  %v1196_v4 = vld [vmem:[#allocation2 + $0xc2] sm:$0xff] }
 0x162   : > { %1850 = vrot.lane.b32.xlu0 %v5124_v22, %s4665_s11 }
 0x163   : > { %v1827_v36 = vpop.permute.xlu1 %1826 }
 0x164   : > { %1923 = vst.msk [vmem:[#allocation4] sm:$0xff] %vm1922_vm12, %v1827_v36  ;;  %v1829_v23 = vpop.permute.xlu0 %1828  ;;  %v1589_v36 = vld [vmem:[#allocation2 + $0x121] sm:$0xff] }
 0x165   : > { %1659 = vrot.lane.b32.xlu1 %v1582_v3, %s4663_s6  ;;  %1924 = vst.msk [vmem:[#allocation4 + $0x8] sm:$0xff] %vm1922_vm12, %v1829_v23 }
 0x166   : > { %1081 = vrot.lane.b32.xlu0 %v1581_v51, %s4660_s28 }
 0x167   : > { %v1251_v12 = vpop.permute.xlu1 %1250 }
 0x168   : > { %1345 = vst.msk [vmem:[#allocation4 + $0x10] sm:$0xff] %vm1342_vm9, %v1251_v12  ;;  %v1445_v30 = vpop.permute.xlu0 %1444 }
 0x169   : > { %1852 = vrot.lane.b32.xlu1 %v5134_v28, %s4665_s11  ;;  %1539 = vst.msk [vmem:[#allocation4 + $0x10] sm:$0xff] %vm1536_vm10, %v1445_v30 }
 0x16a   : > { %1274 = vrot.lane.b32.xlu0 %v1196_v4, %s4661_s29  ;;  %v1782_v4 = vld [vmem:[#allocation2 + $0x122] sm:$0xff] }
 0x16b   : > { %v1253_v22 = vpop.permute.xlu1 %1252  ;;  %v1955_v47 = vld [vmem:[#allocation4] sm:$0xff] }
 0x16c   : > { %1346 = vst.msk [vmem:[#allocation4 + $0x18] sm:$0xff] %vm1342_vm9, %v1253_v22  ;;  %4441 = vmatprep.mubr.msk.f32.mxu0 %vm1996_vm13, %v1955_v47  ;;  %v1638_v48 = vpop.permute.xlu0 %1637  ;;  %v1956_v39 = vld [vmem:[#allocation4 + $0x8] sm:$0xff] }
 0x16d   : > { %1083 = vrot.lane.b32.xlu1 %v1582_v3, %s4660_s28  ;;  %1732 = vst.msk [vmem:[#allocation4 + $0x10] sm:$0xff] %vm1729_vm11, %v1638_v48  ;;  %4442 = vmatmul.mubr.msk.f32.vlgmr.msra.gmra.mrb[0].mxu0 %vm1996_vm13, %v1956_v39  ;;  %v1590_v22 = vld [vmem:[#allocation2 + $0x129] sm:$0xff] }
 0x16e   : > { %1468 = vrot.lane.b32.xlu0 %v5005_v5, %s4662_s30  ;;  %v1584_v5 = vld [vmem:[#allocation2 + $0xe1] sm:$0xff] }
 0x16f   : > { %v1447_v28 = vpop.permute.xlu1 %1446 }
 0x170   : > { %1540 = vst.msk [vmem:[#allocation4 + $0x18] sm:$0xff] %vm1536_vm10, %v1447_v28  ;;  %v1831_v16 = vpop.permute.xlu0 %1830 }
 0x171   : > { %1276 = vrot.lane.b32.xlu1 %v1197_v57, %s4661_s29  ;;  %1925 = vst.msk [vmem:[#allocation4 + $0x10] sm:$0xff] %vm1922_vm12, %v1831_v16  ;;  %v1783_v57 = vld [vmem:[#allocation2 + $0x12a] sm:$0xff] }
 0x172   : > { %1661 = vrot.lane.b32.xlu0 %v1583_v56, %s4663_s6 }
 0x173   : > { %v1640_v58 = vpop.permute.xlu1 %1639 }
 0x174   : > { %1733 = vst.msk [vmem:[#allocation4 + $0x18] sm:$0xff] %vm1729_vm11, %v1640_v58  ;;  %v1062_v20 = vpop.permute.xlu0 %1061  ;;  %v1398_v58 = vld [vmem:[#allocation2 + $0x138] sm:$0xff] }
 0x175   : > { %1470 = vrot.lane.b32.xlu1 %v5007_v6, %s4662_s30  ;;  %1154 = vst.msk [vmem:[#allocation4 + $0x20] sm:$0xff] %vm1149_vm8, %v1062_v20 }
 0x176   : > { %1854 = vrot.lane.b32.xlu0 %v1776_v37, %s4665_s11 }
 0x177   : > { %v1833_v32 = vpop.permute.xlu1 %1832 }
 0x178   : > { %1926 = vst.msk [vmem:[#allocation4 + $0x18] sm:$0xff] %vm1922_vm12, %v1833_v32  ;;  %v1255_v17 = vpop.permute.xlu0 %1254  ;;  %v1957_v53 = vld [vmem:[#allocation4 + $0x10] sm:$0xff] }
 0x179   : > { %1663 = vrot.lane.b32.xlu1 %v1584_v5, %s4663_s6  ;;  %1347 = vst.msk [vmem:[#allocation4 + $0x20] sm:$0xff] %vm1342_vm9, %v1255_v17  ;;  %4444 = vmatprep.mubr.msk.f32.mxu0 %vm1996_vm13, %v1957_v53  ;;  %v1399_v17 = vld [vmem:[#allocation2 + $0x140] sm:$0xff] }
 0x17a   : > { %1085 = vrot.lane.b32.xlu0 %v1583_v56, %s4660_s28 }
 0x17b   : > { %v1064_v6 = vpop.permute.xlu1 %1063 }
 0x17c   : > { %1155 = vst.msk [vmem:[#allocation4 + $0x28] sm:$0xff] %vm1149_vm8, %v1064_v6  ;;  %v1449_v25 = vpop.permute.xlu0 %1448 }
 0x17d   : > { %1856 = vrot.lane.b32.xlu1 %v1777_v41, %s4665_s11  ;;  %1541 = vst.msk [vmem:[#allocation4 + $0x20] sm:$0xff] %vm1536_vm10, %v1449_v25 }
 0x17e   : > { %1278 = vrot.lane.b32.xlu0 %v1776_v37, %s4661_s29 }
 0x17f   : > { %v1257_v60 = vpop.permute.xlu1 %1256  ;;  %v1958_v21 = vld [vmem:[#allocation4 + $0x18] sm:$0xff] }
 0x180   : > { %1348 = vst.msk [vmem:[#allocation4 + $0x28] sm:$0xff] %vm1342_vm9, %v1257_v60  ;;  %4445 = vmatmul.mubr.msk.f32.gmra.mrb[2].mxu0 %vm1996_vm13, %v1958_v21  ;;  %v1642_v42 = vpop.permute.xlu0 %1641  ;;  %v1785_v21 = vld [vmem:[#allocation2 + $0x142] sm:$0xff] }
 0x181   : > { %1087 = vrot.lane.b32.xlu1 %v1584_v5, %s4660_s28  ;;  %1734 = vst.msk [vmem:[#allocation4 + $0x20] sm:$0xff] %vm1729_vm11, %v1642_v42  ;;  %v5558_v5 = vld [vmem:[#allocation2 + $0x139] sm:$0xff] }
 0x182   : > { %1472 = vrot.lane.b32.xlu0 %v5015_v7, %s4662_s30 }
 0x183   : > { %v1451_v40 = vpop.permute.xlu1 %1450 }
 0x184   : > { %1542 = vst.msk [vmem:[#allocation4 + $0x28] sm:$0xff] %vm1536_vm10, %v1451_v40  ;;  %v1835_v50 = vpop.permute.xlu0 %1834 }
 0x185   : > { %1280 = vrot.lane.b32.xlu1 %v1777_v41, %s4661_s29  ;;  %1927 = vst.msk [vmem:[#allocation4 + $0x20] sm:$0xff] %vm1922_vm12, %v1835_v50  ;;  %v5565_v41 = vld [vmem:[#allocation2 + $0x13a] sm:$0xff]  ;;  %v1400_v50 = vld [vmem:[#allocation2 + $0x150] sm:$0xff] }
 0x186   : > { %1665 = vrot.lane.b32.xlu0 %v1585_v27, %s4663_s6 }
 0x187   : > { %v1644_v63 = vpop.permute.xlu1 %1643 }
 0x188   : > { %1735 = vst.msk [vmem:[#allocation4 + $0x28] sm:$0xff] %vm1729_vm11, %v1644_v63  ;;  %v1066_v61 = vpop.permute.xlu0 %1065 }
 0x189   : > { %1474 = vrot.lane.b32.xlu1 %v5017_v8, %s4662_s30  ;;  %1156 = vst.msk [vmem:[#allocation4 + $0x30] sm:$0xff] %vm1149_vm8, %v1066_v61  ;;  %v1593_v61 = vld [vmem:[#allocation2 + $0x151] sm:$0xff] }
 0x18a   : > { %1858 = vrot.lane.b32.xlu0 %v1778_v43, %s4665_s11 }
 0x18b   : > { %v1837_v7 = vpop.permute.xlu1 %1836 }
 0x18c   : > { %1928 = vst.msk [vmem:[#allocation4 + $0x28] sm:$0xff] %vm1922_vm12, %v1837_v7  ;;  %v1259_v15 = vpop.permute.xlu0 %1258  ;;  %v1959_v44 = vld [vmem:[#allocation4 + $0x20] sm:$0xff]  ;;  %v1401_v7 = vld [vmem:[#allocation2 + $0x158] sm:$0xff] }
 0x18d   : > { %1667 = vrot.lane.b32.xlu1 %v1586_v46, %s4663_s6  ;;  %1349 = vst.msk [vmem:[#allocation4 + $0x30] sm:$0xff] %vm1342_vm9, %v1259_v15  ;;  %4447 = vmatprep.mubr.msk.f32.mxu0 %vm1996_vm13, %v1959_v44  ;;  %v1786_v44 = vld [vmem:[#allocation2 + $0x152] sm:$0xff] }
 0x18e   : > { %1089 = vrot.lane.b32.xlu0 %v1585_v27, %s4660_s28 }
 0x18f   : > { %v1068_v49 = vpop.permute.xlu1 %1067 }
 0x190   : > { %1157 = vst.msk [vmem:[#allocation4 + $0x38] sm:$0xff] %vm1149_vm8, %v1068_v49  ;;  %v1453_v8 = vpop.permute.xlu0 %1452  ;;  %v1594_v49 = vld [vmem:[#allocation2 + $0x159] sm:$0xff] }
 0x191   : > { %1860 = vrot.lane.b32.xlu1 %v1779_v62, %s4665_s11  ;;  %1543 = vst.msk [vmem:[#allocation4 + $0x30] sm:$0xff] %vm1536_vm10, %v1453_v8 }
 0x192   : > { %1282 = vrot.lane.b32.xlu0 %v1778_v43, %s4661_s29 }
 0x193   : > { %v1261_v52 = vpop.permute.xlu1 %1260  ;;  %v1960_v38 = vld [vmem:[#allocation4 + $0x28] sm:$0xff] }
 0x194   : > { %1350 = vst.msk [vmem:[#allocation4 + $0x38] sm:$0xff] %vm1342_vm9, %v1261_v52  ;;  %4448 = vmatmul.mubr.msk.f32.gmra.mrb[4].mxu0 %vm1996_vm13, %v1960_v38  ;;  %v1646_v24 = vpop.permute.xlu0 %1645 }
 0x195   : > { %1091 = vrot.lane.b32.xlu1 %v1586_v46, %s4660_s28  ;;  %1736 = vst.msk [vmem:[#allocation4 + $0x30] sm:$0xff] %vm1729_vm11, %v1646_v24  ;;  %v1787_v24 = vld [vmem:[#allocation2 + $0x15a] sm:$0xff] }
 0x196   : > { %1476 = vrot.lane.b32.xlu0 %v5019_v9, %s4662_s30 }
 0x197   : > { %v1455_v26 = vpop.permute.xlu1 %1454 }
 0x198   : > { %1544 = vst.msk [vmem:[#allocation4 + $0x38] sm:$0xff] %vm1536_vm10, %v1455_v26  ;;  %v1839_v31 = vpop.permute.xlu0 %1838 }
 0x199   : > { %1284 = vrot.lane.b32.xlu1 %v1779_v62, %s4661_s29  ;;  %1929 = vst.msk [vmem:[#allocation4 + $0x30] sm:$0xff] %vm1922_vm12, %v1839_v31 }
 0x19a   : > { %1669 = vrot.lane.b32.xlu0 %v1587_v14, %s4663_s6 }
 0x19b   : > { %v1648_v1 = vpop.permute.xlu1 %1647 }
 0x19c   : > { %1737 = vst.msk [vmem:[#allocation4 + $0x38] sm:$0xff] %vm1729_vm11, %v1648_v1  ;;  %v1070_v19 = vpop.permute.xlu0 %1069 }
 0x19d   : > { %1478 = vrot.lane.b32.xlu1 %v5028_v10, %s4662_s30  ;;  %1158 = vst.msk [vmem:[#allocation4 + $0x40] sm:$0xff] %vm1149_vm8, %v1070_v19 }
 0x19e   : > { %1862 = vrot.lane.b32.xlu0 %v1780_v29, %s4665_s11 }
 0x19f   : > { %v1841_v9 = vpop.permute.xlu1 %1840 }
 0x1a0   : > { %1930 = vst.msk [vmem:[#allocation4 + $0x38] sm:$0xff] %vm1922_vm12, %v1841_v9  ;;  %v1263_v2 = vpop.permute.xlu0 %1262  ;;  %v1961_v34 = vld [vmem:[#allocation4 + $0x30] sm:$0xff] }
 0x1a1   : > { %1671 = vrot.lane.b32.xlu1 %v1588_v33, %s4663_s6  ;;  %1351 = vst.msk [vmem:[#allocation4 + $0x40] sm:$0xff] %vm1342_vm9, %v1263_v2  ;;  %4450 = vmatprep.mubr.msk.f32.mxu0 %vm1996_vm13, %v1961_v34  ;;  %v1595_v9 = vld [vmem:[#allocation2 + $0x169] sm:$0xff] }
 0x1a2   : > { %1093 = vrot.lane.b32.xlu0 %v1587_v14, %s4660_s28  ;;  %v1403_v34 = vld [vmem:[#allocation2 + $0x170] sm:$0xff] }
 0x1a3   : > { %v1072_v54 = vpop.permute.xlu1 %1071 }
 0x1a4   : > { %1159 = vst.msk [vmem:[#allocation4 + $0x48] sm:$0xff] %vm1149_vm8, %v1072_v54  ;;  %v1457_v10 = vpop.permute.xlu0 %1456  ;;  %v1788_v54 = vld [vmem:[#allocation2 + $0x16a] sm:$0xff] }
 0x1a5   : > { %1864 = vrot.lane.b32.xlu1 %v1781_v45, %s4665_s11  ;;  %1545 = vst.msk [vmem:[#allocation4 + $0x40] sm:$0xff] %vm1536_vm10, %v1457_v10 }
 0x1a6   : > { %1286 = vrot.lane.b32.xlu0 %v1780_v29, %s4661_s29  ;;  %v1402_v29 = vld [vmem:[#allocation2 + $0x168] sm:$0xff] }
 0x1a7   : > { %v1265_v51 = vpop.permute.xlu1 %1264  ;;  %v1962_v35 = vld [vmem:[#allocation4 + $0x38] sm:$0xff] }
 0x1a8   : > { %1352 = vst.msk [vmem:[#allocation4 + $0x48] sm:$0xff] %vm1342_vm9, %v1265_v51  ;;  %4451 = vmatmul.mubr.msk.f32.gmra.mrb[6].mxu0 %vm1996_vm13, %v1962_v35  ;;  %v1650_v55 = vpop.permute.xlu0 %1649  ;;  %v1596_v51 = vld [vmem:[#allocation2 + $0x171] sm:$0xff] }
 0x1a9   : > { %1095 = vrot.lane.b32.xlu1 %v1588_v33, %s4660_s28  ;;  %1738 = vst.msk [vmem:[#allocation4 + $0x40] sm:$0xff] %vm1729_vm11, %v1650_v55 }
 0x1aa   : > { %1480 = vrot.lane.b32.xlu0 %v1396_v18, %s4662_s30 }
 0x1ab   : > { %v1459_v3 = vpop.permute.xlu1 %1458 }
 0x1ac   : > { %1546 = vst.msk [vmem:[#allocation4 + $0x48] sm:$0xff] %vm1536_vm10, %v1459_v3  ;;  %v1843_v23 = vpop.permute.xlu0 %1842  ;;  %v1789_v3 = vld [vmem:[#allocation2 + $0x172] sm:$0xff] }
 0x1ad   : > { %1288 = vrot.lane.b32.xlu1 %v1781_v45, %s4661_s29  ;;  %1931 = vst.msk [vmem:[#allocation4 + $0x40] sm:$0xff] %vm1922_vm12, %v1843_v23 }
 0x1ae   : > { %1673 = vrot.lane.b32.xlu0 %v1589_v36, %s4663_s6 }
 0x1af   : > { %v1652_v12 = vpop.permute.xlu1 %1651 }
 0x1b0   : > { %1739 = vst.msk [vmem:[#allocation4 + $0x48] sm:$0xff] %vm1729_vm11, %v1652_v12  ;;  %v1074_v30 = vpop.permute.xlu0 %1073 }
 0x1b1   : > { %1482 = vrot.lane.b32.xlu1 %v5037_v13, %s4662_s30  ;;  %1160 = vst.msk [vmem:[#allocation4 + $0x50] sm:$0xff] %vm1149_vm8, %v1074_v30 }
 0x1b2   : > { %1866 = vrot.lane.b32.xlu0 %v1782_v4, %s4665_s11 }
 0x1b3   : > { %v1845_v47 = vpop.permute.xlu1 %1844 }
 0x1b4   : > { %1932 = vst.msk [vmem:[#allocation4 + $0x48] sm:$0xff] %vm1922_vm12, %v1845_v47  ;;  %v1267_v48 = vpop.permute.xlu0 %1266  ;;  %v1963_v39 = vld [vmem:[#allocation4 + $0x40] sm:$0xff] }
 0x1b5   : > { %1675 = vrot.lane.b32.xlu1 %v1590_v22, %s4663_s6  ;;  %1353 = vst.msk [vmem:[#allocation4 + $0x50] sm:$0xff] %vm1342_vm9, %v1267_v48  ;;  %4453 = vmatprep.mubr.msk.f32.mxu0 %vm1996_vm13, %v1963_v39  ;;  %v1404_v47 = vld [vmem:[#allocation2 + $0x180] sm:$0xff] }
 0x1b6   : > { %1097 = vrot.lane.b32.xlu0 %v1589_v36, %s4660_s28 }
 0x1b7   : > { %v1076_v28 = vpop.permute.xlu1 %1075 }
 0x1b8   : > { %1161 = vst.msk [vmem:[#allocation4 + $0x58] sm:$0xff] %vm1149_vm8, %v1076_v28  ;;  %v1461_v13 = vpop.permute.xlu0 %1460 }
 0x1b9   : > { %1868 = vrot.lane.b32.xlu1 %v1783_v57, %s4665_s11  ;;  %1547 = vst.msk [vmem:[#allocation4 + $0x50] sm:$0xff] %vm1536_vm10, %v1461_v13  ;;  %v1405_v13 = vld [vmem:[#allocation2 + $0x188] sm:$0xff] }
 0x1ba   : > { %1290 = vrot.lane.b32.xlu0 %v1782_v4, %s4661_s29 }
 0x1bb   : > { %v1269_v56 = vpop.permute.xlu1 %1268  ;;  %v1964_v16 = vld [vmem:[#allocation4 + $0x48] sm:$0xff] }
 0x1bc   : > { %1354 = vst.msk [vmem:[#allocation4 + $0x58] sm:$0xff] %vm1342_vm9, %v1269_v56  ;;  %4454 = vmatmul.mubr.msk.f32.gmra.mrb[8].mxu0 %vm1996_vm13, %v1964_v16  ;;  %v1654_v37 = vpop.permute.xlu0 %1653  ;;  %v1790_v16 = vld [vmem:[#allocation2 + $0x182] sm:$0xff] }
 0x1bd   : > { %1099 = vrot.lane.b32.xlu1 %v1590_v22, %s4660_s28  ;;  %1740 = vst.msk [vmem:[#allocation4 + $0x50] sm:$0xff] %vm1729_vm11, %v1654_v37 }
 0x1be   : > { %1484 = vrot.lane.b32.xlu0 %v1398_v58, %s4662_s30 }
 0x1bf   : > { %v1463_v20 = vpop.permute.xlu1 %1462 }
 0x1c0   : > { %1548 = vst.msk [vmem:[#allocation4 + $0x58] sm:$0xff] %vm1536_vm10, %v1463_v20  ;;  %v1847_v32 = vpop.permute.xlu0 %1846  ;;  %v1598_v20 = vld [vmem:[#allocation2 + $0x189] sm:$0xff] }
 0x1c1   : > { %1292 = vrot.lane.b32.xlu1 %v1783_v57, %s4661_s29  ;;  %1933 = vst.msk [vmem:[#allocation4 + $0x50] sm:$0xff] %vm1922_vm12, %v1847_v32  ;;  %v1597_v57 = vld [vmem:[#allocation2 + $0x181] sm:$0xff] }
 0x1c2   : > { %1677 = vrot.lane.b32.xlu0 %v5558_v5, %s4663_s6 }
 0x1c3   : > { %v1656_v53 = vpop.permute.xlu1 %1655 }
 0x1c4   : > { %1741 = vst.msk [vmem:[#allocation4 + $0x58] sm:$0xff] %vm1729_vm11, %v1656_v53  ;;  %v1078_v6 = vpop.permute.xlu0 %1077 }
 0x1c5   : > { %1486 = vrot.lane.b32.xlu1 %v1399_v17, %s4662_s30  ;;  %1162 = vst.msk [vmem:[#allocation4 + $0x60] sm:$0xff] %vm1149_vm8, %v1078_v6  ;;  %v1791_v17 = vld [vmem:[#allocation2 + $0x18a] sm:$0xff] }
 0x1c6   : > { %1870 = vrot.lane.b32.xlu0 %v5565_v41, %s4665_s11 }
 0x1c7   : > { %v1849_v11 = vpop.permute.xlu1 %1848 }
 0x1c8   : > { %1934 = vst.msk [vmem:[#allocation4 + $0x58] sm:$0xff] %vm1922_vm12, %v1849_v11  ;;  %v1271_v25 = vpop.permute.xlu0 %1270  ;;  %v1965_v60 = vld [vmem:[#allocation4 + $0x50] sm:$0xff] }
 0x1c9   : > { %1679 = vrot.lane.b32.xlu1 %v1592_v59, %s4663_s6  ;;  %1355 = vst.msk [vmem:[#allocation4 + $0x60] sm:$0xff] %vm1342_vm9, %v1271_v25  ;;  %4456 = vmatprep.mubr.msk.f32.mxu0 %vm1996_vm13, %v1965_v60  ;;  %v1406_v60 = vld [vmem:[#allocation2 + $0x198] sm:$0xff] }
 0x1ca   : > { %1101 = vrot.lane.b32.xlu0 %v5558_v5, %s4660_s28 }
 0x1cb   : > { %v1080_v42 = vpop.permute.xlu1 %1079 }
 0x1cc   : > { %1163 = vst.msk [vmem:[#allocation4 + $0x68] sm:$0xff] %vm1149_vm8, %v1080_v42  ;;  %v1465_v0 = vpop.permute.xlu0 %1464 }
 0x1cd   : > { %1872 = vrot.lane.b32.xlu1 %v1785_v21, %s4665_s11  ;;  %1549 = vst.msk [vmem:[#allocation4 + $0x60] sm:$0xff] %vm1536_vm10, %v1465_v0  ;;  %v1599_v0 = vld [vmem:[#allocation2 + $0x199] sm:$0xff] }
 0x1ce   : > { %1294 = vrot.lane.b32.xlu0 %v5565_v41, %s4661_s29 }
 0x1cf   : > { %v1273_v40 = vpop.permute.xlu1 %1272  ;;  %v1966_v27 = vld [vmem:[#allocation4 + $0x58] sm:$0xff] }
 0x1d0   : > { %1356 = vst.msk [vmem:[#allocation4 + $0x68] sm:$0xff] %vm1342_vm9, %v1273_v40  ;;  %4457 = vmatmul.mubr.msk.f32.gmra.mrb[10].mxu0 %vm1996_vm13, %v1966_v27  ;;  %v1658_v63 = vpop.permute.xlu0 %1657 }
 0x1d1   : > { %1103 = vrot.lane.b32.xlu1 %v1592_v59, %s4660_s28  ;;  %1742 = vst.msk [vmem:[#allocation4 + $0x60] sm:$0xff] %vm1729_vm11, %v1658_v63 }
 0x1d2   : > { %1488 = vrot.lane.b32.xlu0 %v1400_v50, %s4662_s30  ;;  %v1407_v50 = vld [vmem:[#allocation2 + $0x1a0] sm:$0xff] }
 0x1d3   : > { %v1467_v43 = vpop.permute.xlu1 %1466 }
 0x1d4   : > { %1550 = vst.msk [vmem:[#allocation4 + $0x68] sm:$0xff] %vm1536_vm10, %v1467_v43  ;;  %v1851_v46 = vpop.permute.xlu0 %1850  ;;  %v1792_v43 = vld [vmem:[#allocation2 + $0x19a] sm:$0xff] }
 0x1d5   : > { %1296 = vrot.lane.b32.xlu1 %v1785_v21, %s4661_s29  ;;  %1935 = vst.msk [vmem:[#allocation4 + $0x60] sm:$0xff] %vm1922_vm12, %v1851_v46  ;;  %v1600_v46 = vld [vmem:[#allocation2 + $0x1a1] sm:$0xff] }
 0x1d6   : > { %1681 = vrot.lane.b32.xlu0 %v1593_v61, %s4663_s6 }
 0x1d7   : > { %v1660_v15 = vpop.permute.xlu1 %1659 }
 0x1d8   : > { %1743 = vst.msk [vmem:[#allocation4 + $0x68] sm:$0xff] %vm1729_vm11, %v1660_v15  ;;  %v1082_v62 = vpop.permute.xlu0 %1081 }
 0x1d9   : > { %1490 = vrot.lane.b32.xlu1 %v1401_v7, %s4662_s30  ;;  %1164 = vst.msk [vmem:[#allocation4 + $0x70] sm:$0xff] %vm1149_vm8, %v1082_v62  ;;  %v1793_v62 = vld [vmem:[#allocation2 + $0x1a2] sm:$0xff] }
 0x1da   : > { %1874 = vrot.lane.b32.xlu0 %v1786_v44, %s4665_s11 }
 0x1db   : > { %v1853_v8 = vpop.permute.xlu1 %1852 }
 0x1dc   : > { %1936 = vst.msk [vmem:[#allocation4 + $0x68] sm:$0xff] %vm1922_vm12, %v1853_v8  ;;  %v1275_v52 = vpop.permute.xlu0 %1274  ;;  %v1967_v38 = vld [vmem:[#allocation4 + $0x60] sm:$0xff] }
 0x1dd   : > { %1683 = vrot.lane.b32.xlu1 %v1594_v49, %s4663_s6  ;;  %1357 = vst.msk [vmem:[#allocation4 + $0x70] sm:$0xff] %vm1342_vm9, %v1275_v52  ;;  %4459 = vmatprep.mubr.msk.f32.mxu0 %vm1996_vm13, %v1967_v38 }
 0x1de   : > { %1105 = vrot.lane.b32.xlu0 %v1593_v61, %s4660_s28 }
 0x1df   : > { %v1084_v26 = vpop.permute.xlu1 %1083 }
 0x1e0   : > { %1165 = vst.msk [vmem:[#allocation4 + $0x78] sm:$0xff] %vm1149_vm8, %v1084_v26  ;;  %v1469_v14 = vpop.permute.xlu0 %1468 }
 0x1e1   : > { %1876 = vrot.lane.b32.xlu1 %v1787_v24, %s4665_s11  ;;  %1551 = vst.msk [vmem:[#allocation4 + $0x70] sm:$0xff] %vm1536_vm10, %v1469_v14 }
 0x1e2   : > { %1298 = vrot.lane.b32.xlu0 %v1786_v44, %s4661_s29 }
 0x1e3   : > { %v1277_v31 = vpop.permute.xlu1 %1276  ;;  %v1968_v1 = vld [vmem:[#allocation4 + $0x68] sm:$0xff] }
 0x1e4   : > { %1358 = vst.msk [vmem:[#allocation4 + $0x78] sm:$0xff] %vm1342_vm9, %v1277_v31  ;;  %4460 = vmatmul.mubr.msk.f32.gmra.mrb[12].mxu0 %vm1996_vm13, %v1968_v1  ;;  %v1662_v19 = vpop.permute.xlu0 %1661 }
 0x1e5   : > { %1107 = vrot.lane.b32.xlu1 %v1594_v49, %s4660_s28  ;;  %1744 = vst.msk [vmem:[#allocation4 + $0x70] sm:$0xff] %vm1729_vm11, %v1662_v19 }
 0x1e6   : > { %1492 = vrot.lane.b32.xlu0 %v1402_v29, %s4662_s30 }
 0x1e7   : > { %v1471_v33 = vpop.permute.xlu1 %1470 }
 0x1e8   : > { %1552 = vst.msk [vmem:[#allocation4 + $0x78] sm:$0xff] %vm1536_vm10, %v1471_v33  ;;  %v1855_v2 = vpop.permute.xlu0 %1854 }
 0x1e9   : > { %1300 = vrot.lane.b32.xlu1 %v1787_v24, %s4661_s29  ;;  %1937 = vst.msk [vmem:[#allocation4 + $0x70] sm:$0xff] %vm1922_vm12, %v1855_v2 }
 0x1ea   : > { %1685 = vrot.lane.b32.xlu0 %v1595_v9, %s4663_s6 }
 0x1eb   : > { %v1664_v45 = vpop.permute.xlu1 %1663 }
 0x1ec   : > { %1745 = vst.msk [vmem:[#allocation4 + $0x78] sm:$0xff] %vm1729_vm11, %v1664_v45  ;;  %v1086_v10 = vpop.permute.xlu0 %1085 }
 0x1ed   : > { %1494 = vrot.lane.b32.xlu1 %v1403_v34, %s4662_s30  ;;  %1166 = vst.msk [vmem:[#allocation4 + $0x80] sm:$0xff] %vm1149_vm8, %v1086_v10  ;;  %v5802_v10 = vld [vmem:[%s6978_s2] ss:$0 sm:$0xff] }
 0x1ee   : > { %1878 = vrot.lane.b32.xlu0 %v1788_v54, %s4665_s11 }
 0x1ef   : > { %v1857_v35 = vpop.permute.xlu1 %1856 }
 0x1f0   : > { %1938 = vst.msk [vmem:[#allocation4 + $0x78] sm:$0xff] %vm1922_vm12, %v1857_v35  ;;  %v1279_v18 = vpop.permute.xlu0 %1278  ;;  %v1969_v55 = vld [vmem:[#allocation4 + $0x70] sm:$0xff] }
 0x1f1   : > { %1687 = vrot.lane.b32.xlu1 %v1596_v51, %s4663_s6  ;;  %1359 = vst.msk [vmem:[#allocation4 + $0x80] sm:$0xff] %vm1342_vm9, %v1279_v18  ;;  %4462 = vmatprep.mubr.msk.f32.mxu0 %vm1996_vm13, %v1969_v55 }
 0x1f2   : > { %916 = vrot.lane.b32.xlu0 %v1402_v29, %s4659_s27 }
 0x1f3   : > { %v1088_v36 = vpop.permute.xlu1 %1087 }
 0x1f4   : > { %1167 = vst.msk [vmem:[#allocation4 + $0x88] sm:$0xff] %vm1149_vm8, %v1088_v36  ;;  %v1473_v23 = vpop.permute.xlu0 %1472 }
 0x1f5   : > { %1880 = vrot.lane.b32.xlu1 %v1789_v3, %s4665_s11  ;;  %1553 = vst.msk [vmem:[#allocation4 + $0x80] sm:$0xff] %vm1536_vm10, %v1473_v23 }
 0x1f6   : > { %1109 = vrot.lane.b32.xlu0 %v1595_v9, %s4660_s28 }
 0x1f7   : > { %v1281_v12 = vpop.permute.xlu1 %1280  ;;  %v1970_v4 = vld [vmem:[#allocation4 + $0x78] sm:$0xff] }
 0x1f8   : > { %1360 = vst.msk [vmem:[#allocation4 + $0x88] sm:$0xff] %vm1342_vm9, %v1281_v12  ;;  %4463 = vmatmul.mubr.msk.f32.gmra.mrb[14].mxu0 %vm1996_vm13, %v1970_v4  ;;  %v1666_v30 = vpop.permute.xlu0 %1665 }
 0x1f9   : > { %918 = vrot.lane.b32.xlu1 %v1403_v34, %s4659_s27  ;;  %1746 = vst.msk [vmem:[#allocation4 + $0x80] sm:$0xff] %vm1729_vm11, %v1666_v30 }
 0x1fa   : > { %1302 = vrot.lane.b32.xlu0 %v1788_v54, %s4661_s29 }
 0x1fb   : > { %v1475_v22 = vpop.permute.xlu1 %1474 }
 0x1fc   : > { %1554 = vst.msk [vmem:[#allocation4 + $0x88] sm:$0xff] %vm1536_vm10, %v1475_v22  ;;  %v1859_v48 = vpop.permute.xlu0 %1858 }
 0x1fd   : > { %1111 = vrot.lane.b32.xlu1 %v1596_v51, %s4660_s28  ;;  %1939 = vst.msk [vmem:[#allocation4 + $0x80] sm:$0xff] %vm1922_vm12, %v1859_v48 }
 0x1fe   : > { %1496 = vrot.lane.b32.xlu0 %v1404_v47, %s4662_s30 }
 0x1ff   : > { %v1668_v39 = vpop.permute.xlu1 %1667 }
 0x200   : > { %1747 = vst.msk [vmem:[#allocation4 + $0x88] sm:$0xff] %vm1729_vm11, %v1668_v39  ;;  %v1090_v28 = vpop.permute.xlu0 %1089 }
 0x201   : > { %1304 = vrot.lane.b32.xlu1 %v1789_v3, %s4661_s29  ;;  %1168 = vst.msk [vmem:[#allocation4 + $0x90] sm:$0xff] %vm1149_vm8, %v1090_v28 }
 0x202   : > { %1689 = vrot.lane.b32.xlu0 %v1597_v57, %s4663_s6 }
 0x203   : > { %v1861_v56 = vpop.permute.xlu1 %1860 }
 0x204   : > { %1940 = vst.msk [vmem:[#allocation4 + $0x88] sm:$0xff] %vm1922_vm12, %v1861_v56  ;;  %v1283_v58 = vpop.permute.xlu0 %1282  ;;  %v1971_v37 = vld [vmem:[#allocation4 + $0x80] sm:$0xff]  ;;  %v2443_v56 = vld [vmem:[#allocation3] sm:$0xff] }
 0x205   : > { %1498 = vrot.lane.b32.xlu1 %v1405_v13, %s4662_s30  ;;  %1361 = vst.msk [vmem:[#allocation4 + $0x90] sm:$0xff] %vm1342_vm9, %v1283_v58  ;;  %4465 = vmatprep.mubr.msk.f32.mxu0 %vm1996_vm13, %v1971_v37 }
 0x206   : > { %1882 = vrot.lane.b32.xlu0 %v1790_v16, %s4665_s11  ;;  %2475 = vst.msk [vmem:[#allocation5] sm:$0xff] %vm2354_vm14, %v2443_v56 }
 0x207   : > { %v1092_v5 = vpop.permute.xlu1 %1091 }
 0x208   : > { %1169 = vst.msk [vmem:[#allocation4 + $0x98] sm:$0xff] %vm1149_vm8, %v1092_v5  ;;  %v1477_v32 = vpop.permute.xlu0 %1476  ;;  %v2508_v5 = vld [vmem:[#allocation3 + $0x9] sm:$0xff] }
 0x209   : > { %1691 = vrot.lane.b32.xlu1 %v1598_v20, %s4663_s6  ;;  %1555 = vst.msk [vmem:[#allocation4 + $0x90] sm:$0xff] %vm1536_vm10, %v1477_v32 }
 0x20a   : > { %920 = vrot.lane.b32.xlu0 %v1404_v47, %s4659_s27 }
 0x20b   : > { %v1285_v53 = vpop.permute.xlu1 %1284  ;;  %v1972_v41 = vld [vmem:[#allocation4 + $0x88] sm:$0xff] }
 0x20c   : > { %1362 = vst.msk [vmem:[#allocation4 + $0x98] sm:$0xff] %vm1342_vm9, %v1285_v53  ;;  %4466 = vmatmul.mubr.msk.f32.gmra.mrb[16].mxu0 %vm1996_vm13, %v1972_v41  ;;  %v1670_v6 = vpop.permute.xlu0 %1669  ;;  %v2507_v53 = vld [vmem:[#allocation3 + $0x1] sm:$0xff] }
 0x20d   : > { %1884 = vrot.lane.b32.xlu1 %v1791_v17, %s4665_s11  ;;  %1748 = vst.msk [vmem:[#allocation4 + $0x90] sm:$0xff] %vm1729_vm11, %v1670_v6 }
 0x20e   : > { %1113 = vrot.lane.b32.xlu0 %v1597_v57, %s4660_s28 }
 0x20f   : > { %v1479_v59 = vpop.permute.xlu1 %1478 }
 0x210   : > { %1556 = vst.msk [vmem:[#allocation4 + $0x98] sm:$0xff] %vm1536_vm10, %v1479_v59  ;;  %v1863_v11 = vpop.permute.xlu0 %1862 }
 0x211   : > { %922 = vrot.lane.b32.xlu1 %v1405_v13, %s4659_s27  ;;  %1941 = vst.msk [vmem:[#allocation4 + $0x90] sm:$0xff] %vm1922_vm12, %v1863_v11 }
 0x212   : > { %1306 = vrot.lane.b32.xlu0 %v1790_v16, %s4661_s29 }
 0x213   : > { %v1672_v25 = vpop.permute.xlu1 %1671 }
 0x214   : > { %1749 = vst.msk [vmem:[#allocation4 + $0x98] sm:$0xff] %vm1729_vm11, %v1672_v25  ;;  %v1094_v21 = vpop.permute.xlu0 %1093 }
 0x215   : > { %1115 = vrot.lane.b32.xlu1 %v1598_v20, %s4660_s28  ;;  %1170 = vst.msk [vmem:[#allocation4 + $0xa0] sm:$0xff] %vm1149_vm8, %v1094_v21 }
 0x216   : > { %1500 = vrot.lane.b32.xlu0 %v1406_v60, %s4662_s30 }
 0x217   : > { %v1865_v42 = vpop.permute.xlu1 %1864 }
 0x218   : > { %1942 = vst.msk [vmem:[#allocation4 + $0x98] sm:$0xff] %vm1922_vm12, %v1865_v42  ;;  %v1287_v40 = vpop.permute.xlu0 %1286  ;;  %v1973_v27 = vld [vmem:[#allocation4 + $0x90] sm:$0xff] }
 0x219   : > { %1308 = vrot.lane.b32.xlu1 %v1791_v17, %s4661_s29  ;;  %1363 = vst.msk [vmem:[#allocation4 + $0xa0] sm:$0xff] %vm1342_vm9, %v1287_v40  ;;  %4468 = vmatprep.mubr.msk.f32.mxu0 %vm1996_vm13, %v1973_v27  ;;  %v2444_v17 = vld [vmem:[#allocation3 + $0x8] sm:$0xff] }
 0x21a   : > { %1693 = vrot.lane.b32.xlu0 %v1599_v0, %s4663_s6  ;;  %2476 = vst.msk [vmem:[#allocation5 + $0x18] sm:$0xff] %vm2354_vm14, %v2444_v17 }
 0x21b   : > { %v1096_v63 = vpop.permute.xlu1 %1095 }
 0x21c   : > { %1171 = vst.msk [vmem:[#allocation4 + $0xa8] sm:$0xff] %vm1149_vm8, %v1096_v63  ;;  %v1481_v61 = vpop.permute.xlu0 %1480 }
 0x21d   : > { %1502 = vrot.lane.b32.xlu1 %v1407_v50, %s4662_s30  ;;  %1557 = vst.msk [vmem:[#allocation4 + $0xa0] sm:$0xff] %vm1536_vm10, %v1481_v61  ;;  %s4362_s30 = sshll.u32 %s6986_s19, 6 }
 0x21e   : > { %1886 = vrot.lane.b32.xlu0 %v1792_v43, %s4665_s11  ;;  %s6963_s8 = scalar_lea.vmem %s6981_s5, %s4362_s30 }
 0x21f   : > { %v1289_v7 = vpop.permute.xlu1 %1288  ;;  %v1974_v15 = vld [vmem:[#allocation4 + $0x98] sm:$0xff] }
 0x220   : > { %1364 = vst.msk [vmem:[#allocation4 + $0xa8] sm:$0xff] %vm1342_vm9, %v1289_v7  ;;  %4469 = vmatmul.mubr.msk.f32.gmra.mrb[18].mxu0 %vm1996_vm13, %v1974_v15  ;;  %v1674_v44 = vpop.permute.xlu0 %1673 }
 0x221   : > { %1695 = vrot.lane.b32.xlu1 %v1600_v46, %s4663_s6  ;;  %1750 = vst.msk [vmem:[#allocation4 + $0xa0] sm:$0xff] %vm1729_vm11, %v1674_v44 }
 0x223   : > { %v1483_v49 = vpop.permute.xlu1 %1482 }
 0x224   : > { %1558 = vst.msk [vmem:[#allocation4 + $0xa8] sm:$0xff] %vm1536_vm10, %v1483_v49  ;;  %v1867_v8 = vpop.permute.xlu0 %1866 }
 0x225   : > { %1888 = vrot.lane.b32.xlu1 %v1793_v62, %s4665_s11  ;;  %1943 = vst.msk [vmem:[#allocation4 + $0xa0] sm:$0xff] %vm1922_vm12, %v1867_v8 }
 0x227   : > { %v1676_v52 = vpop.permute.xlu1 %1675 }
 0x228   : > { %1751 = vst.msk [vmem:[#allocation4 + $0xa8] sm:$0xff] %vm1729_vm11, %v1676_v52  ;;  %v1098_v38 = vpop.permute.xlu0 %1097 }
 0x229   : > { %1172 = vst.msk [vmem:[#allocation4 + $0xb0] sm:$0xff] %vm1149_vm8, %v1098_v38  ;;  %v2701_v38 = vld [vmem:[#allocation3 + $0xa] sm:$0xff] }
 0x22b   : > { %v1869_v24 = vpop.permute.xlu1 %1868 }
 0x22c   : > { %1944 = vst.msk [vmem:[#allocation4 + $0xa8] sm:$0xff] %vm1922_vm12, %v1869_v24  ;;  %v1291_v26 = vpop.permute.xlu0 %1290  ;;  %v1975_v14 = vld [vmem:[#allocation4 + $0xa0] sm:$0xff]  ;;  %v2700_v24 = vld [vmem:[#allocation3 + $0x2] sm:$0xff] }
 0x22d   : > { %1365 = vst.msk [vmem:[#allocation4 + $0xb0] sm:$0xff] %vm1342_vm9, %v1291_v26  ;;  %4471 = vmatprep.mubr.msk.f32.mxu0 %vm1996_vm13, %v1975_v14 }
 0x22f   : > { %v1100_v31 = vpop.permute.xlu1 %1099 }
 0x230   : > { %1173 = vst.msk [vmem:[#allocation4 + $0xb8] sm:$0xff] %vm1149_vm8, %v1100_v31  ;;  %v1485_v1 = vpop.permute.xlu0 %1484 }
 0x231   : > { %1559 = vst.msk [vmem:[#allocation4 + $0xb0] sm:$0xff] %vm1536_vm10, %v1485_v1 }
 0x233   : > { %v1293_v29 = vpop.permute.xlu1 %1292  ;;  %v1976_v19 = vld [vmem:[#allocation4 + $0xa8] sm:$0xff] }
 0x234   : > { %1366 = vst.msk [vmem:[#allocation4 + $0xb8] sm:$0xff] %vm1342_vm9, %v1293_v29  ;;  %4472 = vmatmul.mubr.msk.f32.gmra.mrb[20].mxu0 %vm1996_vm13, %v1976_v19  ;;  %v1678_v33 = vpop.permute.xlu0 %1677 }
 0x235   : > { %1752 = vst.msk [vmem:[#allocation4 + $0xb0] sm:$0xff] %vm1729_vm11, %v1678_v33 }
 0x237   : > { %v1487_v9 = vpop.permute.xlu1 %1486 }
 0x238   : > { %1560 = vst.msk [vmem:[#allocation4 + $0xb8] sm:$0xff] %vm1536_vm10, %v1487_v9  ;;  %v1871_v2 = vpop.permute.xlu0 %1870 }
 0x239   : > { %1945 = vst.msk [vmem:[#allocation4 + $0xb0] sm:$0xff] %vm1922_vm12, %v1871_v2 }
 0x23b   : > { %v1680_v34 = vpop.permute.xlu1 %1679 }
 0x23c   : > { %1753 = vst.msk [vmem:[#allocation4 + $0xb8] sm:$0xff] %vm1729_vm11, %v1680_v34  ;;  %v1102_v45 = vpop.permute.xlu0 %1101 }
 0x23d   : > { %1174 = vst.msk [vmem:[#allocation4 + $0xc0] sm:$0xff] %vm1149_vm8, %v1102_v45 }
 0x23f   : > { %v1873_v54 = vpop.permute.xlu1 %1872 }
 0x240   : > { %1946 = vst.msk [vmem:[#allocation4 + $0xb8] sm:$0xff] %vm1922_vm12, %v1873_v54  ;;  %v4443_v51 = vpop.f32.mrb[0].mxu0  ;;  %v1295_v35 = vpop.permute.xlu0 %1294  ;;  %v1977_v18 = vld [vmem:[#allocation4 + $0xb0] sm:$0xff] }
 0x241   : > { %v2169_v55 = vadd.f32 %v4443_v51, %v5802_v10  ;;  %1367 = vst.msk [vmem:[#allocation4 + $0xc0] sm:$0xff] %vm1342_vm9, %v1295_v35  ;;  %v2163_v3 = vpop.f32.mrb[1].mxu0  ;;  %4474 = vmatprep.mubr.msk.f32.mxu0 %vm1996_vm13, %v1977_v18 }
 0x242   : > { %v2164_v23 = vadd.f32 %v5802_v10, %v2163_v3 }
 0x243   : > { %v1104_v36 = vpop.permute.xlu1 %1103  ;;  %v2323_v12 = vmax.f32 %v2169_v55, 0.0 }
 0x244   : > { %1175 = vst.msk [vmem:[#allocation4 + $0xc8] sm:$0xff] %vm1149_vm8, %v1104_v36  ;;  %v2322_v4 = vmax.f32 %v2164_v23, 0.0  ;;  %v1489_v30 = vpop.permute.xlu0 %1488 }
 0x245   : > { %2412 = vst.msk [vmem:[#allocation3 + $0x21] sm:$0xff] %vm2354_vm14, %v2323_v12 }
 0x246   : > { %1561 = vst.msk [vmem:[#allocation4 + $0xc0] sm:$0xff] %vm1536_vm10, %v1489_v30 }
 0x247   : > { %2411 = vst.msk [vmem:[#allocation3 + $0x19] sm:$0xff] %vm2354_vm14, %v2322_v4  ;;  %v1297_v22 = vpop.permute.xlu1 %1296  ;;  %v1978_v47 = vld [vmem:[#allocation4 + $0xb8] sm:$0xff] }
 0x248   : > { %1368 = vst.msk [vmem:[#allocation4 + $0xc8] sm:$0xff] %vm1342_vm9, %v1297_v22  ;;  %4475 = vmatmul.mubr.msk.f32.gmra.mrb[22].mxu0 %vm1996_vm13, %v1978_v47  ;;  %v1682_v48 = vpop.permute.xlu0 %1681 }
 0x249   : > { %1754 = vst.msk [vmem:[#allocation4 + $0xc0] sm:$0xff] %vm1729_vm11, %v1682_v48 }
 0x24b   : > { %v1491_v39 = vpop.permute.xlu1 %1490 }
 0x24c   : > { %1562 = vst.msk [vmem:[#allocation4 + $0xc8] sm:$0xff] %vm1536_vm10, %v1491_v39  ;;  %v1875_v57 = vpop.permute.xlu0 %1874  ;;  %v5817_v28 = vld [vmem:[#allocation3 + $0x22] sm:$0xff] }
 0x24d   : > { %v5819_v13 = vld [vmem:[#allocation3 + $0x21] sm:$0xff]  ;;  %1947 = vst.msk [vmem:[#allocation4 + $0xc0] sm:$0xff] %vm1922_vm12, %v1875_v57  ;;  %3216 = vrot.lane.b32.xlu1 %v5817_v28, %s4666_s14 }
 0x24e   : > { %v5822_v16 = vld [vmem:[#allocation3 + $0x1a] sm:$0xff]  ;;  %3119 = vst.msk [vmem:[#allocation5 + $0x20] sm:$0xff] %vm2354_vm14, %v5819_v13 }
 0x24f   : > { %v5826_v58 = vld [vmem:[#allocation3 + $0x20] sm:$0xff]  ;;  %v5828_v37 = vld [vmem:[#allocation3 + $0x18] sm:$0xff]  ;;  %v1684_v20 = vpop.permute.xlu1 %1683  ;;  %3214 = vrot.lane.b32.xlu0 %v5822_v16, %s4666_s14 }
 0x250   : > { %v5835_v32 = vld [vmem:[#allocation3 + $0x19] sm:$0xff]  ;;  %2478 = vst.msk [vmem:[#allocation5 + $0x48] sm:$0xff] %vm2354_vm14, %v5826_v58  ;;  %2477 = vst.msk [vmem:[#allocation5 + $0x30] sm:$0xff] %vm2354_vm14, %v5828_v37  ;;  %v1106_v41 = vpop.permute.xlu0 %1105 }
 0x251   : > { %1755 = vst.msk [vmem:[#allocation4 + $0xc8] sm:$0xff] %vm1729_vm11, %v1684_v20  ;;  %2573 = vrot.lane.b32.xlu1 %v2508_v5, %s4666_s14 }
 0x252   : > { %3118 = vst.msk [vmem:[#allocation5 + $0x8] sm:$0xff] %vm2354_vm14, %v5835_v32 }
 0x253   : > { %1176 = vst.msk [vmem:[#allocation4 + $0xd0] sm:$0xff] %vm1149_vm8, %v1106_v41  ;;  %v1877_v6 = vpop.permute.xlu1 %1876  ;;  %v4446_v59 = vpop.f32.mrb[2].mxu0  ;;  %2571 = vrot.lane.b32.xlu0 %v2507_v53, %s4666_s14 }
 0x254   : > { %1948 = vst.msk [vmem:[#allocation4 + $0xc8] sm:$0xff] %vm1922_vm12, %v1877_v6  ;;  %v2179_v11 = vadd.f32 %v4446_v59, %v5802_v10  ;;  %v2173_v25 = vpop.f32.mrb[3].mxu0  ;;  %v1299_v21 = vpop.permute.xlu0 %1298  ;;  %v1979_v42 = vld [vmem:[#allocation4 + $0xc0] sm:$0xff] }
 0x255   : > { %v2174_v60 = vadd.f32 %v5802_v10, %v2173_v25  ;;  %1369 = vst.msk [vmem:[#allocation4 + $0xd0] sm:$0xff] %vm1342_vm9, %v1299_v21  ;;  %4477 = vmatprep.mubr.msk.f32.mxu0 %vm1996_vm13, %v1979_v42 }
 0x256   : > { %v2325_v0 = vmax.f32 %v2179_v11, 0.0 }
 0x257   : > { %v2324_v40 = vmax.f32 %v2174_v60, 0.0  ;;  %v1108_v27 = vpop.permute.xlu1 %1107 }
 0x258   : > { %2414 = vst.msk [vmem:[#allocation3 + $0x39] sm:$0xff] %vm2354_vm14, %v2325_v0  ;;  %v1493_v50 = vpop.permute.xlu0 %1492 }
 0x259   : > { %1177 = vst.msk [vmem:[#allocation4 + $0xd8] sm:$0xff] %vm1149_vm8, %v1108_v27 }
 0x25a   : > { %2413 = vst.msk [vmem:[#allocation3 + $0x31] sm:$0xff] %vm2354_vm14, %v2324_v40 }
 0x25b   : > { %1563 = vst.msk [vmem:[#allocation4 + $0xd0] sm:$0xff] %vm1536_vm10, %v1493_v50  ;;  %v1301_v63 = vpop.permute.xlu1 %1300  ;;  %v1980_v43 = vld [vmem:[#allocation4 + $0xc8] sm:$0xff] }
 0x25c   : > { %1370 = vst.msk [vmem:[#allocation4 + $0xd8] sm:$0xff] %vm1342_vm9, %v1301_v63  ;;  %4478 = vmatmul.mubr.msk.f32.gmra.mrb[24].mxu0 %vm1996_vm13, %v1980_v43  ;;  %v1686_v61 = vpop.permute.xlu0 %1685 }
 0x25d   : > { %1756 = vst.msk [vmem:[#allocation4 + $0xd0] sm:$0xff] %vm1729_vm11, %v1686_v61 }
 0x25f   : > { %v5860_v46 = vld [vmem:[#allocation3 + $0x3a] sm:$0xff]  ;;  %v1495_v7 = vpop.permute.xlu1 %1494 }
 0x260   : > { %v5862_v15 = vld [vmem:[#allocation3 + $0x39] sm:$0xff]  ;;  %3760 = vst.msk [vmem:[#allocation5 + $0x28] sm:$0xff] %vm2354_vm14, %v5860_v46  ;;  %v1879_v8 = vpop.permute.xlu0 %1878 }
 0x261   : > { %v5866_v44 = vld [vmem:[#allocation3 + $0x32] sm:$0xff]  ;;  %1564 = vst.msk [vmem:[#allocation4 + $0xd8] sm:$0xff] %vm1536_vm10, %v1495_v7 }
 0x262   : > { %v5869_v62 = vld [vmem:[#allocation3 + $0x38] sm:$0xff]  ;;  %v5871_v49 = vld [vmem:[#allocation3 + $0x30] sm:$0xff]  ;;  %3121 = vst.msk [vmem:[#allocation5 + $0x50] sm:$0xff] %vm2354_vm14, %v5862_v15  ;;  %3759 = vst.msk [vmem:[#allocation5 + $0x10] sm:$0xff] %vm2354_vm14, %v5866_v44 }
 0x263   : > { %3409 = vrot.lane.b32.xlu1 %v5869_v62, %s4667_s15  ;;  %3407 = vrot.lane.b32.xlu0 %v5871_v49, %s4667_s15  ;;  %v5881_v52 = vld [vmem:[#allocation3 + $0x31] sm:$0xff]  ;;  %2480 = vst.msk [vmem:[#allocation5 + $0x78] sm:$0xff] %vm2354_vm14, %v5869_v62  ;;  %2479 = vst.msk [vmem:[#allocation5 + $0x60] sm:$0xff] %vm2354_vm14, %v5871_v49  ;;  %v1688_v26 = vpop.permute.xlu1 %1687 }
 0x264   : > { %1949 = vst.msk [vmem:[#allocation4 + $0xd0] sm:$0xff] %vm1922_vm12, %v1879_v8  ;;  %v917_v14 = vpop.permute.xlu0 %916 }
 0x265   : > { %3120 = vst.msk [vmem:[#allocation5 + $0x38] sm:$0xff] %vm2354_vm14, %v5881_v52 }
 0x266   : > { %1757 = vst.msk [vmem:[#allocation4 + $0xd8] sm:$0xff] %vm1729_vm11, %v1688_v26 }
 0x267   : > { %2766 = vrot.lane.b32.xlu1 %v2701_v38, %s4667_s15  ;;  %2764 = vrot.lane.b32.xlu0 %v2700_v24, %s4667_s15  ;;  %985 = vst.msk [vmem:[#allocation4 + $0xe0] sm:$0xff] %vm956_vm7, %v917_v14  ;;  %v1881_v31 = vpop.permute.xlu1 %1880  ;;  %v4449_v1 = vpop.f32.mrb[4].mxu0 }
 0x268   : > { %1950 = vst.msk [vmem:[#allocation4 + $0xd8] sm:$0xff] %vm1922_vm12, %v1881_v31  ;;  %v2189_v29 = vadd.f32 %v4449_v1, %v5802_v10  ;;  %v2183_v19 = vpop.f32.mrb[5].mxu0  ;;  %v1110_v9 = vpop.permute.xlu0 %1109 }
 0x269   : > { %v2184_v33 = vadd.f32 %v5802_v10, %v2183_v19  ;;  %1178 = vst.msk [vmem:[#allocation4 + $0xe0] sm:$0xff] %vm1149_vm8, %v1110_v9 }
 0x26a   : > { %v2327_v34 = vmax.f32 %v2189_v29, 0.0 }
 0x26b   : > { %3601 = vrot.lane.b32.xlu1 %v5862_v15, %s4668_s16  ;;  %3599 = vrot.lane.b32.xlu0 %v5881_v52, %s4668_s16  ;;  %v1981_v2 = vld [vmem:[#allocation4 + $0xd0] sm:$0xff]  ;;  %v919_v45 = vpop.permute.xlu1 %918  ;;  %v2326_v54 = vmax.f32 %v2184_v33, 0.0 }
 0x26c   : > { %4480 = vmatprep.mubr.msk.f32.mxu0 %vm1996_vm13, %v1981_v2  ;;  %2416 = vst.msk [vmem:[#allocation3 + $0x51] sm:$0xff] %vm2354_vm14, %v2327_v34  ;;  %v1303_v51 = vpop.permute.xlu0 %1302 }
 0x26d   : > { %986 = vst.msk [vmem:[#allocation4 + $0xe8] sm:$0xff] %vm956_vm7, %v919_v45 }
 0x26e   : > { %2415 = vst.msk [vmem:[#allocation3 + $0x49] sm:$0xff] %vm2354_vm14, %v2326_v54 }
 0x26f   : > { %2959 = vrot.lane.b32.xlu1 %v5826_v58, %s4668_s16  ;;  %2957 = vrot.lane.b32.xlu0 %v5828_v37, %s4668_s16  ;;  %1371 = vst.msk [vmem:[#allocation4 + $0xe0] sm:$0xff] %vm1342_vm9, %v1303_v51  ;;  %v1112_v35 = vpop.permute.xlu1 %1111  ;;  %v1982_v18 = vld [vmem:[#allocation4 + $0xd8] sm:$0xff] }
 0x270   : > { %1179 = vst.msk [vmem:[#allocation4 + $0xe8] sm:$0xff] %vm1149_vm8, %v1112_v35  ;;  %4481 = vmatmul.mubr.msk.f32.gmra.mrb[26].mxu0 %vm1996_vm13, %v1982_v18  ;;  %v1497_v55 = vpop.permute.xlu0 %1496 }
 0x271   : > { %1565 = vst.msk [vmem:[#allocation4 + $0xe0] sm:$0xff] %vm1536_vm10, %v1497_v55 }
 0x273   : > { %3220 = vrot.lane.b32.xlu1 %v5860_v46, %s4666_s14  ;;  %3218 = vrot.lane.b32.xlu0 %v5866_v44, %s4666_s14  ;;  %v5918_v3 = vld [vmem:[#allocation3 + $0x52] sm:$0xff]  ;;  %v1305_v36 = vpop.permute.xlu1 %1304 }
 0x274   : > { %v5920_v23 = vld [vmem:[#allocation3 + $0x51] sm:$0xff]  ;;  %3762 = vst.msk [vmem:[#allocation5 + $0x58] sm:$0xff] %vm2354_vm14, %v5918_v3  ;;  %v1690_v22 = vpop.permute.xlu0 %1689 }
 0x275   : > { %v5924_v12 = vld [vmem:[#allocation3 + $0x4a] sm:$0xff]  ;;  %1372 = vst.msk [vmem:[#allocation4 + $0xe8] sm:$0xff] %vm1342_vm9, %v1305_v36 }
 0x276   : > { %v5927_v4 = vld [vmem:[#allocation3 + $0x50] sm:$0xff]  ;;  %v5929_v30 = vld [vmem:[#allocation3 + $0x48] sm:$0xff]  ;;  %3123 = vst.msk [vmem:[#allocation5 + $0x80] sm:$0xff] %vm2354_vm14, %v5920_v23  ;;  %3761 = vst.msk [vmem:[#allocation5 + $0x40] sm:$0xff] %vm2354_vm14, %v5924_v12 }
 0x277   : > { %2577 = vrot.lane.b32.xlu1 %v5819_v13, %s4666_s14  ;;  %2575 = vrot.lane.b32.xlu0 %v5835_v32, %s4666_s14  ;;  %v5939_v47 = vld [vmem:[#allocation3 + $0x49] sm:$0xff]  ;;  %2482 = vst.msk [vmem:[#allocation5 + $0xa8] sm:$0xff] %vm2354_vm14, %v5927_v4  ;;  %2481 = vst.msk [vmem:[#allocation5 + $0x90] sm:$0xff] %vm2354_vm14, %v5929_v30  ;;  %v1499_v48 = vpop.permute.xlu1 %1498 }
 0x278   : > { %1758 = vst.msk [vmem:[#allocation4 + $0xe0] sm:$0xff] %vm1729_vm11, %v1690_v22  ;;  %v1883_v39 = vpop.permute.xlu0 %1882 }
 0x279   : > { %3122 = vst.msk [vmem:[#allocation5 + $0x68] sm:$0xff] %vm2354_vm14, %v5939_v47 }
 0x27a   : > { %1566 = vst.msk [vmem:[#allocation4 + $0xe8] sm:$0xff] %vm1536_vm10, %v1499_v48 }
 0x27b   : > { %3413 = vrot.lane.b32.xlu1 %v5927_v4, %s4667_s15  ;;  %3411 = vrot.lane.b32.xlu0 %v5929_v30, %s4667_s15  ;;  %1951 = vst.msk [vmem:[#allocation4 + $0xe0] sm:$0xff] %vm1922_vm12, %v1883_v39  ;;  %v1692_v57 = vpop.permute.xlu1 %1691  ;;  %v4452_v13 = vpop.f32.mrb[6].mxu0 }
 0x27c   : > { %1759 = vst.msk [vmem:[#allocation4 + $0xe8] sm:$0xff] %vm1729_vm11, %v1692_v57  ;;  %v2199_v56 = vadd.f32 %v4452_v13, %v5802_v10  ;;  %v2193_v58 = vpop.f32.mrb[7].mxu0  ;;  %v921_v37 = vpop.permute.xlu0 %920 }
 0x27d   : > { %v2194_v20 = vadd.f32 %v5802_v10, %v2193_v58  ;;  %987 = vst.msk [vmem:[#allocation4 + $0xf0] sm:$0xff] %vm956_vm7, %v921_v37 }
 0x27e   : > { %v2329_v5 = vmax.f32 %v2199_v56, 0.0 }
 0x27f   : > { %2770 = vrot.lane.b32.xlu1 %v5817_v28, %s4667_s15  ;;  %2768 = vrot.lane.b32.xlu0 %v5822_v16, %s4667_s15  ;;  %v1885_v32 = vpop.permute.xlu1 %1884  ;;  %v2328_v17 = vmax.f32 %v2194_v20, 0.0 }
 0x280   : > { %1952 = vst.msk [vmem:[#allocation4 + $0xe8] sm:$0xff] %vm1922_vm12, %v1885_v32  ;;  %v1114_v28 = vpop.permute.xlu0 %1113 }
 0x281   : > { %2418 = vst.msk [vmem:[#allocation3 + $0x69] sm:$0xff] %vm2354_vm14, %v2329_v5  ;;  %2417 = vst.msk [vmem:[#allocation3 + $0x61] sm:$0xff] %vm2354_vm14, %v2328_v17 }
 0x282   : > { %v1983_v16 = vld [vmem:[#allocation4 + $0xe0] sm:$0xff]  ;;  %1180 = vst.msk [vmem:[#allocation4 + $0xf0] sm:$0xff] %vm1149_vm8, %v1114_v28 }
 0x283   : > { %3605 = vrot.lane.b32.xlu1 %v5920_v23, %s4668_s16  ;;  %3603 = vrot.lane.b32.xlu0 %v5939_v47, %s4668_s16  ;;  %v923_v53 = vpop.permute.xlu1 %922 }
 0x284   : > { %4483 = vmatprep.mubr.msk.f32.mxu0 %vm1996_vm13, %v1983_v16  ;;  %988 = vst.msk [vmem:[#allocation4 + $0xf8] sm:$0xff] %vm956_vm7, %v923_v53  ;;  %v1307_v41 = vpop.permute.xlu0 %1306 }
 0x285   : > { %1373 = vst.msk [vmem:[#allocation4 + $0xf0] sm:$0xff] %vm1342_vm9, %v1307_v41 }
 0x287   : > { %2963 = vrot.lane.b32.xlu1 %v5869_v62, %s4668_s16  ;;  %2961 = vrot.lane.b32.xlu0 %v5871_v49, %s4668_s16  ;;  %v1116_v59 = vpop.permute.xlu1 %1115  ;;  %v1984_v11 = vld [vmem:[#allocation4 + $0xe8] sm:$0xff] }
 0x288   : > { %v5977_v6 = vld [vmem:[#allocation3 + $0x6a] sm:$0xff]  ;;  %v5983_v60 = vld [vmem:[#allocation3 + $0x62] sm:$0xff]  ;;  %1181 = vst.msk [vmem:[#allocation4 + $0xf8] sm:$0xff] %vm1149_vm8, %v1116_v59  ;;  %4484 = vmatmul.mubr.msk.f32.gmra.mrb[28].mxu0 %vm1996_vm13, %v1984_v11  ;;  %v1501_v0 = vpop.permute.xlu0 %1500 }
 0x289   : > { %v5979_v25 = vld [vmem:[#allocation3 + $0x69] sm:$0xff]  ;;  %3764 = vst.msk [vmem:[#allocation5 + $0x88] sm:$0xff] %vm2354_vm14, %v5977_v6  ;;  %v5989_v42 = vld [vmem:[#allocation3 + $0x60] sm:$0xff]  ;;  %3763 = vst.msk [vmem:[#allocation5 + $0x70] sm:$0xff] %vm2354_vm14, %v5983_v60 }
 0x28a   : > { %v5987_v21 = vld [vmem:[#allocation3 + $0x68] sm:$0xff]  ;;  %3125 = vst.msk [vmem:[#allocation5 + $0xb0] sm:$0xff] %vm2354_vm14, %v5979_v25  ;;  %2483 = vst.msk [vmem:[#allocation5 + $0xc0] sm:$0xff] %vm2354_vm14, %v5989_v42 }
 0x28b   : > { %3224 = vrot.lane.b32.xlu1 %v5918_v3, %s4666_s14  ;;  %3222 = vrot.lane.b32.xlu0 %v5924_v12, %s4666_s14  ;;  %v5999_v40 = vld [vmem:[#allocation3 + $0x61] sm:$0xff]  ;;  %2484 = vst.msk [vmem:[#allocation5 + $0xd8] sm:$0xff] %vm2354_vm14, %v5987_v21  ;;  %v1309_v27 = vpop.permute.xlu1 %1308 }
 0x28c   : > { %1567 = vst.msk [vmem:[#allocation4 + $0xf0] sm:$0xff] %vm1536_vm10, %v1501_v0  ;;  %v1694_v50 = vpop.permute.xlu0 %1693 }
 0x28d   : > { %3124 = vst.msk [vmem:[#allocation5 + $0x98] sm:$0xff] %vm2354_vm14, %v5999_v40 }
 0x28e   : > { %1374 = vst.msk [vmem:[#allocation4 + $0xf8] sm:$0xff] %vm1342_vm9, %v1309_v27 }
 0x28f   : > { %2581 = vrot.lane.b32.xlu1 %v5862_v15, %s4666_s14  ;;  %2579 = vrot.lane.b32.xlu0 %v5881_v52, %s4666_s14  ;;  %1760 = vst.msk [vmem:[#allocation4 + $0xf0] sm:$0xff] %vm1729_vm11, %v1694_v50  ;;  %v1503_v63 = vpop.permute.xlu1 %1502  ;;  %v4455_v43 = vpop.f32.mrb[8].mxu0 }
 0x290   : > { %1568 = vst.msk [vmem:[#allocation4 + $0xf8] sm:$0xff] %vm1536_vm10, %v1503_v63  ;;  %v2209_v61 = vadd.f32 %v4455_v43, %v5802_v10  ;;  %v2203_v7 = vpop.f32.mrb[9].mxu0  ;;  %v1887_v15 = vpop.permute.xlu0 %1886 }
 0x291   : > { %v2204_v62 = vadd.f32 %v5802_v10, %v2203_v7  ;;  %1953 = vst.msk [vmem:[#allocation4 + $0xf0] sm:$0xff] %vm1922_vm12, %v1887_v15 }
 0x292   : > { %v2331_v49 = vmax.f32 %v2209_v61, 0.0 }
 0x293   : > { %3417 = vrot.lane.b32.xlu1 %v5987_v21, %s4667_s15  ;;  %3415 = vrot.lane.b32.xlu0 %v5989_v42, %s4667_s15  ;;  %v1696_v8 = vpop.permute.xlu1 %1695  ;;  %v2330_v52 = vmax.f32 %v2204_v62, 0.0 }
 0x294   : > { %1761 = vst.msk [vmem:[#allocation4 + $0xf8] sm:$0xff] %vm1729_vm11, %v1696_v8 }
 0x295   : > { %2420 = vst.msk [vmem:[#allocation3 + $0x81] sm:$0xff] %vm2354_vm14, %v2331_v49  ;;  %2419 = vst.msk [vmem:[#allocation3 + $0x79] sm:$0xff] %vm2354_vm14, %v2330_v52 }
 0x297   : > { %2774 = vrot.lane.b32.xlu1 %v5860_v46, %s4667_s15  ;;  %2772 = vrot.lane.b32.xlu0 %v5866_v44, %s4667_s15  ;;  %v1889_v38 = vpop.permute.xlu1 %1888 }
 0x298   : > { %1954 = vst.msk [vmem:[#allocation4 + $0xf8] sm:$0xff] %vm1922_vm12, %v1889_v38  ;;  %v1985_v24 = vld [vmem:[#allocation4 + $0xf0] sm:$0xff] }
 0x299   : > { %4486 = vmatprep.mubr.msk.f32.mxu0 %vm1996_vm13, %v1985_v24 }
 0x29b   : > { %3609 = vrot.lane.b32.xlu1 %v5979_v25, %s4668_s16  ;;  %3607 = vrot.lane.b32.xlu0 %v5999_v40, %s4668_s16 }
 0x29c   : > { %v6035_v26 = vld [vmem:[#allocation3 + $0x82] sm:$0xff]  ;;  %v6041_v44 = vld [vmem:[#allocation3 + $0x7a] sm:$0xff] }
 0x29d   : > { %v6037_v46 = vld [vmem:[#allocation3 + $0x81] sm:$0xff]  ;;  %3766 = vst.msk [vmem:[#allocation5 + $0xb8] sm:$0xff] %vm2354_vm14, %v6035_v26  ;;  %v6045_v31 = vld [vmem:[#allocation3 + $0x78] sm:$0xff]  ;;  %3765 = vst.msk [vmem:[#allocation5 + $0xa0] sm:$0xff] %vm2354_vm14, %v6041_v44 }
 0x29e   : > { %v6043_v14 = vld [vmem:[#allocation3 + $0x80] sm:$0xff]  ;;  %3127 = vst.msk [vmem:[#allocation5 + $0xe0] sm:$0xff] %vm2354_vm14, %v6037_v46  ;;  %2485 = vst.msk [vmem:[#allocation5 + $0xf0] sm:$0xff] %vm2354_vm14, %v6045_v31 }
 0x29f   : > { %2967 = vrot.lane.b32.xlu1 %v5927_v4, %s4668_s16  ;;  %2965 = vrot.lane.b32.xlu0 %v5929_v30, %s4668_s16  ;;  %v6055_v1 = vld [vmem:[#allocation3 + $0x79] sm:$0xff]  ;;  %2486 = vst.msk [vmem:[#allocation5 + $0x108] sm:$0xff] %vm2354_vm14, %v6043_v14  ;;  %v1986_v29 = vld [vmem:[#allocation4 + $0xf8] sm:$0xff] }
 0x2a0   : > { %3126 = vst.msk [vmem:[#allocation5 + $0xc8] sm:$0xff] %vm2354_vm14, %v6055_v1  ;;  %4487 = vmatmul.mubr.msk.f32.gmra.mrb[30].mxu0 %vm1996_vm13, %v1986_v29 }
 0x2a3   : > { %3228 = vrot.lane.b32.xlu1 %v5977_v6, %s4666_s14  ;;  %3226 = vrot.lane.b32.xlu0 %v5983_v60, %s4666_s14  ;;  %v4458_v19 = vpop.f32.mrb[10].mxu0 }
 0x2a4   : > { %v2219_v33 = vadd.f32 %v4458_v19, %v5802_v10  ;;  %v2213_v9 = vpop.f32.mrb[11].mxu0 }
 0x2a5   : > { %v2214_v2 = vadd.f32 %v5802_v10, %v2213_v9 }
 0x2a6   : > { %v2333_v34 = vmax.f32 %v2219_v33, 0.0 }
 0x2a7   : > { %2585 = vrot.lane.b32.xlu1 %v5920_v23, %s4666_s14  ;;  %2583 = vrot.lane.b32.xlu0 %v5939_v47, %s4666_s14  ;;  %v2332_v45 = vmax.f32 %v2214_v2, 0.0 }
 0x2a8   : > { %2422 = vst.msk [vmem:[#allocation3 + $0x99] sm:$0xff] %vm2354_vm14, %v2333_v34 }
 0x2a9   : > { %2421 = vst.msk [vmem:[#allocation3 + $0x91] sm:$0xff] %vm2354_vm14, %v2332_v45 }
 0x2ab   : > { %3421 = vrot.lane.b32.xlu1 %v6043_v14, %s4667_s15  ;;  %3419 = vrot.lane.b32.xlu0 %v6045_v31, %s4667_s15 }
 0x2af   : > { %2778 = vrot.lane.b32.xlu1 %v5918_v3, %s4667_s15  ;;  %2776 = vrot.lane.b32.xlu0 %v5924_v12, %s4667_s15  ;;  %v6084_v54 = vld [vmem:[#allocation3 + $0x9a] sm:$0xff] }
 0x2b0   : > { %v6086_v51 = vld [vmem:[#allocation3 + $0x99] sm:$0xff]  ;;  %3768 = vst.msk [vmem:[#allocation5 + $0xe8] sm:$0xff] %vm2354_vm14, %v6084_v54  ;;  %v6100_v18 = vld [vmem:[#allocation3 + $0x91] sm:$0xff] }
 0x2b1   : > { %v6090_v35 = vld [vmem:[#allocation3 + $0x92] sm:$0xff]  ;;  %3129 = vst.msk [vmem:[#allocation5 + $0x110] sm:$0xff] %vm2354_vm14, %v6086_v51  ;;  %3128 = vst.msk [vmem:[#allocation5 + $0xf8] sm:$0xff] %vm2354_vm14, %v6100_v18 }
 0x2b2   : > { %3767 = vst.msk [vmem:[#allocation5 + $0xd0] sm:$0xff] %vm2354_vm14, %v6090_v35  ;;  %v2456_v55 = vld [vmem:[#allocation3 + $0x98] sm:$0xff]  ;;  %v2455_v3 = vld [vmem:[#allocation3 + $0x90] sm:$0xff] }
 0x2b3   : > { %3613 = vrot.lane.b32.xlu1 %v6037_v46, %s4668_s16  ;;  %3611 = vrot.lane.b32.xlu0 %v6055_v1, %s4668_s16  ;;  %2488 = vst.msk [vmem:[#allocation5 + $0x138] sm:$0xff] %vm2354_vm14, %v2456_v55  ;;  %2487 = vst.msk [vmem:[#allocation5 + $0x120] sm:$0xff] %vm2354_vm14, %v2455_v3  ;;  %v6122_v47 = vld [vmem:[#allocation3 + $0x98] sm:$0xff]  ;;  %v6124_v48 = vld [vmem:[#allocation3 + $0x90] sm:$0xff] }
 0x2b7   : > { %2971 = vrot.lane.b32.xlu1 %v5987_v21, %s4668_s16  ;;  %2969 = vrot.lane.b32.xlu0 %v5989_v42, %s4668_s16  ;;  %v4461_v36 = vpop.f32.mrb[12].mxu0 }
 0x2b8   : > { %v2229_v23 = vadd.f32 %v4461_v36, %v5802_v10  ;;  %v2223_v12 = vpop.f32.mrb[13].mxu0 }
 0x2b9   : > { %v2224_v4 = vadd.f32 %v5802_v10, %v2223_v12 }
 0x2ba   : > { %v2335_v30 = vmax.f32 %v2229_v23, 0.0 }
 0x2bb   : > { %3232 = vrot.lane.b32.xlu1 %v6035_v26, %s4666_s14  ;;  %3230 = vrot.lane.b32.xlu0 %v6041_v44, %s4666_s14  ;;  %v2334_v22 = vmax.f32 %v2224_v4, 0.0 }
 0x2bc   : > { %2424 = vst.msk [vmem:[#allocation3 + $0xb1] sm:$0xff] %vm2354_vm14, %v2335_v30 }
 0x2bd   : > { %2423 = vst.msk [vmem:[#allocation3 + $0xa9] sm:$0xff] %vm2354_vm14, %v2334_v22 }
 0x2bf   : > { %2589 = vrot.lane.b32.xlu1 %v5979_v25, %s4666_s14  ;;  %2587 = vrot.lane.b32.xlu0 %v5999_v40, %s4666_s14  ;;  %v3217_v39 = vpop.permute.xlu1 %3216 }
 0x2c0   : > { %3311 = vst.msk [vmem:[#allocation5 + $0x20] sm:$0xff] %vm2667_vm0, %v3217_v39 }
 0x2c1   : > { %v3215_v57 = vpop.permute.xlu0 %3214 }
 0x2c2   : > { %3310 = vst.msk [vmem:[#allocation5 + $0x8] sm:$0xff] %vm2667_vm0, %v3215_v57 }
 0x2c3   : > { %3425 = vrot.lane.b32.xlu1 %v6122_v47, %s4667_s15  ;;  %3423 = vrot.lane.b32.xlu0 %v6124_v48, %s4667_s15  ;;  %v6132_v13 = vld [vmem:[#allocation3 + $0xb2] sm:$0xff]  ;;  %v2574_v37 = vpop.permute.xlu1 %2573 }
 0x2c4   : > { %v6134_v56 = vld [vmem:[#allocation3 + $0xb1] sm:$0xff]  ;;  %3770 = vst.msk [vmem:[#allocation5 + $0x118] sm:$0xff] %vm2354_vm14, %v6132_v13  ;;  %v6149_v5 = vld [vmem:[#allocation3 + $0xa9] sm:$0xff] }
 0x2c5   : > { %v6138_v58 = vld [vmem:[#allocation3 + $0xaa] sm:$0xff]  ;;  %3131 = vst.msk [vmem:[#allocation5 + $0x140] sm:$0xff] %vm2354_vm14, %v6134_v56  ;;  %v2572_v20 = vpop.permute.xlu0 %2571  ;;  %3130 = vst.msk [vmem:[#allocation5 + $0x128] sm:$0xff] %vm2354_vm14, %v6149_v5 }
 0x2c6   : > { %3769 = vst.msk [vmem:[#allocation5 + $0x100] sm:$0xff] %vm2354_vm14, %v6138_v58  ;;  %v2458_v32 = vld [vmem:[#allocation3 + $0xb0] sm:$0xff]  ;;  %v2457_v17 = vld [vmem:[#allocation3 + $0xa8] sm:$0xff] }
 0x2c7   : > { %2782 = vrot.lane.b32.xlu1 %v5977_v6, %s4667_s15  ;;  %2780 = vrot.lane.b32.xlu0 %v5983_v60, %s4667_s15  ;;  %2669 = vst.msk [vmem:[#allocation5 + $0x18] sm:$0xff] %vm2667_vm0, %v2574_v37  ;;  %2668 = vst.msk [vmem:[#allocation5] sm:$0xff] %vm2667_vm0, %v2572_v20  ;;  %v6178_v60 = vld [vmem:[#allocation3 + $0xb0] sm:$0xff]  ;;  %v6180_v21 = vld [vmem:[#allocation3 + $0xa8] sm:$0xff] }
 0x2c8   : > { %2490 = vst.msk [vmem:[#allocation5 + $0x168] sm:$0xff] %vm2354_vm14, %v2458_v32  ;;  %2489 = vst.msk [vmem:[#allocation5 + $0x150] sm:$0xff] %vm2354_vm14, %v2457_v17 }
 0x2cb   : > { %3617 = vrot.lane.b32.xlu1 %v6086_v51, %s4668_s16  ;;  %3615 = vrot.lane.b32.xlu0 %v6100_v18, %s4668_s16  ;;  %v4464_v28 = vpop.f32.mrb[14].mxu0 }
 0x2cc   : > { %v2239_v16 = vadd.f32 %v4464_v28, %v5802_v10  ;;  %v2233_v53 = vpop.f32.mrb[15].mxu0 }
 0x2cd   : > { %v2234_v41 = vadd.f32 %v5802_v10, %v2233_v53 }
 0x2ce   : > { %v2337_v6 = vmax.f32 %v2239_v16, 0.0 }
 0x2cf   : > { %2975 = vrot.lane.b32.xlu1 %v6043_v14, %s4668_s16  ;;  %2973 = vrot.lane.b32.xlu0 %v6045_v31, %s4668_s16  ;;  %v2336_v59 = vmax.f32 %v2234_v41, 0.0 }
 0x2d0   : > { %2426 = vst.msk [vmem:[#allocation3 + $0xc9] sm:$0xff] %vm2354_vm14, %v2337_v6 }
 0x2d1   : > { %2425 = vst.msk [vmem:[#allocation3 + $0xc1] sm:$0xff] %vm2354_vm14, %v2336_v59 }
 0x2d3   : > { %3236 = vrot.lane.b32.xlu1 %v6084_v54, %s4666_s14  ;;  %3234 = vrot.lane.b32.xlu0 %v6090_v35, %s4666_s14 }
 0x2d5   : > { %v3410_v11 = vpop.permute.xlu1 %3409  ;;  %v3408_v25 = vpop.permute.xlu0 %3407 }
 0x2d6   : > { %3504 = vst.msk [vmem:[#allocation5 + $0x20] sm:$0xff] %vm2860_vm1, %v3410_v11  ;;  %3503 = vst.msk [vmem:[#allocation5 + $0x8] sm:$0xff] %vm2860_vm1, %v3408_v25 }
 0x2d7   : > { %2593 = vrot.lane.b32.xlu1 %v6037_v46, %s4666_s14  ;;  %2591 = vrot.lane.b32.xlu0 %v6055_v1, %s4666_s14  ;;  %v6182_v40 = vld [vmem:[#allocation3 + $0xca] sm:$0xff] }
 0x2d8   : > { %v6184_v27 = vld [vmem:[#allocation3 + $0xc9] sm:$0xff]  ;;  %3772 = vst.msk [vmem:[#allocation5 + $0x148] sm:$0xff] %vm2354_vm14, %v6182_v40  ;;  %v6200_v63 = vld [vmem:[#allocation3 + $0xc1] sm:$0xff] }
 0x2d9   : > { %v2767_v42 = vpop.permute.xlu1 %2766  ;;  %v2765_v0 = vpop.permute.xlu0 %2764  ;;  %v6190_v50 = vld [vmem:[#allocation3 + $0xc2] sm:$0xff]  ;;  %3133 = vst.msk [vmem:[#allocation5 + $0x170] sm:$0xff] %vm2354_vm14, %v6184_v27  ;;  %3132 = vst.msk [vmem:[#allocation5 + $0x158] sm:$0xff] %vm2354_vm14, %v6200_v63 }
 0x2da   : > { %2862 = vst.msk [vmem:[#allocation5 + $0x18] sm:$0xff] %vm2860_vm1, %v2767_v42  ;;  %2861 = vst.msk [vmem:[#allocation5] sm:$0xff] %vm2860_vm1, %v2765_v0  ;;  %v2460_v43 = vld [vmem:[#allocation3 + $0xc8] sm:$0xff]  ;;  %v2459_v61 = vld [vmem:[#allocation3 + $0xc0] sm:$0xff] }
 0x2db   : > { %3429 = vrot.lane.b32.xlu1 %v6178_v60, %s4667_s15  ;;  %3427 = vrot.lane.b32.xlu0 %v6180_v21, %s4667_s15  ;;  %3771 = vst.msk [vmem:[#allocation5 + $0x130] sm:$0xff] %vm2354_vm14, %v6190_v50  ;;  %2492 = vst.msk [vmem:[#allocation5 + $0x198] sm:$0xff] %vm2354_vm14, %v2460_v43  ;;  %v6246_v23 = vld [vmem:[#allocation3 + $0xc8] sm:$0xff]  ;;  %v6248_v12 = vld [vmem:[#allocation3 + $0xc0] sm:$0xff] }
 0x2dc   : > { %2491 = vst.msk [vmem:[#allocation5 + $0x180] sm:$0xff] %vm2354_vm14, %v2459_v61 }
 0x2dd   : > { %v3602_v7 = vpop.permute.xlu1 %3601  ;;  %v3600_v15 = vpop.permute.xlu0 %3599 }
 0x2de   : > { %3696 = vst.msk [vmem:[#allocation5 + $0x20] sm:$0xff] %vm3053_vm2, %v3602_v7  ;;  %3695 = vst.msk [vmem:[#allocation5 + $0x8] sm:$0xff] %vm3053_vm2, %v3600_v15 }
 0x2df   : > { %2786 = vrot.lane.b32.xlu1 %v6035_v26, %s4667_s15  ;;  %2784 = vrot.lane.b32.xlu0 %v6041_v44, %s4667_s15  ;;  %v4467_v8 = vpop.f32.mrb[16].mxu0 }
 0x2e0   : > { %v2249_v52 = vadd.f32 %v4467_v8, %v5802_v10  ;;  %v2243_v38 = vpop.f32.mrb[17].mxu0 }
 0x2e1   : > { %v2960_v62 = vpop.permute.xlu1 %2959  ;;  %v2958_v49 = vpop.permute.xlu0 %2957  ;;  %v2244_v24 = vadd.f32 %v5802_v10, %v2243_v38 }
 0x2e2   : > { %3055 = vst.msk [vmem:[#allocation5 + $0x18] sm:$0xff] %vm3053_vm2, %v2960_v62  ;;  %3054 = vst.msk [vmem:[#allocation5] sm:$0xff] %vm3053_vm2, %v2958_v49  ;;  %v2339_v31 = vmax.f32 %v2249_v52, 0.0 }
 0x2e3   : > { %3621 = vrot.lane.b32.xlu1 %v6134_v56, %s4668_s16  ;;  %3619 = vrot.lane.b32.xlu0 %v6149_v5, %s4668_s16  ;;  %v2338_v29 = vmax.f32 %v2244_v24, 0.0 }
 0x2e4   : > { %2428 = vst.msk [vmem:[#allocation3 + $0xe1] sm:$0xff] %vm2354_vm14, %v2339_v31 }
 0x2e5   : > { %v3221_v26 = vpop.permute.xlu1 %3220  ;;  %v3219_v46 = vpop.permute.xlu0 %3218  ;;  %v3804_v44 = vld [vmem:[#allocation5 + $0x8] sm:$0xff]  ;;  %v3807_v14 = vld [vmem:[#allocation5 + $0x20] sm:$0xff]  ;;  %2427 = vst.msk [vmem:[#allocation3 + $0xd9] sm:$0xff] %vm2354_vm14, %v2338_v29 }
 0x2e6   : > { %3313 = vst.msk [vmem:[#allocation5 + $0x50] sm:$0xff] %vm2667_vm0, %v3221_v26  ;;  %3312 = vst.msk [vmem:[#allocation5 + $0x38] sm:$0xff] %vm2667_vm0, %v3219_v46  ;;  %v4495_v1 = vpack.c.bf16 %v3807_v14, %v3804_v44  ;;  %v3805_v44 = vld [vmem:[#allocation5 + $0x10] sm:$0xff]  ;;  %v3808_v14 = vld [vmem:[#allocation5 + $0x28] sm:$0xff] }
 0x2e7   : > { %2979 = vrot.lane.b32.xlu1 %v6122_v47, %s4668_s16  ;;  %2977 = vrot.lane.b32.xlu0 %v6124_v48, %s4668_s16 }
 0x2e8   : > { %4496 = vmatprep.subr.bf16.mxu1 %v4495_v1 }
 0x2e9   : > { %v2578_v19 = vpop.permute.xlu1 %2577  ;;  %v2576_v33 = vpop.permute.xlu0 %2575  ;;  %v3803_v9 = vld [vmem:[#allocation5] sm:$0xff]  ;;  %v3806_v2 = vld [vmem:[#allocation5 + $0x18] sm:$0xff] }
 0x2ea   : > { %2671 = vst.msk [vmem:[#allocation5 + $0x48] sm:$0xff] %vm2667_vm0, %v2578_v19  ;;  %2670 = vst.msk [vmem:[#allocation5 + $0x30] sm:$0xff] %vm2667_vm0, %v2576_v33  ;;  %v4497_v34 = vpack.c.bf16 %v3806_v2, %v3803_v9  ;;  %v3757_v9 = vld [vmem:[#allocation3 + $0x19a] sm:$0xff]  ;;  %v3758_v2 = vld [vmem:[#allocation3 + $0x1a2] sm:$0xff] }
 0x2eb   : > { %3240 = vrot.lane.b32.xlu1 %v6132_v13, %s4666_s14  ;;  %3238 = vrot.lane.b32.xlu0 %v6138_v58, %s4666_s14  ;;  %v6236_v3 = vld [vmem:[#allocation3 + $0xe2] sm:$0xff]  ;;  %3789 = vst.msk [vmem:[#allocation5 + $0x2e0] sm:$0xff] %vm2354_vm14, %v3757_v9  ;;  %3790 = vst.msk [vmem:[#allocation5 + $0x2f8] sm:$0xff] %vm2354_vm14, %v3758_v2 }
 0x2ec   : > { %4498 = vmatpush1.bf16.xpose.msra.mxu1 %v4497_v34  ;;  %v6238_v36 = vld [vmem:[#allocation3 + $0xe1] sm:$0xff]  ;;  %3774 = vst.msk [vmem:[#allocation5 + $0x178] sm:$0xff] %vm2354_vm14, %v6236_v3  ;;  %v6256_v30 = vld [vmem:[#allocation3 + $0xd9] sm:$0xff] }
 0x2ed   : > { %v3414_v45 = vpop.permute.xlu1 %3413  ;;  %v3412_v55 = vpop.permute.xlu0 %3411  ;;  %v6250_v4 = vld [vmem:[#allocation3 + $0xda] sm:$0xff]  ;;  %3135 = vst.msk [vmem:[#allocation5 + $0x1a0] sm:$0xff] %vm2354_vm14, %v6238_v36  ;;  %3134 = vst.msk [vmem:[#allocation5 + $0x188] sm:$0xff] %vm2354_vm14, %v6256_v30 }
 0x2ee   : > { %3506 = vst.msk [vmem:[#allocation5 + $0x50] sm:$0xff] %vm2860_vm1, %v3414_v45  ;;  %3505 = vst.msk [vmem:[#allocation5 + $0x38] sm:$0xff] %vm2860_vm1, %v3412_v55  ;;  %v2461_v22 = vld [vmem:[#allocation3 + $0xd8] sm:$0xff]  ;;  %v6320_v52 = vld [vmem:[#allocation3 + $0xe0] sm:$0xff]  ;;  %v4562_v45 = vpack.c.bf16 %v3808_v14, %v3805_v44 }
 0x2ef   : > { %2597 = vrot.lane.b32.xlu1 %v6086_v51, %s4666_s14  ;;  %2595 = vrot.lane.b32.xlu0 %v6100_v18, %s4666_s14  ;;  %3773 = vst.msk [vmem:[#allocation5 + $0x160] sm:$0xff] %vm2354_vm14, %v6250_v4  ;;  %v2462_v51 = vld [vmem:[#allocation3 + $0xe0] sm:$0xff]  ;;  %2493 = vst.msk [vmem:[#allocation5 + $0x1b0] sm:$0xff] %vm2354_vm14, %v2461_v22  ;;  %v6322_v38 = vld [vmem:[#allocation3 + $0xd8] sm:$0xff] }
 0x2f0   : > { %2494 = vst.msk [vmem:[#allocation5 + $0x1c8] sm:$0xff] %vm2354_vm14, %v2462_v51 }
 0x2f1   : > { %v2771_v18 = vpop.permute.xlu1 %2770  ;;  %v2769_v47 = vpop.permute.xlu0 %2768 }
 0x2f2   : > { %2864 = vst.msk [vmem:[#allocation5 + $0x48] sm:$0xff] %vm2860_vm1, %v2771_v18  ;;  %2863 = vst.msk [vmem:[#allocation5 + $0x30] sm:$0xff] %vm2860_vm1, %v2769_v47 }
 0x2f3   : > { %3433 = vrot.lane.b32.xlu1 %v6246_v23, %s4667_s15  ;;  %3431 = vrot.lane.b32.xlu0 %v6248_v12, %s4667_s15  ;;  %v4470_v48 = vpop.f32.mrb[18].mxu0 }
 0x2f4   : > { %v2259_v57 = vadd.f32 %v4470_v48, %v5802_v10  ;;  %v2253_v20 = vpop.f32.mrb[19].mxu0 }
 0x2f5   : > { %v3606_v39 = vpop.permute.xlu1 %3605  ;;  %v3604_v37 = vpop.permute.xlu0 %3603  ;;  %v2254_v32 = vadd.f32 %v5802_v10, %v2253_v20 }
 0x2f6   : > { %3698 = vst.msk [vmem:[#allocation5 + $0x50] sm:$0xff] %vm3053_vm2, %v3606_v39  ;;  %3697 = vst.msk [vmem:[#allocation5 + $0x38] sm:$0xff] %vm3053_vm2, %v3604_v37  ;;  %v2341_v17 = vmax.f32 %v2259_v57, 0.0 }
 0x2f7   : > { %2790 = vrot.lane.b32.xlu1 %v6084_v54, %s4667_s15  ;;  %2788 = vrot.lane.b32.xlu0 %v6090_v35, %s4667_s15  ;;  %v2340_v28 = vmax.f32 %v2254_v32, 0.0 }
 0x2f8   : > { %2430 = vst.msk [vmem:[#allocation3 + $0xf9] sm:$0xff] %vm2354_vm14, %v2341_v17 }
 0x2f9   : > { %v2964_v16 = vpop.permute.xlu1 %2963  ;;  %v2962_v53 = vpop.permute.xlu0 %2961  ;;  %2429 = vst.msk [vmem:[#allocation3 + $0xf1] sm:$0xff] %vm2354_vm14, %v2340_v28 }
 0x2fa   : > { %3057 = vst.msk [vmem:[#allocation5 + $0x48] sm:$0xff] %vm3053_vm2, %v2964_v16  ;;  %3056 = vst.msk [vmem:[#allocation5 + $0x30] sm:$0xff] %vm3053_vm2, %v2962_v53 }
 0x2fb   : > { %3625 = vrot.lane.b32.xlu1 %v6184_v27, %s4668_s16  ;;  %3623 = vrot.lane.b32.xlu0 %v6200_v63, %s4668_s16 }
 0x2fd   : > { %v3225_v54 = vpop.permute.xlu1 %3224  ;;  %v3813_v35 = vld [vmem:[#allocation5 + $0x50] sm:$0xff]  ;;  %v3223_v41 = vpop.permute.xlu0 %3222  ;;  %v3810_v6 = vld [vmem:[#allocation5 + $0x38] sm:$0xff] }
 0x2fe   : > { %3315 = vst.msk [vmem:[#allocation5 + $0x80] sm:$0xff] %vm2667_vm0, %v3225_v54  ;;  %3314 = vst.msk [vmem:[#allocation5 + $0x68] sm:$0xff] %vm2667_vm0, %v3223_v41  ;;  %v4499_v59 = vpack.c.bf16 %v3813_v35, %v3810_v6 }
 0x2ff   : > { %2983 = vrot.lane.b32.xlu1 %v6178_v60, %s4668_s16  ;;  %2981 = vrot.lane.b32.xlu0 %v6180_v21, %s4668_s16  ;;  %v6290_v11 = vld [vmem:[#allocation3 + $0xfa] sm:$0xff] }
 0x300   : > { %4500 = vmatprep.subr.bf16.mxu1 %v4499_v59  ;;  %v6292_v0 = vld [vmem:[#allocation3 + $0xf9] sm:$0xff]  ;;  %3776 = vst.msk [vmem:[#allocation5 + $0x1a8] sm:$0xff] %vm2354_vm14, %v6290_v11  ;;  %v6308_v7 = vld [vmem:[#allocation3 + $0xf1] sm:$0xff] }
 0x301   : > { %v2582_v25 = vpop.permute.xlu1 %2581  ;;  %v3812_v42 = vld [vmem:[#allocation5 + $0x48] sm:$0xff]  ;;  %v2580_v61 = vpop.permute.xlu0 %2579  ;;  %v3809_v60 = vld [vmem:[#allocation5 + $0x30] sm:$0xff]  ;;  %3137 = vst.msk [vmem:[#allocation5 + $0x1d0] sm:$0xff] %vm2354_vm14, %v6292_v0  ;;  %3136 = vst.msk [vmem:[#allocation5 + $0x1b8] sm:$0xff] %vm2354_vm14, %v6308_v7 }
 0x302   : > { %v6296_v43 = vld [vmem:[#allocation3 + $0xf2] sm:$0xff]  ;;  %2673 = vst.msk [vmem:[#allocation5 + $0x78] sm:$0xff] %vm2667_vm0, %v2582_v25  ;;  %2672 = vst.msk [vmem:[#allocation5 + $0x60] sm:$0xff] %vm2667_vm0, %v2580_v61  ;;  %v4501_v21 = vpack.c.bf16 %v3812_v42, %v3809_v60  ;;  %v3814_v25 = vld [vmem:[#allocation5 + $0x58] sm:$0xff] }
 0x303   : > { %3775 = vst.msk [vmem:[#allocation5 + $0x190] sm:$0xff] %vm2354_vm14, %v6296_v43  ;;  %3244 = vrot.lane.b32.xlu1 %v6182_v40, %s4666_s14  ;;  %3242 = vrot.lane.b32.xlu0 %v6190_v50, %s4666_s14  ;;  %v2464_v15 = vld [vmem:[#allocation3 + $0xf8] sm:$0xff]  ;;  %v2463_v62 = vld [vmem:[#allocation3 + $0xf0] sm:$0xff] }
 0x304   : > { %2496 = vst.msk [vmem:[#allocation5 + $0x1f8] sm:$0xff] %vm2354_vm14, %v2464_v15  ;;  %4502 = vmatpush1.bf16.xpose.msra.mxu1 %v4501_v21  ;;  %2495 = vst.msk [vmem:[#allocation5 + $0x1e0] sm:$0xff] %vm2354_vm14, %v2463_v62  ;;  %v3811_v59 = vld [vmem:[#allocation5 + $0x40] sm:$0xff] }
 0x305   : > { %v3418_v49 = vpop.permute.xlu1 %3417  ;;  %v3416_v8 = vpop.permute.xlu0 %3415  ;;  %v6397_v42 = vld [vmem:[%s6978_s2] ss:$0 sm:$0xff] }
 0x306   : > { %3508 = vst.msk [vmem:[#allocation5 + $0x80] sm:$0xff] %vm2860_vm1, %v3418_v49  ;;  %3507 = vst.msk [vmem:[#allocation5 + $0x68] sm:$0xff] %vm2860_vm1, %v3416_v8 }
 0x307   : > { %2601 = vrot.lane.b32.xlu1 %v6134_v56, %s4666_s14  ;;  %2599 = vrot.lane.b32.xlu0 %v6149_v5, %s4666_s14  ;;  %v4473_v24 = vpop.f32.mrb[20].mxu0  ;;  %v3856_v46 = vld [vmem:[#allocation5 + $0x1a8] sm:$0xff] }
 0x308   : > { %v2269_v31 = vadd.f32 %v4473_v24, %v5802_v10  ;;  %v2263_v29 = vpop.f32.mrb[21].mxu0  ;;  %v4568_v24 = vpack.c.bf16 %v3814_v25, %v3811_v59 }
 0x309   : > { %v2775_v26 = vpop.permute.xlu1 %2774  ;;  %v2773_v1 = vpop.permute.xlu0 %2772  ;;  %v2264_v5 = vadd.f32 %v5802_v10, %v2263_v29 }
 0x30a   : > { %2866 = vst.msk [vmem:[#allocation5 + $0x78] sm:$0xff] %vm2860_vm1, %v2775_v26  ;;  %v3853_v19 = vld [vmem:[#allocation5 + $0x190] sm:$0xff]  ;;  %2865 = vst.msk [vmem:[#allocation5 + $0x60] sm:$0xff] %vm2860_vm1, %v2773_v1  ;;  %v2343_v34 = vmax.f32 %v2269_v31, 0.0  ;;  %v6407_v26 = vld [vmem:[#allocation3 + $0xf8] sm:$0xff] }
 0x30b   : > { %3437 = vrot.lane.b32.xlu1 %v6320_v52, %s4667_s15  ;;  %3435 = vrot.lane.b32.xlu0 %v6322_v38, %s4667_s15  ;;  %v4559_v33 = vpack.c.bf16 %v3856_v46, %v3853_v19  ;;  %v2342_v55 = vmax.f32 %v2264_v5, 0.0  ;;  %v6409_v46 = vld [vmem:[#allocation3 + $0xf0] sm:$0xff] }
 0x30c   : > { %2432 = vst.msk [vmem:[#allocation3 + $0x111] sm:$0xff] %vm2354_vm14, %v2343_v34 }
 0x30d   : > { %4561 = vmatprep.subr.msk.bf16.mxu0 %vm6328_vm3, %v4559_v33  ;;  %v3610_v10 = vpop.permute.xlu1 %3609  ;;  %v3608_v51 = vpop.permute.xlu0 %3607  ;;  %2431 = vst.msk [vmem:[#allocation3 + $0x109] sm:$0xff] %vm2354_vm14, %v2342_v55 }
 0x30e   : > { %3700 = vst.msk [vmem:[#allocation5 + $0x80] sm:$0xff] %vm3053_vm2, %v3610_v10  ;;  %4564 = vmatpush3.bf16.xpose.msk.msra.mxu0 %vm6328_vm3, %v4562_v45  ;;  %3699 = vst.msk [vmem:[#allocation5 + $0x68] sm:$0xff] %vm3053_vm2, %v3608_v51  ;;  %v3820_v51 = vld [vmem:[#allocation5 + $0x88] sm:$0xff] }
 0x30f   : > { %2794 = vrot.lane.b32.xlu1 %v6132_v13, %s4667_s15  ;;  %2792 = vrot.lane.b32.xlu0 %v6138_v58, %s4667_s15 }
 0x311   : > { %v2968_v22 = vpop.permute.xlu1 %2967  ;;  %v2966_v18 = vpop.permute.xlu0 %2965 }
 0x312   : > { %3059 = vst.msk [vmem:[#allocation5 + $0x78] sm:$0xff] %vm3053_vm2, %v2968_v22  ;;  %3058 = vst.msk [vmem:[#allocation5 + $0x60] sm:$0xff] %vm3053_vm2, %v2966_v18 }
 0x313   : > { %3629 = vrot.lane.b32.xlu1 %v6238_v36, %s4668_s16  ;;  %3627 = vrot.lane.b32.xlu0 %v6256_v30, %s4668_s16  ;;  %v6358_v47 = vld [vmem:[#allocation3 + $0x112] sm:$0xff] }
 0x314   : > { %v6360_v13 = vld [vmem:[#allocation3 + $0x111] sm:$0xff]  ;;  %3778 = vst.msk [vmem:[#allocation5 + $0x1d8] sm:$0xff] %vm2354_vm14, %v6358_v47  ;;  %v6378_v17 = vld [vmem:[#allocation3 + $0x108] sm:$0xff] }
 0x315   : > { %v3229_v48 = vpop.permute.xlu1 %3228  ;;  %v3819_v39 = vld [vmem:[#allocation5 + $0x80] sm:$0xff]  ;;  %v3227_v57 = vpop.permute.xlu0 %3226  ;;  %v3816_v37 = vld [vmem:[#allocation5 + $0x68] sm:$0xff]  ;;  %3139 = vst.msk [vmem:[#allocation5 + $0x200] sm:$0xff] %vm2354_vm14, %v6360_v13  ;;  %2497 = vst.msk [vmem:[#allocation5 + $0x210] sm:$0xff] %vm2354_vm14, %v6378_v17 }
 0x316   : > { %v6364_v58 = vld [vmem:[#allocation3 + $0x10a] sm:$0xff]  ;;  %3317 = vst.msk [vmem:[#allocation5 + $0xb0] sm:$0xff] %vm2667_vm0, %v3229_v48  ;;  %3316 = vst.msk [vmem:[#allocation5 + $0x98] sm:$0xff] %vm2667_vm0, %v3227_v57  ;;  %v4503_v32 = vpack.c.bf16 %v3819_v39, %v3816_v37  ;;  %v3817_v57 = vld [vmem:[#allocation5 + $0x70] sm:$0xff] }
 0x317   : > { %v6367_v20 = vld [vmem:[#allocation3 + $0x110] sm:$0xff]  ;;  %3777 = vst.msk [vmem:[#allocation5 + $0x1c0] sm:$0xff] %vm2354_vm14, %v6364_v58  ;;  %2987 = vrot.lane.b32.xlu1 %v6246_v23, %s4668_s16  ;;  %2985 = vrot.lane.b32.xlu0 %v6248_v12, %s4668_s16 }
 0x318   : > { %v6380_v28 = vld [vmem:[#allocation3 + $0x109] sm:$0xff]  ;;  %2498 = vst.msk [vmem:[#allocation5 + $0x228] sm:$0xff] %vm2354_vm14, %v6367_v20  ;;  %4504 = vmatprep.subr.bf16.mxu1 %v4503_v32 }
 0x319   : > { %3138 = vst.msk [vmem:[#allocation5 + $0x1e8] sm:$0xff] %vm2354_vm14, %v6380_v28  ;;  %v2586_v16 = vpop.permute.xlu1 %2585  ;;  %v3818_v23 = vld [vmem:[#allocation5 + $0x78] sm:$0xff]  ;;  %v2584_v12 = vpop.permute.xlu0 %2583  ;;  %v3815_v53 = vld [vmem:[#allocation5 + $0x60] sm:$0xff] }
 0x31a   : > { %2675 = vst.msk [vmem:[#allocation5 + $0xa8] sm:$0xff] %vm2667_vm0, %v2586_v16  ;;  %2674 = vst.msk [vmem:[#allocation5 + $0x90] sm:$0xff] %vm2667_vm0, %v2584_v12  ;;  %v4505_v54 = vpack.c.bf16 %v3818_v23, %v3815_v53 }
 0x31b   : > { %3248 = vrot.lane.b32.xlu1 %v6236_v3, %s4666_s14  ;;  %3246 = vrot.lane.b32.xlu0 %v6250_v4, %s4666_s14  ;;  %v4476_v35 = vpop.f32.mrb[22].mxu0  ;;  %v3862_v6 = vld [vmem:[#allocation5 + $0x1d8] sm:$0xff] }
 0x31c   : > { %4506 = vmatpush1.bf16.xpose.msra.mxu1 %v4505_v54  ;;  %v2279_v61 = vadd.f32 %v6397_v42, %v4476_v35  ;;  %v2273_v21 = vpop.f32.mrb[23].mxu0  ;;  %v4574_v35 = vpack.c.bf16 %v3820_v51, %v3817_v57 }
 0x31d   : > { %v3422_v41 = vpop.permute.xlu1 %3421  ;;  %v3420_v60 = vpop.permute.xlu0 %3419  ;;  %v2274_v62 = vadd.f32 %v6397_v42, %v2273_v21 }
 0x31e   : > { %3510 = vst.msk [vmem:[#allocation5 + $0xb0] sm:$0xff] %vm2860_vm1, %v3422_v41  ;;  %v3859_v15 = vld [vmem:[#allocation5 + $0x1c0] sm:$0xff]  ;;  %3509 = vst.msk [vmem:[#allocation5 + $0x98] sm:$0xff] %vm2860_vm1, %v3420_v60  ;;  %v2345_v8 = vmax.f32 %v2279_v61, 0.0 }
 0x31f   : > { %2605 = vrot.lane.b32.xlu1 %v6184_v27, %s4666_s14  ;;  %2603 = vrot.lane.b32.xlu0 %v6200_v63, %s4666_s14  ;;  %v4565_v49 = vpack.c.bf16 %v3862_v6, %v3859_v15  ;;  %v2344_v44 = vmax.f32 %v2274_v62, 0.0 }
 0x320   : > { %2434 = vst.msk [vmem:[#allocation3 + $0x129] sm:$0xff] %vm2354_vm14, %v2345_v8 }
 0x321   : > { %4567 = vmatprep.subr.msk.bf16.mxu0 %vm6328_vm3, %v4565_v49  ;;  %v2779_v14 = vpop.permute.xlu1 %2778  ;;  %v2777_v27 = vpop.permute.xlu0 %2776  ;;  %2433 = vst.msk [vmem:[#allocation3 + $0x121] sm:$0xff] %vm2354_vm14, %v2344_v44 }
 0x322   : > { %2868 = vst.msk [vmem:[#allocation5 + $0xa8] sm:$0xff] %vm2860_vm1, %v2779_v14  ;;  %4570 = vmatpush3.bf16.xpose.msk.msra.mxu0 %vm6328_vm3, %v4568_v24  ;;  %2867 = vst.msk [vmem:[#allocation5 + $0x90] sm:$0xff] %vm2860_vm1, %v2777_v27 }
 0x323   : > { %3441 = vrot.lane.b32.xlu1 %v6407_v26, %s4667_s15  ;;  %3439 = vrot.lane.b32.xlu0 %v6409_v46, %s4667_s15 }
 0x325   : > { %v3614_v63 = vpop.permute.xlu1 %3613  ;;  %v3612_v31 = vpop.permute.xlu0 %3611 }
 0x326   : > { %3702 = vst.msk [vmem:[#allocation5 + $0xb0] sm:$0xff] %vm3053_vm2, %v3614_v63  ;;  %3701 = vst.msk [vmem:[#allocation5 + $0x98] sm:$0xff] %vm3053_vm2, %v3612_v31  ;;  %v3823_v31 = vld [vmem:[#allocation5 + $0xa0] sm:$0xff] }
 0x327   : > { %2798 = vrot.lane.b32.xlu1 %v6182_v40, %s4667_s15  ;;  %2796 = vrot.lane.b32.xlu0 %v6190_v50, %s4667_s15  ;;  %v6429_v1 = vld [vmem:[#allocation3 + $0x12a] sm:$0xff] }
 0x328   : > { %v6431_v19 = vld [vmem:[#allocation3 + $0x129] sm:$0xff]  ;;  %3780 = vst.msk [vmem:[#allocation5 + $0x208] sm:$0xff] %vm2354_vm14, %v6429_v1  ;;  %v6440_v2 = vld [vmem:[#allocation3 + $0x120] sm:$0xff] }
 0x329   : > { %v2972_v29 = vpop.permute.xlu1 %2971  ;;  %v6435_v5 = vld [vmem:[#allocation3 + $0x122] sm:$0xff]  ;;  %v2970_v33 = vpop.permute.xlu0 %2969  ;;  %3141 = vst.msk [vmem:[#allocation5 + $0x230] sm:$0xff] %vm2354_vm14, %v6431_v19  ;;  %2499 = vst.msk [vmem:[#allocation5 + $0x240] sm:$0xff] %vm2354_vm14, %v6440_v2 }
 0x32a   : > { %3061 = vst.msk [vmem:[#allocation5 + $0xa8] sm:$0xff] %vm3053_vm2, %v2972_v29  ;;  %v6438_v9 = vld [vmem:[#allocation3 + $0x128] sm:$0xff]  ;;  %3060 = vst.msk [vmem:[#allocation5 + $0x90] sm:$0xff] %vm3053_vm2, %v2970_v33 }
 0x32b   : > { %3779 = vst.msk [vmem:[#allocation5 + $0x1f0] sm:$0xff] %vm2354_vm14, %v6435_v5  ;;  %3633 = vrot.lane.b32.xlu1 %v6292_v0, %s4668_s16  ;;  %3631 = vrot.lane.b32.xlu0 %v6308_v7, %s4668_s16  ;;  %v6451_v40 = vld [vmem:[#allocation3 + $0x121] sm:$0xff]  ;;  %2500 = vst.msk [vmem:[#allocation5 + $0x258] sm:$0xff] %vm2354_vm14, %v6438_v9 }
 0x32c   : > { %3140 = vst.msk [vmem:[#allocation5 + $0x218] sm:$0xff] %vm2354_vm14, %v6451_v40 }
 0x32d   : > { %v3233_v50 = vpop.permute.xlu1 %3232  ;;  %v3825_v34 = vld [vmem:[#allocation5 + $0xb0] sm:$0xff]  ;;  %v3231_v45 = vpop.permute.xlu0 %3230  ;;  %v3822_v55 = vld [vmem:[#allocation5 + $0x98] sm:$0xff] }
 0x32e   : > { %3319 = vst.msk [vmem:[#allocation5 + $0xe0] sm:$0xff] %vm2667_vm0, %v3233_v50  ;;  %3318 = vst.msk [vmem:[#allocation5 + $0xc8] sm:$0xff] %vm2667_vm0, %v3231_v45  ;;  %v4507_v10 = vpack.c.bf16 %v3825_v34, %v3822_v55 }
 0x32f   : > { %2991 = vrot.lane.b32.xlu1 %v6320_v52, %s4668_s16  ;;  %2989 = vrot.lane.b32.xlu0 %v6322_v38, %s4668_s16  ;;  %v4479_v22 = vpop.f32.mrb[24].mxu0  ;;  %v3868_v39 = vld [vmem:[#allocation5 + $0x208] sm:$0xff] }
 0x330   : > { %4508 = vmatprep.subr.bf16.mxu1 %v4507_v10  ;;  %v2289_v37 = vadd.f32 %v6397_v42, %v4479_v22  ;;  %v2283_v16 = vpop.f32.mrb[25].mxu0 }
 0x331   : > { %v2590_v18 = vpop.permute.xlu1 %2589  ;;  %v3824_v48 = vld [vmem:[#allocation5 + $0xa8] sm:$0xff]  ;;  %v2588_v32 = vpop.permute.xlu0 %2587  ;;  %v3821_v23 = vld [vmem:[#allocation5 + $0x90] sm:$0xff]  ;;  %v2284_v52 = vadd.f32 %v6397_v42, %v2283_v16 }
 0x332   : > { %2677 = vst.msk [vmem:[#allocation5 + $0xd8] sm:$0xff] %vm2667_vm0, %v2590_v18  ;;  %v3865_v12 = vld [vmem:[#allocation5 + $0x1f0] sm:$0xff]  ;;  %2676 = vst.msk [vmem:[#allocation5 + $0xc0] sm:$0xff] %vm2667_vm0, %v2588_v32  ;;  %v4509_v38 = vpack.c.bf16 %v3824_v48, %v3821_v23  ;;  %v2347_v54 = vmax.f32 %v2289_v37, 0.0 }
 0x333   : > { %3252 = vrot.lane.b32.xlu1 %v6290_v11, %s4666_s14  ;;  %3250 = vrot.lane.b32.xlu0 %v6296_v43, %s4666_s14  ;;  %v4571_v53 = vpack.c.bf16 %v3868_v39, %v3865_v12  ;;  %v2346_v41 = vmax.f32 %v2284_v52, 0.0 }
 0x334   : > { %4510 = vmatpush1.bf16.xpose.msra.mxu1 %v4509_v38  ;;  %2436 = vst.msk [vmem:[#allocation3 + $0x141] sm:$0xff] %vm2354_vm14, %v2347_v54 }
 0x335   : > { %4573 = vmatprep.subr.msk.bf16.mxu0 %vm6328_vm3, %v4571_v53  ;;  %v3426_v6 = vpop.permute.xlu1 %3425  ;;  %v3424_v59 = vpop.permute.xlu0 %3423  ;;  %2435 = vst.msk [vmem:[#allocation3 + $0x139] sm:$0xff] %vm2354_vm14, %v2346_v41 }
 0x336   : > { %3512 = vst.msk [vmem:[#allocation5 + $0xe0] sm:$0xff] %vm2860_vm1, %v3426_v6  ;;  %4576 = vmatpush3.bf16.xpose.msk.msra.mxu0 %vm6328_vm3, %v4574_v35  ;;  %3511 = vst.msk [vmem:[#allocation5 + $0xc8] sm:$0xff] %vm2860_vm1, %v3424_v59 }
 0x337   : > { %2609 = vrot.lane.b32.xlu1 %v6238_v36, %s4666_s14  ;;  %2607 = vrot.lane.b32.xlu0 %v6256_v30, %s4666_s14 }
 0x339   : > { %v2783_v25 = vpop.permute.xlu1 %2782  ;;  %v2781_v61 = vpop.permute.xlu0 %2780 }
 0x33a   : > { %2870 = vst.msk [vmem:[#allocation5 + $0xd8] sm:$0xff] %vm2860_vm1, %v2783_v25  ;;  %2869 = vst.msk [vmem:[#allocation5 + $0xc0] sm:$0xff] %vm2860_vm1, %v2781_v61  ;;  %v3829_v25 = vld [vmem:[#allocation5 + $0xd0] sm:$0xff]  ;;  %v3832_v61 = vld [vmem:[#allocation5 + $0xe8] sm:$0xff] }
 0x33b   : > { %3445 = vrot.lane.b32.xlu1 %v6367_v20, %s4667_s15  ;;  %3443 = vrot.lane.b32.xlu0 %v6378_v17, %s4667_s15  ;;  %v6491_v60 = vld [vmem:[#allocation3 + $0x142] sm:$0xff] }
 0x33c   : > { %v6493_v15 = vld [vmem:[#allocation3 + $0x141] sm:$0xff]  ;;  %3782 = vst.msk [vmem:[#allocation5 + $0x238] sm:$0xff] %vm2354_vm14, %v6491_v60  ;;  %v6502_v49 = vld [vmem:[#allocation3 + $0x138] sm:$0xff] }
 0x33d   : > { %v3618_v21 = vpop.permute.xlu1 %3617  ;;  %v6497_v36 = vld [vmem:[#allocation3 + $0x13a] sm:$0xff]  ;;  %v3616_v30 = vpop.permute.xlu0 %3615  ;;  %3143 = vst.msk [vmem:[#allocation5 + $0x260] sm:$0xff] %vm2354_vm14, %v6493_v15  ;;  %2501 = vst.msk [vmem:[#allocation5 + $0x270] sm:$0xff] %vm2354_vm14, %v6502_v49 }
 0x33e   : > { %3704 = vst.msk [vmem:[#allocation5 + $0xe0] sm:$0xff] %vm3053_vm2, %v3618_v21  ;;  %v6500_v62 = vld [vmem:[#allocation3 + $0x140] sm:$0xff]  ;;  %3703 = vst.msk [vmem:[#allocation5 + $0xc8] sm:$0xff] %vm3053_vm2, %v3616_v30 }
 0x33f   : > { %3781 = vst.msk [vmem:[#allocation5 + $0x220] sm:$0xff] %vm2354_vm14, %v6497_v36  ;;  %2802 = vrot.lane.b32.xlu1 %v6236_v3, %s4667_s15  ;;  %2800 = vrot.lane.b32.xlu0 %v6250_v4, %s4667_s15  ;;  %v6513_v8 = vld [vmem:[#allocation3 + $0x139] sm:$0xff]  ;;  %2502 = vst.msk [vmem:[#allocation5 + $0x288] sm:$0xff] %vm2354_vm14, %v6500_v62  ;;  %v3826_v3 = vld [vmem:[#allocation5 + $0xb8] sm:$0xff] }
 0x340   : > { %3142 = vst.msk [vmem:[#allocation5 + $0x248] sm:$0xff] %vm2354_vm14, %v6513_v8  ;;  %v4580_v18 = vpack.c.bf16 %v3826_v3, %v3823_v31 }
 0x341   : > { %v2976_v24 = vpop.permute.xlu1 %2975  ;;  %v2974_v44 = vpop.permute.xlu0 %2973 }
 0x342   : > { %3063 = vst.msk [vmem:[#allocation5 + $0xd8] sm:$0xff] %vm3053_vm2, %v2976_v24  ;;  %3062 = vst.msk [vmem:[#allocation5 + $0xc0] sm:$0xff] %vm3053_vm2, %v2974_v44  ;;  %v4586_v24 = vpack.c.bf16 %v3832_v61, %v3829_v25 }
 0x343   : > { %3637 = vrot.lane.b32.xlu1 %v6360_v13, %s4668_s16  ;;  %3635 = vrot.lane.b32.xlu0 %v6380_v28, %s4668_s16  ;;  %v4482_v4 = vpop.f32.mrb[26].mxu0  ;;  %v3874_v63 = vld [vmem:[#allocation5 + $0x238] sm:$0xff] }
 0x344   : > { %v2299_v29 = vadd.f32 %v6397_v42, %v4482_v4  ;;  %v2293_v50 = vpop.f32.mrb[27].mxu0 }
 0x345   : > { %v3237_v14 = vpop.permute.xlu1 %3236  ;;  %v3831_v27 = vld [vmem:[#allocation5 + $0xe0] sm:$0xff]  ;;  %v3235_v33 = vpop.permute.xlu0 %3234  ;;  %v3828_v34 = vld [vmem:[#allocation5 + $0xc8] sm:$0xff]  ;;  %v2294_v55 = vadd.f32 %v6397_v42, %v2293_v50 }
 0x346   : > { %3321 = vst.msk [vmem:[#allocation5 + $0x110] sm:$0xff] %vm2667_vm0, %v3237_v14  ;;  %v3871_v45 = vld [vmem:[#allocation5 + $0x220] sm:$0xff]  ;;  %3320 = vst.msk [vmem:[#allocation5 + $0xf8] sm:$0xff] %vm2667_vm0, %v3235_v33  ;;  %v4511_v10 = vpack.c.bf16 %v3831_v27, %v3828_v34  ;;  %v2349_v22 = vmax.f32 %v2299_v29, 0.0 }
 0x347   : > { %2995 = vrot.lane.b32.xlu1 %v6407_v26, %s4668_s16  ;;  %2993 = vrot.lane.b32.xlu0 %v6409_v46, %s4668_s16  ;;  %v4577_v51 = vpack.c.bf16 %v3874_v63, %v3871_v45  ;;  %v2348_v48 = vmax.f32 %v2294_v55, 0.0 }
 0x348   : > { %4512 = vmatprep.subr.bf16.mxu1 %v4511_v10  ;;  %2438 = vst.msk [vmem:[#allocation3 + $0x159] sm:$0xff] %vm2354_vm14, %v2349_v22 }
 0x349   : > { %4579 = vmatprep.subr.msk.bf16.mxu0 %vm6328_vm3, %v4577_v51  ;;  %v2594_v39 = vpop.permute.xlu1 %2593  ;;  %v3830_v57 = vld [vmem:[#allocation5 + $0xd8] sm:$0xff]  ;;  %v2592_v37 = vpop.permute.xlu0 %2591  ;;  %v3827_v26 = vld [vmem:[#allocation5 + $0xc0] sm:$0xff]  ;;  %2437 = vst.msk [vmem:[#allocation3 + $0x151] sm:$0xff] %vm2354_vm14, %v2348_v48 }
 0x34a   : > { %2679 = vst.msk [vmem:[#allocation5 + $0x108] sm:$0xff] %vm2667_vm0, %v2594_v39  ;;  %4582 = vmatpush3.bf16.xpose.msk.msra.mxu0 %vm6328_vm3, %v4580_v18  ;;  %2678 = vst.msk [vmem:[#allocation5 + $0xf0] sm:$0xff] %vm2667_vm0, %v2592_v37  ;;  %v4513_v46 = vpack.c.bf16 %v3830_v57, %v3827_v26 }
 0x34b   : > { %3256 = vrot.lane.b32.xlu1 %v6358_v47, %s4666_s14  ;;  %3254 = vrot.lane.b32.xlu0 %v6364_v58, %s4666_s14 }
 0x34c   : > { %4514 = vmatpush1.bf16.xpose.msra.mxu1 %v4513_v46 }
 0x34d   : > { %v3430_v32 = vpop.permute.xlu1 %3429  ;;  %v3428_v16 = vpop.permute.xlu0 %3427 }
 0x34e   : > { %3514 = vst.msk [vmem:[#allocation5 + $0x110] sm:$0xff] %vm2860_vm1, %v3430_v32  ;;  %3513 = vst.msk [vmem:[#allocation5 + $0xf8] sm:$0xff] %vm2860_vm1, %v3428_v16 }
 0x34f   : > { %2613 = vrot.lane.b32.xlu1 %v6292_v0, %s4666_s14  ;;  %2611 = vrot.lane.b32.xlu0 %v6308_v7, %s4666_s14  ;;  %v6553_v23 = vld [vmem:[#allocation3 + $0x15a] sm:$0xff] }
 0x350   : > { %v6555_v52 = vld [vmem:[#allocation3 + $0x159] sm:$0xff]  ;;  %3784 = vst.msk [vmem:[#allocation5 + $0x268] sm:$0xff] %vm2354_vm14, %v6553_v23  ;;  %v6564_v35 = vld [vmem:[#allocation3 + $0x150] sm:$0xff] }
 0x351   : > { %v2787_v12 = vpop.permute.xlu1 %2786  ;;  %v6559_v38 = vld [vmem:[#allocation3 + $0x152] sm:$0xff]  ;;  %v2785_v53 = vpop.permute.xlu0 %2784  ;;  %3145 = vst.msk [vmem:[#allocation5 + $0x290] sm:$0xff] %vm2354_vm14, %v6555_v52  ;;  %2503 = vst.msk [vmem:[#allocation5 + $0x2a0] sm:$0xff] %vm2354_vm14, %v6564_v35 }
 0x352   : > { %2872 = vst.msk [vmem:[#allocation5 + $0x108] sm:$0xff] %vm2860_vm1, %v2787_v12  ;;  %v6562_v54 = vld [vmem:[#allocation3 + $0x158] sm:$0xff]  ;;  %2871 = vst.msk [vmem:[#allocation5 + $0xf0] sm:$0xff] %vm2860_vm1, %v2785_v53  ;;  %v3835_v12 = vld [vmem:[#allocation5 + $0x100] sm:$0xff] }
 0x353   : > { %3783 = vst.msk [vmem:[#allocation5 + $0x250] sm:$0xff] %vm2354_vm14, %v6559_v38  ;;  %3449 = vrot.lane.b32.xlu1 %v6438_v9, %s4667_s15  ;;  %3447 = vrot.lane.b32.xlu0 %v6440_v2, %s4667_s15  ;;  %v6575_v0 = vld [vmem:[#allocation3 + $0x151] sm:$0xff]  ;;  %2504 = vst.msk [vmem:[#allocation5 + $0x2b8] sm:$0xff] %vm2354_vm14, %v6562_v54  ;;  %v3838_v53 = vld [vmem:[#allocation5 + $0x118] sm:$0xff] }
 0x354   : > { %3144 = vst.msk [vmem:[#allocation5 + $0x278] sm:$0xff] %vm2354_vm14, %v6575_v0 }
 0x355   : > { %v3622_v7 = vpop.permute.xlu1 %3621  ;;  %v3620_v41 = vpop.permute.xlu0 %3619 }
 0x356   : > { %3706 = vst.msk [vmem:[#allocation5 + $0x110] sm:$0xff] %vm3053_vm2, %v3622_v7  ;;  %3705 = vst.msk [vmem:[#allocation5 + $0xf8] sm:$0xff] %vm3053_vm2, %v3620_v41 }
 0x357   : > { %2806 = vrot.lane.b32.xlu1 %v6290_v11, %s4667_s15  ;;  %2804 = vrot.lane.b32.xlu0 %v6296_v43, %s4667_s15  ;;  %v3880_v59 = vld [vmem:[#allocation5 + $0x268] sm:$0xff] }
 0x359   : > { %v2980_v6 = vpop.permute.xlu1 %2979  ;;  %v2978_v21 = vpop.permute.xlu0 %2977 }
 0x35a   : > { %3065 = vst.msk [vmem:[#allocation5 + $0x108] sm:$0xff] %vm3053_vm2, %v2980_v6  ;;  %v3877_v30 = vld [vmem:[#allocation5 + $0x250] sm:$0xff]  ;;  %3064 = vst.msk [vmem:[#allocation5 + $0xf0] sm:$0xff] %vm3053_vm2, %v2978_v21  ;;  %v4592_v6 = vpack.c.bf16 %v3838_v53, %v3835_v12 }
 0x35b   : > { %3641 = vrot.lane.b32.xlu1 %v6431_v19, %s4668_s16  ;;  %3639 = vrot.lane.b32.xlu0 %v6451_v40, %s4668_s16  ;;  %v4583_v11 = vpack.c.bf16 %v3880_v59, %v3877_v30  ;;  %v4485_v44 = vpop.f32.mrb[28].mxu0 }
 0x35c   : > { %v2309_v4 = vadd.f32 %v6397_v42, %v4485_v44  ;;  %v2303_v27 = vpop.f32.mrb[29].mxu0 }
 0x35d   : > { %4585 = vmatprep.subr.msk.bf16.mxu0 %vm6328_vm3, %v4583_v11  ;;  %v3241_v43 = vpop.permute.xlu1 %3240  ;;  %v3837_v3 = vld [vmem:[#allocation5 + $0x110] sm:$0xff]  ;;  %v3239_v14 = vpop.permute.xlu0 %3238  ;;  %v3834_v63 = vld [vmem:[#allocation5 + $0xf8] sm:$0xff]  ;;  %v2304_v31 = vadd.f32 %v6397_v42, %v2303_v27 }
 0x35e   : > { %3323 = vst.msk [vmem:[#allocation5 + $0x140] sm:$0xff] %vm2667_vm0, %v3241_v43  ;;  %4588 = vmatpush3.bf16.xpose.msk.msra.mxu0 %vm6328_vm3, %v4586_v24  ;;  %3322 = vst.msk [vmem:[#allocation5 + $0x128] sm:$0xff] %vm2667_vm0, %v3239_v14  ;;  %v4515_v29 = vpack.c.bf16 %v3837_v3, %v3834_v63  ;;  %v2351_v33 = vmax.f32 %v2309_v4, 0.0 }
 0x35f   : > { %2999 = vrot.lane.b32.xlu1 %v6367_v20, %s4668_s16  ;;  %2997 = vrot.lane.b32.xlu0 %v6378_v17, %s4668_s16  ;;  %v2350_v50 = vmax.f32 %v2304_v31, 0.0 }
 0x360   : > { %4516 = vmatprep.subr.bf16.mxu1 %v4515_v29  ;;  %2440 = vst.msk [vmem:[#allocation3 + $0x171] sm:$0xff] %vm2354_vm14, %v2351_v33 }
 0x361   : > { %v2598_v34 = vpop.permute.xlu1 %2597  ;;  %v3836_v45 = vld [vmem:[#allocation5 + $0x108] sm:$0xff]  ;;  %v2596_v55 = vpop.permute.xlu0 %2595  ;;  %v3833_v10 = vld [vmem:[#allocation5 + $0xf0] sm:$0xff]  ;;  %2439 = vst.msk [vmem:[#allocation3 + $0x169] sm:$0xff] %vm2354_vm14, %v2350_v50 }
 0x362   : > { %2681 = vst.msk [vmem:[#allocation5 + $0x138] sm:$0xff] %vm2667_vm0, %v2598_v34  ;;  %2680 = vst.msk [vmem:[#allocation5 + $0x120] sm:$0xff] %vm2667_vm0, %v2596_v55  ;;  %v4517_v20 = vpack.c.bf16 %v3836_v45, %v3833_v10  ;;  %v3841_v55 = vld [vmem:[#allocation5 + $0x130] sm:$0xff]  ;;  %v3844_v10 = vld [vmem:[#allocation5 + $0x148] sm:$0xff] }
 0x363   : > { %3260 = vrot.lane.b32.xlu1 %v6429_v1, %s4666_s14  ;;  %3258 = vrot.lane.b32.xlu0 %v6435_v5, %s4666_s14 }
 0x364   : > { %4518 = vmatpush1.bf16.xpose.msra.mxu1 %v4517_v20 }
 0x365   : > { %v3434_v17 = vpop.permute.xlu1 %3433  ;;  %v3432_v51 = vpop.permute.xlu0 %3431 }
 0x366   : > { %3516 = vst.msk [vmem:[#allocation5 + $0x140] sm:$0xff] %vm2860_vm1, %v3434_v17  ;;  %3515 = vst.msk [vmem:[#allocation5 + $0x128] sm:$0xff] %vm2860_vm1, %v3432_v51  ;;  %v3895_v51 = vld [vmem:[#allocation5 + $0x2e0] sm:$0xff] }
 0x367   : > { %2617 = vrot.lane.b32.xlu1 %v6360_v13, %s4666_s14  ;;  %2615 = vrot.lane.b32.xlu0 %v6380_v28, %s4666_s14  ;;  %v6621_v22 = vld [vmem:[#allocation3 + $0x172] sm:$0xff] }
 0x368   : > { %v6623_v48 = vld [vmem:[#allocation3 + $0x171] sm:$0xff]  ;;  %3786 = vst.msk [vmem:[#allocation5 + $0x298] sm:$0xff] %vm2354_vm14, %v6621_v22  ;;  %v6632_v26 = vld [vmem:[#allocation3 + $0x168] sm:$0xff] }
 0x369   : > { %v2791_v18 = vpop.permute.xlu1 %2790  ;;  %v6627_v39 = vld [vmem:[#allocation3 + $0x16a] sm:$0xff]  ;;  %v2789_v57 = vpop.permute.xlu0 %2788  ;;  %3147 = vst.msk [vmem:[#allocation5 + $0x2c0] sm:$0xff] %vm2354_vm14, %v6623_v48  ;;  %2505 = vst.msk [vmem:[#allocation5 + $0x2d0] sm:$0xff] %vm2354_vm14, %v6632_v26 }
 0x36a   : > { %2874 = vst.msk [vmem:[#allocation5 + $0x138] sm:$0xff] %vm2860_vm1, %v2791_v18  ;;  %v6630_v37 = vld [vmem:[#allocation3 + $0x170] sm:$0xff]  ;;  %2873 = vst.msk [vmem:[#allocation5 + $0x120] sm:$0xff] %vm2860_vm1, %v2789_v57  ;;  %v3898_v18 = vld [vmem:[#allocation5 + $0x2f8] sm:$0xff] }
 0x36b   : > { %3785 = vst.msk [vmem:[#allocation5 + $0x280] sm:$0xff] %vm2354_vm14, %v6627_v39  ;;  %3453 = vrot.lane.b32.xlu1 %v6500_v62, %s4667_s15  ;;  %3451 = vrot.lane.b32.xlu0 %v6502_v49, %s4667_s15  ;;  %v6643_v13 = vld [vmem:[#allocation3 + $0x169] sm:$0xff]  ;;  %2506 = vst.msk [vmem:[#allocation5 + $0x2e8] sm:$0xff] %vm2354_vm14, %v6630_v37 }
 0x36c   : > { %3146 = vst.msk [vmem:[#allocation5 + $0x2a8] sm:$0xff] %vm2354_vm14, %v6643_v13 }
 0x36d   : > { %v3626_v28 = vpop.permute.xlu1 %3625  ;;  %v3624_v46 = vpop.permute.xlu0 %3623 }
 0x36e   : > { %3708 = vst.msk [vmem:[#allocation5 + $0x140] sm:$0xff] %vm3053_vm2, %v3626_v28  ;;  %3707 = vst.msk [vmem:[#allocation5 + $0x128] sm:$0xff] %vm3053_vm2, %v3624_v46  ;;  %v4601_v46 = vpack.c.bf16 %v3898_v18, %v3895_v51 }
 0x36f   : > { %2810 = vrot.lane.b32.xlu1 %v6358_v47, %s4667_s15  ;;  %2808 = vrot.lane.b32.xlu0 %v6364_v58, %s4667_s15  ;;  %v3886_v16 = vld [vmem:[#allocation5 + $0x298] sm:$0xff] }
 0x371   : > { %v2984_v32 = vpop.permute.xlu1 %2983  ;;  %v2982_v7 = vpop.permute.xlu0 %2981 }
 0x372   : > { %3067 = vst.msk [vmem:[#allocation5 + $0x138] sm:$0xff] %vm3053_vm2, %v2984_v32  ;;  %v3883_v41 = vld [vmem:[#allocation5 + $0x280] sm:$0xff]  ;;  %3066 = vst.msk [vmem:[#allocation5 + $0x120] sm:$0xff] %vm3053_vm2, %v2982_v7 }
 0x373   : > { %3645 = vrot.lane.b32.xlu1 %v6493_v15, %s4668_s16  ;;  %3643 = vrot.lane.b32.xlu0 %v6513_v8, %s4668_s16  ;;  %v4589_v47 = vpack.c.bf16 %v3886_v16, %v3883_v41  ;;  %v4488_v59 = vpop.f32.mrb[30].mxu0 }
 0x374   : > { %v2319_v61 = vadd.f32 %v6397_v42, %v4488_v59  ;;  %v2313_v30 = vpop.f32.mrb[31].mxu0  ;;  %v3850_v59 = vld [vmem:[#allocation5 + $0x178] sm:$0xff] }
 0x375   : > { %4591 = vmatprep.subr.msk.bf16.mxu0 %vm6328_vm3, %v4589_v47  ;;  %v3245_v58 = vpop.permute.xlu1 %3244  ;;  %v3843_v25 = vld [vmem:[#allocation5 + $0x140] sm:$0xff]  ;;  %v3243_v21 = vpop.permute.xlu0 %3242  ;;  %v3840_v11 = vld [vmem:[#allocation5 + $0x128] sm:$0xff]  ;;  %v2314_v24 = vadd.f32 %v6397_v42, %v2313_v30 }
 0x376   : > { %3325 = vst.msk [vmem:[#allocation5 + $0x170] sm:$0xff] %vm2667_vm0, %v3245_v58  ;;  %4594 = vmatpush3.bf16.xpose.msk.msra.mxu0 %vm6328_vm3, %v4592_v6  ;;  %3324 = vst.msk [vmem:[#allocation5 + $0x158] sm:$0xff] %vm2667_vm0, %v3243_v21  ;;  %v4519_v44 = vpack.c.bf16 %v3843_v25, %v3840_v11  ;;  %v2353_v43 = vmax.f32 %v2319_v61, 0.0  ;;  %v3847_v6 = vld [vmem:[#allocation5 + $0x160] sm:$0xff] }
 0x377   : > { %3003 = vrot.lane.b32.xlu1 %v6438_v9, %s4668_s16  ;;  %3001 = vrot.lane.b32.xlu0 %v6440_v2, %s4668_s16  ;;  %v2352_v3 = vmax.f32 %v2314_v24, 0.0 }
 0x378   : > { %4520 = vmatprep.subr.bf16.mxu1 %v4519_v44  ;;  %2442 = vst.msk [vmem:[#allocation3 + $0x189] sm:$0xff] %vm2354_vm14, %v2353_v43 }
 0x379   : > { %v2602_v4 = vpop.permute.xlu1 %2601  ;;  %v3842_v14 = vld [vmem:[#allocation5 + $0x138] sm:$0xff]  ;;  %v2600_v27 = vpop.permute.xlu0 %2599  ;;  %v3839_v63 = vld [vmem:[#allocation5 + $0x120] sm:$0xff]  ;;  %2441 = vst.msk [vmem:[#allocation3 + $0x181] sm:$0xff] %vm2354_vm14, %v2352_v3 }
 0x37a   : > { %2683 = vst.msk [vmem:[#allocation5 + $0x168] sm:$0xff] %vm2667_vm0, %v2602_v4  ;;  %2682 = vst.msk [vmem:[#allocation5 + $0x150] sm:$0xff] %vm2667_vm0, %v2600_v27  ;;  %v4521_v42 = vpack.c.bf16 %v3842_v14, %v3839_v63 }
 0x37b   : > { %3264 = vrot.lane.b32.xlu1 %v6491_v60, %s4666_s14  ;;  %3262 = vrot.lane.b32.xlu0 %v6497_v36, %s4666_s14 }
 0x37c   : > { %4522 = vmatpush1.bf16.xpose.msra.mxu1 %v4521_v42 }
 0x37d   : > { %v3438_v9 = vpop.permute.xlu1 %3437  ;;  %v3436_v2 = vpop.permute.xlu0 %3435 }
 0x37e   : > { %3518 = vst.msk [vmem:[#allocation5 + $0x170] sm:$0xff] %vm2860_vm1, %v3438_v9  ;;  %3517 = vst.msk [vmem:[#allocation5 + $0x158] sm:$0xff] %vm2860_vm1, %v3436_v2 }
 0x37f   : > { %2621 = vrot.lane.b32.xlu1 %v6431_v19, %s4666_s14  ;;  %2619 = vrot.lane.b32.xlu0 %v6451_v40, %s4666_s14  ;;  %v6689_v31 = vld [vmem:[#allocation3 + $0x18a] sm:$0xff] }
 0x380   : > { %v6691_v33 = vld [vmem:[#allocation3 + $0x189] sm:$0xff]  ;;  %3788 = vst.msk [vmem:[#allocation5 + $0x2c8] sm:$0xff] %vm2354_vm14, %v6689_v31  ;;  %v6707_v19 = vld [vmem:[#allocation3 + $0x181] sm:$0xff] }
 0x381   : > { %v2795_v29 = vpop.permute.xlu1 %2794  ;;  %v6695_v50 = vld [vmem:[#allocation3 + $0x182] sm:$0xff]  ;;  %v2793_v34 = vpop.permute.xlu0 %2792  ;;  %3149 = vst.msk [vmem:[#allocation5 + $0x2f0] sm:$0xff] %vm2354_vm14, %v6691_v33  ;;  %3148 = vst.msk [vmem:[#allocation5 + $0x2d8] sm:$0xff] %vm2354_vm14, %v6707_v19 }
 0x382   : > { %2876 = vst.msk [vmem:[#allocation5 + $0x168] sm:$0xff] %vm2860_vm1, %v2795_v29  ;;  %2875 = vst.msk [vmem:[#allocation5 + $0x150] sm:$0xff] %vm2860_vm1, %v2793_v34  ;;  %v6785_v9 = vld [vmem:[#allocation3 + $0x188] sm:$0xff]  ;;  %v6787_v2 = vld [vmem:[#allocation3 + $0x180] sm:$0xff] }
 0x383   : > { %3787 = vst.msk [vmem:[#allocation5 + $0x2b0] sm:$0xff] %vm2354_vm14, %v6695_v50  ;;  %3457 = vrot.lane.b32.xlu1 %v6562_v54, %s4667_s15  ;;  %3455 = vrot.lane.b32.xlu0 %v6564_v35, %s4667_s15 }
 0x385   : > { %v3630_v40 = vpop.permute.xlu1 %3629  ;;  %v3628_v45 = vpop.permute.xlu0 %3627 }
 0x386   : > { %3710 = vst.msk [vmem:[#allocation5 + $0x170] sm:$0xff] %vm3053_vm2, %v3630_v40  ;;  %3709 = vst.msk [vmem:[#allocation5 + $0x158] sm:$0xff] %vm3053_vm2, %v3628_v45 }
 0x387   : > { %2814 = vrot.lane.b32.xlu1 %v6429_v1, %s4667_s15  ;;  %2812 = vrot.lane.b32.xlu0 %v6435_v5, %s4667_s15  ;;  %v3892_v17 = vld [vmem:[#allocation5 + $0x2c8] sm:$0xff]  ;;  %v4598_v5 = vpack.c.bf16 %v3844_v10, %v3841_v55 }
 0x389   : > { %v2988_v20 = vpop.permute.xlu1 %2987  ;;  %v2986_v57 = vpop.permute.xlu0 %2985 }
 0x38a   : > { %3069 = vst.msk [vmem:[#allocation5 + $0x168] sm:$0xff] %vm3053_vm2, %v2988_v20  ;;  %v3889_v28 = vld [vmem:[#allocation5 + $0x2b0] sm:$0xff]  ;;  %3068 = vst.msk [vmem:[#allocation5 + $0x150] sm:$0xff] %vm3053_vm2, %v2986_v57 }
 0x38b   : > { %3649 = vrot.lane.b32.xlu1 %v6555_v52, %s4668_s16  ;;  %3647 = vrot.lane.b32.xlu0 %v6575_v0, %s4668_s16  ;;  %v4595_v1 = vpack.c.bf16 %v3892_v17, %v3889_v28  ;;  %v3374_v57 = vld [vmem:[#allocation3 + $0x1a0] sm:$0xff]  ;;  %v3373_v28 = vld [vmem:[#allocation3 + $0x198] sm:$0xff] }
 0x38d   : > { %4597 = vmatprep.subr.msk.bf16.mxu0 %vm6328_vm3, %v4595_v1  ;;  %v3249_v32 = vpop.permute.xlu1 %3248  ;;  %v3849_v16 = vld [vmem:[#allocation5 + $0x170] sm:$0xff]  ;;  %v3247_v12 = vpop.permute.xlu0 %3246  ;;  %v3846_v53 = vld [vmem:[#allocation5 + $0x158] sm:$0xff] }
 0x38e   : > { %3327 = vst.msk [vmem:[#allocation5 + $0x1a0] sm:$0xff] %vm2667_vm0, %v3249_v32  ;;  %4600 = vmatpush3.bf16.xpose.msk.msra.mxu0 %vm6328_vm3, %v4598_v5  ;;  %3326 = vst.msk [vmem:[#allocation5 + $0x188] sm:$0xff] %vm2667_vm0, %v3247_v12  ;;  %v4523_v7 = vpack.c.bf16 %v3849_v16, %v3846_v53 }
 0x38f   : > { %3007 = vrot.lane.b32.xlu1 %v6500_v62, %s4668_s16  ;;  %3005 = vrot.lane.b32.xlu0 %v6502_v49, %s4668_s16  ;;  %v4604_v49 = vpack.c.bf16 %v3850_v59, %v3847_v6 }
 0x390   : > { %4603 = vmatprep.subr.msk.bf16.mxu0 %vm6328_vm3, %v4601_v46  ;;  %4524 = vmatprep.subr.bf16.mxu1 %v4523_v7 }
 0x391   : > { %v2606_v41 = vpop.permute.xlu1 %2605  ;;  %v3848_v47 = vld [vmem:[#allocation5 + $0x168] sm:$0xff]  ;;  %v2604_v58 = vpop.permute.xlu0 %2603  ;;  %v3845_v25 = vld [vmem:[#allocation5 + $0x150] sm:$0xff] }
 0x392   : > { %2685 = vst.msk [vmem:[#allocation5 + $0x198] sm:$0xff] %vm2667_vm0, %v2606_v41  ;;  %2684 = vst.msk [vmem:[#allocation5 + $0x180] sm:$0xff] %vm2667_vm0, %v2604_v58  ;;  %v4525_v62 = vpack.c.bf16 %v3848_v47, %v3845_v25  ;;  %v3793_v25 = vld [vmem:[%s6979_s3 + $0x10] sm:$0xff] }
 0x393   : > { %3268 = vrot.lane.b32.xlu1 %v6553_v23, %s4666_s14  ;;  %3266 = vrot.lane.b32.xlu0 %v6559_v38, %s4666_s14 }
 0x394   : > { %4526 = vmatpush1.bf16.xpose.msra.mxu1 %v4525_v62  ;;  %4429 = vmatprep.mubr.msk.f32.mxu0 %vm2354_vm14, %v3793_v25 }
 0x395   : > { %v3442_v61 = vpop.permute.xlu1 %3441  ;;  %v3440_v21 = vpop.permute.xlu0 %3439 }
 0x396   : > { %3520 = vst.msk [vmem:[#allocation5 + $0x1a0] sm:$0xff] %vm2860_vm1, %v3442_v61  ;;  %4606 = vmatpush3.bf16.xpose.msk.msra.mxu0 %vm6328_vm3, %v4604_v49  ;;  %3519 = vst.msk [vmem:[#allocation5 + $0x188] sm:$0xff] %vm2860_vm1, %v3440_v21  ;;  %v3796_v61 = vld [vmem:[%s6979_s3 + $0x28] sm:$0xff] }
 0x397   : > { %2625 = vrot.lane.b32.xlu1 %v6493_v15, %s4666_s14  ;;  %2623 = vrot.lane.b32.xlu0 %v6513_v8, %s4666_s14 }
 0x399   : > { %v2799_v30 = vpop.permute.xlu1 %2798  ;;  %v2797_v11 = vpop.permute.xlu0 %2796 }
 0x39a   : > { %2878 = vst.msk [vmem:[#allocation5 + $0x198] sm:$0xff] %vm2860_vm1, %v2799_v30  ;;  %2877 = vst.msk [vmem:[#allocation5 + $0x180] sm:$0xff] %vm2860_vm1, %v2797_v11  ;;  %v3799_v11 = vld [vmem:[%s6979_s3 + $0x40] sm:$0xff] }
 0x39b   : > { %3461 = vrot.lane.b32.xlu1 %v6630_v37, %s4667_s15  ;;  %3459 = vrot.lane.b32.xlu0 %v6632_v26, %s4667_s15 }
 0x39d   : > { %v3634_v56 = vpop.permute.xlu1 %3633  ;;  %v3632_v24 = vpop.permute.xlu0 %3631  ;;  %4430 = vmatmul.mubr.msk.f32.vlgmr.msra.gmra.mrb[32].mxu0 %vm2354_vm14, %v3793_v25 }
 0x39e   : > { %3712 = vst.msk [vmem:[#allocation5 + $0x1a0] sm:$0xff] %vm3053_vm2, %v3634_v56  ;;  %3711 = vst.msk [vmem:[#allocation5 + $0x188] sm:$0xff] %vm3053_vm2, %v3632_v24  ;;  %4431 = vmatprep.mubr.msk.f32.mxu0 %vm2354_vm14, %v3796_v61 }
 0x39f   : > { %2818 = vrot.lane.b32.xlu1 %v6491_v60, %s4667_s15  ;;  %2816 = vrot.lane.b32.xlu0 %v6497_v36, %s4667_s15 }
 0x3a1   : > { %v2992_v15 = vpop.permute.xlu1 %2991  ;;  %v2990_v8 = vpop.permute.xlu0 %2989  ;;  %4432 = vmatmul.mubr.msk.f32.gmra.mrb[34].mxu0 %vm2354_vm14, %v3796_v61 }
 0x3a2   : > { %3071 = vst.msk [vmem:[#allocation5 + $0x198] sm:$0xff] %vm3053_vm2, %v2992_v15  ;;  %3070 = vst.msk [vmem:[#allocation5 + $0x180] sm:$0xff] %vm3053_vm2, %v2990_v8  ;;  %4433 = vmatprep.mubr.msk.f32.mxu0 %vm2354_vm14, %v3799_v11  ;;  %v3802_v15 = vld [vmem:[%s6979_s3 + $0x58] sm:$0xff]  ;;  %v3899_v8 = vld [vmem:[%s6980_s4] sm:$0xff] }
 0x3a3   : > { %3653 = vrot.lane.b32.xlu1 %v6623_v48, %s4668_s16  ;;  %3651 = vrot.lane.b32.xlu0 %v6643_v13, %s4668_s16 }
 0x3a5   : > { %v3253_v44 = vpop.permute.xlu1 %3252  ;;  %v3855_v43 = vld [vmem:[#allocation5 + $0x1a0] sm:$0xff]  ;;  %v3251_v60 = vpop.permute.xlu0 %3250  ;;  %v3852_v3 = vld [vmem:[#allocation5 + $0x188] sm:$0xff]  ;;  %4434 = vmatmul.mubr.msk.f32.gmra.mrb[36].mxu0 %vm2354_vm14, %v3799_v11 }
 0x3a6   : > { %3329 = vst.msk [vmem:[#allocation5 + $0x1d0] sm:$0xff] %vm2667_vm0, %v3253_v44  ;;  %3328 = vst.msk [vmem:[#allocation5 + $0x1b8] sm:$0xff] %vm2667_vm0, %v3251_v60  ;;  %v4527_v36 = vpack.c.bf16 %v3855_v43, %v3852_v3  ;;  %4435 = vmatprep.mubr.msk.f32.mxu0 %vm2354_vm14, %v3802_v15  ;;  %v3900_v44 = vld [vmem:[%s6980_s4 + $0x8] sm:$0xff]  ;;  %v4669_v60 = vmov 0  }
 0x3a7   : > { %3011 = vrot.lane.b32.xlu1 %v6562_v54, %s4668_s16  ;;  %3009 = vrot.lane.b32.xlu0 %v6564_v35, %s4668_s16 }
 0x3a8   : > { %4528 = vmatprep.subr.bf16.mxu1 %v4527_v36  ;;  %4645 = vset.pattern.permute.xlu0 %v4669_v60  ;;  %v3902_v36 = vld [vmem:[%s6980_s4 + $0x18] sm:$0xff] }
 0x3a9   : > { %v2610_v4 = vpop.permute.xlu1 %2609  ;;  %v3854_v14 = vld [vmem:[#allocation5 + $0x198] sm:$0xff]  ;;  %v2608_v27 = vpop.permute.xlu0 %2607  ;;  %v3851_v63 = vld [vmem:[#allocation5 + $0x180] sm:$0xff]  ;;  %4436 = vmatmul.mubr.msk.f32.gmra.mrb[38].mxu0 %vm2354_vm14, %v3802_v15  ;;  %4646 = vset.pattern.permute.xlu1 %v4669_v60 }
 0x3aa   : > { %2687 = vst.msk [vmem:[#allocation5 + $0x1c8] sm:$0xff] %vm2667_vm0, %v2610_v4  ;;  %2686 = vst.msk [vmem:[#allocation5 + $0x1b0] sm:$0xff] %vm2667_vm0, %v2608_v27  ;;  %v4529_v54 = vpack.c.bf16 %v3854_v14, %v3851_v63  ;;  %v3901_v4 = vld [vmem:[%s6980_s4 + $0x10] sm:$0xff] }
 0x3ab   : > { %3272 = vrot.lane.b32.xlu1 %v6621_v22, %s4666_s14  ;;  %3270 = vrot.lane.b32.xlu0 %v6627_v39, %s4666_s14 }
 0x3ac   : > { %4530 = vmatpush1.bf16.xpose.msra.mxu1 %v4529_v54 }
 0x3ad   : > { %v3446_v42 = vpop.permute.xlu1 %3445  ;;  %v3444_v35 = vpop.permute.xlu0 %3443 }
 0x3ae   : > { %3522 = vst.msk [vmem:[#allocation5 + $0x1d0] sm:$0xff] %vm2860_vm1, %v3446_v42  ;;  %3521 = vst.msk [vmem:[#allocation5 + $0x1b8] sm:$0xff] %vm2860_vm1, %v3444_v35 }
 0x3af   : > { %2629 = vrot.lane.b32.xlu1 %v6555_v52, %s4666_s14  ;;  %2627 = vrot.lane.b32.xlu0 %v6575_v0, %s4666_s14 }
 0x3b1   : > { %v2803_v29 = vpop.permute.xlu1 %2802  ;;  %v2801_v34 = vpop.permute.xlu0 %2800 }
 0x3b2   : > { %2880 = vst.msk [vmem:[#allocation5 + $0x1c8] sm:$0xff] %vm2860_vm1, %v2803_v29  ;;  %2879 = vst.msk [vmem:[#allocation5 + $0x1b0] sm:$0xff] %vm2860_vm1, %v2801_v34 }
 0x3b3   : > { %3465 = vrot.lane.b32.xlu1 %v6785_v9, %s4667_s15  ;;  %3463 = vrot.lane.b32.xlu0 %v6787_v2, %s4667_s15 }
 0x3b5   : > { %v3638_v52 = vpop.permute.xlu1 %3637  ;;  %v3636_v0 = vpop.permute.xlu0 %3635 }
 0x3b6   : > { %3714 = vst.msk [vmem:[#allocation5 + $0x1d0] sm:$0xff] %vm3053_vm2, %v3638_v52  ;;  %3713 = vst.msk [vmem:[#allocation5 + $0x1b8] sm:$0xff] %vm3053_vm2, %v3636_v0 }
 0x3b7   : > { %2822 = vrot.lane.b32.xlu1 %v6553_v23, %s4667_s15  ;;  %2820 = vrot.lane.b32.xlu0 %v6559_v38, %s4667_s15 }
 0x3b9   : > { %v2996_v40 = vpop.permute.xlu1 %2995  ;;  %v2994_v45 = vpop.permute.xlu0 %2993 }
 0x3ba   : > { %3073 = vst.msk [vmem:[#allocation5 + $0x1c8] sm:$0xff] %vm3053_vm2, %v2996_v40  ;;  %3072 = vst.msk [vmem:[#allocation5 + $0x1b0] sm:$0xff] %vm3053_vm2, %v2994_v45 }
 0x3bb   : > { %3657 = vrot.lane.b32.xlu1 %v6691_v33, %s4668_s16  ;;  %3655 = vrot.lane.b32.xlu0 %v6707_v19, %s4668_s16 }
 0x3bd   : > { %v3257_v55 = vpop.permute.xlu1 %3256  ;;  %v3861_v10 = vld [vmem:[#allocation5 + $0x1d0] sm:$0xff]  ;;  %v3255_v23 = vpop.permute.xlu0 %3254  ;;  %v3858_v20 = vld [vmem:[#allocation5 + $0x1b8] sm:$0xff] }
 0x3be   : > { %3331 = vst.msk [vmem:[#allocation5 + $0x200] sm:$0xff] %vm2667_vm0, %v3257_v55  ;;  %3330 = vst.msk [vmem:[#allocation5 + $0x1e8] sm:$0xff] %vm2667_vm0, %v3255_v23  ;;  %v4531_v38 = vpack.c.bf16 %v3861_v10, %v3858_v20 }
 0x3bf   : > { %3015 = vrot.lane.b32.xlu1 %v6630_v37, %s4668_s16  ;;  %3013 = vrot.lane.b32.xlu0 %v6632_v26, %s4668_s16 }
 0x3c0   : > { %4532 = vmatprep.subr.bf16.mxu1 %v4531_v38 }
 0x3c1   : > { %v2614_v33 = vpop.permute.xlu1 %2613  ;;  %v3860_v17 = vld [vmem:[#allocation5 + $0x1c8] sm:$0xff]  ;;  %v2612_v19 = vpop.permute.xlu0 %2611  ;;  %v3857_v51 = vld [vmem:[#allocation5 + $0x1b0] sm:$0xff] }
 0x3c2   : > { %2689 = vst.msk [vmem:[#allocation5 + $0x1f8] sm:$0xff] %vm2667_vm0, %v2614_v33  ;;  %2688 = vst.msk [vmem:[#allocation5 + $0x1e0] sm:$0xff] %vm2667_vm0, %v2612_v19  ;;  %v4533_v37 = vpack.c.bf16 %v3860_v17, %v3857_v51 }
 0x3c3   : > { %3276 = vrot.lane.b32.xlu1 %v6689_v31, %s4666_s14  ;;  %3274 = vrot.lane.b32.xlu0 %v6695_v50, %s4666_s14 }
 0x3c4   : > { %4534 = vmatpush1.bf16.xpose.msra.mxu1 %v4533_v37 }
 0x3c5   : > { %v3450_v18 = vpop.permute.xlu1 %3449  ;;  %v3448_v26 = vpop.permute.xlu0 %3447 }
 0x3c6   : > { %3524 = vst.msk [vmem:[#allocation5 + $0x200] sm:$0xff] %vm2860_vm1, %v3450_v18  ;;  %3523 = vst.msk [vmem:[#allocation5 + $0x1e8] sm:$0xff] %vm2860_vm1, %v3448_v26 }
 0x3c7   : > { %2633 = vrot.lane.b32.xlu1 %v6623_v48, %s4666_s14  ;;  %2631 = vrot.lane.b32.xlu0 %v6643_v13, %s4666_s14  ;;  %v3566_v48 = vld [vmem:[#allocation3 + $0x1a1] sm:$0xff]  ;;  %v3565_v13 = vld [vmem:[#allocation3 + $0x199] sm:$0xff] }
 0x3c9   : > { %v2807_v31 = vpop.permute.xlu1 %2806  ;;  %v2805_v50 = vpop.permute.xlu0 %2804 }
 0x3ca   : > { %2882 = vst.msk [vmem:[#allocation5 + $0x1f8] sm:$0xff] %vm2860_vm1, %v2807_v31  ;;  %2881 = vst.msk [vmem:[#allocation5 + $0x1e0] sm:$0xff] %vm2860_vm1, %v2805_v50 }
 0x3cb   : > { %3469 = vrot.lane.b32.xlu1 %v3374_v57, %s4667_s15  ;;  %3467 = vrot.lane.b32.xlu0 %v3373_v28, %s4667_s15 }
 0x3cd   : > { %v3642_v1 = vpop.permute.xlu1 %3641  ;;  %v3640_v5 = vpop.permute.xlu0 %3639 }
 0x3ce   : > { %3716 = vst.msk [vmem:[#allocation5 + $0x200] sm:$0xff] %vm3053_vm2, %v3642_v1  ;;  %3715 = vst.msk [vmem:[#allocation5 + $0x1e8] sm:$0xff] %vm3053_vm2, %v3640_v5 }
 0x3cf   : > { %2826 = vrot.lane.b32.xlu1 %v6621_v22, %s4667_s15  ;;  %2824 = vrot.lane.b32.xlu0 %v6627_v39, %s4667_s15  ;;  %v3792_v22 = vld [vmem:[%s6979_s3 + $0x8] sm:$0xff] }
 0x3d0   : > { %4095 = vmatprep.mubr.f32.mxu1 %v3792_v22 }
 0x3d1   : > { %v3000_v46 = vpop.permute.xlu1 %2999  ;;  %v2998_v32 = vpop.permute.xlu0 %2997 }
 0x3d2   : > { %3075 = vst.msk [vmem:[#allocation5 + $0x1f8] sm:$0xff] %vm3053_vm2, %v3000_v46  ;;  %3074 = vst.msk [vmem:[#allocation5 + $0x1e0] sm:$0xff] %vm3053_vm2, %v2998_v32 }
 0x3d3   : > { %3661 = vrot.lane.b32.xlu1 %v3566_v48, %s4668_s16  ;;  %3659 = vrot.lane.b32.xlu0 %v3565_v13, %s4668_s16 }
 0x3d5   : > { %v3261_v16 = vpop.permute.xlu1 %3260  ;;  %v3867_v12 = vld [vmem:[#allocation5 + $0x200] sm:$0xff]  ;;  %v3259_v39 = vpop.permute.xlu0 %3258  ;;  %v3864_v53 = vld [vmem:[#allocation5 + $0x1e8] sm:$0xff] }
 0x3d6   : > { %3333 = vst.msk [vmem:[#allocation5 + $0x230] sm:$0xff] %vm2667_vm0, %v3261_v16  ;;  %3332 = vst.msk [vmem:[#allocation5 + $0x218] sm:$0xff] %vm2667_vm0, %v3259_v39  ;;  %v4535_v7 = vpack.c.bf16 %v3867_v12, %v3864_v53 }
 0x3d7   : > { %3019 = vrot.lane.b32.xlu1 %v6785_v9, %s4668_s16  ;;  %3017 = vrot.lane.b32.xlu0 %v6787_v2, %s4668_s16 }
 0x3d8   : > { %4536 = vmatprep.subr.bf16.mxu1 %v4535_v7 }
 0x3d9   : > { %v2618_v41 = vpop.permute.xlu1 %2617  ;;  %v3866_v47 = vld [vmem:[#allocation5 + $0x1f8] sm:$0xff]  ;;  %v2616_v6 = vpop.permute.xlu0 %2615  ;;  %v3863_v59 = vld [vmem:[#allocation5 + $0x1e0] sm:$0xff] }
 0x3da   : > { %2691 = vst.msk [vmem:[#allocation5 + $0x228] sm:$0xff] %vm2667_vm0, %v2618_v41  ;;  %2690 = vst.msk [vmem:[#allocation5 + $0x210] sm:$0xff] %vm2667_vm0, %v2616_v6  ;;  %v4537_v58 = vpack.c.bf16 %v3866_v47, %v3863_v59 }
 0x3db   : > { %3905 = vperm.xlu0 %4645, %v3899_v8   ;;  %3910 = vperm.xlu1 %4646, %v3900_v44  }
 0x3dc   : > { %4538 = vmatpush1.bf16.xpose.msra.mxu1 %v4537_v58 }
 0x3dd   : > { %v3454_v62 = vpop.permute.xlu1 %3453  ;;  %v3452_v49 = vpop.permute.xlu0 %3451 }
 0x3de   : > { %3526 = vst.msk [vmem:[#allocation5 + $0x230] sm:$0xff] %vm2860_vm1, %v3454_v62  ;;  %3525 = vst.msk [vmem:[#allocation5 + $0x218] sm:$0xff] %vm2860_vm1, %v3452_v49 }
 0x3df   : > { %3920 = vperm.xlu0 %4645, %v3902_v36   ;;  %3915 = vperm.xlu1 %4646, %v3901_v4  }
 0x3e1   : > { %v2811_v21 = vpop.permute.xlu1 %2810  ;;  %v2809_v30 = vpop.permute.xlu0 %2808 }
 0x3e2   : > { %2884 = vst.msk [vmem:[#allocation5 + $0x228] sm:$0xff] %vm2860_vm1, %v2811_v21  ;;  %2883 = vst.msk [vmem:[#allocation5 + $0x210] sm:$0xff] %vm2860_vm1, %v2809_v30 }
 0x3e5   : > { %v3646_v56 = vpop.permute.xlu1 %3645  ;;  %v3644_v24 = vpop.permute.xlu0 %3643 }
 0x3e6   : > { %3718 = vst.msk [vmem:[#allocation5 + $0x230] sm:$0xff] %vm3053_vm2, %v3646_v56  ;;  %3717 = vst.msk [vmem:[#allocation5 + $0x218] sm:$0xff] %vm3053_vm2, %v3644_v24 }
 0x3e9   : > { %v3004_v43 = vpop.permute.xlu1 %3003  ;;  %v3002_v3 = vpop.permute.xlu0 %3001 }
 0x3ea   : > { %3077 = vst.msk [vmem:[#allocation5 + $0x228] sm:$0xff] %vm3053_vm2, %v3004_v43  ;;  %3076 = vst.msk [vmem:[#allocation5 + $0x210] sm:$0xff] %vm3053_vm2, %v3002_v3 }
 0x3ed   : > { %v3265_v14 = vpop.permute.xlu1 %3264  ;;  %v3873_v27 = vld [vmem:[#allocation5 + $0x230] sm:$0xff]  ;;  %v3263_v63 = vpop.permute.xlu0 %3262  ;;  %v3870_v54 = vld [vmem:[#allocation5 + $0x218] sm:$0xff] }
 0x3ee   : > { %3335 = vst.msk [vmem:[#allocation5 + $0x260] sm:$0xff] %vm2667_vm0, %v3265_v14  ;;  %3334 = vst.msk [vmem:[#allocation5 + $0x248] sm:$0xff] %vm2667_vm0, %v3263_v63  ;;  %v4539_v42 = vpack.c.bf16 %v3873_v27, %v3870_v54 }
 0x3f0   : > { %4540 = vmatprep.subr.bf16.mxu1 %v4539_v42 }
 0x3f1   : > { %v2622_v35 = vpop.permute.xlu1 %2621  ;;  %v3872_v9 = vld [vmem:[#allocation5 + $0x228] sm:$0xff]  ;;  %v2620_v2 = vpop.permute.xlu0 %2619  ;;  %v3869_v29 = vld [vmem:[#allocation5 + $0x210] sm:$0xff] }
 0x3f2   : > { %2693 = vst.msk [vmem:[#allocation5 + $0x258] sm:$0xff] %vm2667_vm0, %v2622_v35  ;;  %2692 = vst.msk [vmem:[#allocation5 + $0x240] sm:$0xff] %vm2667_vm0, %v2620_v2  ;;  %v4541_v34 = vpack.c.bf16 %v3872_v9, %v3869_v29 }
 0x3f4   : > { %4542 = vmatpush1.bf16.xpose.msra.mxu1 %v4541_v34 }
 0x3f5   : > { %v3458_v52 = vpop.permute.xlu1 %3457  ;;  %v3456_v0 = vpop.permute.xlu0 %3455 }
 0x3f6   : > { %3528 = vst.msk [vmem:[#allocation5 + $0x260] sm:$0xff] %vm2860_vm1, %v3458_v52  ;;  %3527 = vst.msk [vmem:[#allocation5 + $0x248] sm:$0xff] %vm2860_vm1, %v3456_v0 }
 0x3f9   : > { %v2815_v40 = vpop.permute.xlu1 %2814  ;;  %v2813_v45 = vpop.permute.xlu0 %2812 }
 0x3fa   : > { %2886 = vst.msk [vmem:[#allocation5 + $0x258] sm:$0xff] %vm2860_vm1, %v2815_v40  ;;  %2885 = vst.msk [vmem:[#allocation5 + $0x240] sm:$0xff] %vm2860_vm1, %v2813_v45 }
 0x3fd   : > { %v3650_v55 = vpop.permute.xlu1 %3649  ;;  %v3648_v10 = vpop.permute.xlu0 %3647 }
 0x3fe   : > { %3720 = vst.msk [vmem:[#allocation5 + $0x260] sm:$0xff] %vm3053_vm2, %v3650_v55  ;;  %3719 = vst.msk [vmem:[#allocation5 + $0x248] sm:$0xff] %vm3053_vm2, %v3648_v10  ;;  %v3791_v55 = vld [vmem:[%s6979_s3] sm:$0xff] }
 0x3ff   : > { %v3795_v10 = vld [vmem:[%s6979_s3 + $0x20] sm:$0xff] }
 0x401   : > { %v3008_v23 = vpop.permute.xlu1 %3007  ;;  %v3006_v20 = vpop.permute.xlu0 %3005 }
 0x402   : > { %3079 = vst.msk [vmem:[#allocation5 + $0x258] sm:$0xff] %vm3053_vm2, %v3008_v23  ;;  %3078 = vst.msk [vmem:[#allocation5 + $0x240] sm:$0xff] %vm3053_vm2, %v3006_v20  ;;  %v3794_v23 = vld [vmem:[%s6979_s3 + $0x18] sm:$0xff] }
 0x403   : > { %v3798_v20 = vld [vmem:[%s6979_s3 + $0x38] sm:$0xff] }
 0x405   : > { %v3269_v38 = vpop.permute.xlu1 %3268  ;;  %v3879_v33 = vld [vmem:[#allocation5 + $0x260] sm:$0xff]  ;;  %v3267_v17 = vpop.permute.xlu0 %3266  ;;  %v3876_v19 = vld [vmem:[#allocation5 + $0x248] sm:$0xff] }
 0x406   : > { %3337 = vst.msk [vmem:[#allocation5 + $0x290] sm:$0xff] %vm2667_vm0, %v3269_v38  ;;  %3336 = vst.msk [vmem:[#allocation5 + $0x278] sm:$0xff] %vm2667_vm0, %v3267_v17  ;;  %v4543_v51 = vpack.c.bf16 %v3879_v33, %v3876_v19  ;;  %v3797_v38 = vld [vmem:[%s6979_s3 + $0x30] sm:$0xff]  ;;  %v3800_v17 = vld [vmem:[%s6979_s3 + $0x48] sm:$0xff] }
 0x407   : > { %v3801_v33 = vld [vmem:[%s6979_s3 + $0x50] sm:$0xff] }
 0x408   : > { %4544 = vmatprep.subr.bf16.mxu1 %v4543_v51 }
 0x409   : > { %v2626_v37 = vpop.permute.xlu1 %2625  ;;  %v3878_v18 = vld [vmem:[#allocation5 + $0x258] sm:$0xff]  ;;  %v2624_v26 = vpop.permute.xlu0 %2623  ;;  %v3875_v57 = vld [vmem:[#allocation5 + $0x240] sm:$0xff] }
 0x40a   : > { %2695 = vst.msk [vmem:[#allocation5 + $0x288] sm:$0xff] %vm2667_vm0, %v2626_v37  ;;  %2694 = vst.msk [vmem:[#allocation5 + $0x270] sm:$0xff] %vm2667_vm0, %v2624_v26  ;;  %v4545_v28 = vpack.c.bf16 %v3878_v18, %v3875_v57 }
 0x40c   : > { %4546 = vmatpush1.bf16.xpose.msra.mxu1 %v4545_v28 }
 0x40d   : > { %v3462_v31 = vpop.permute.xlu1 %3461  ;;  %v3460_v50 = vpop.permute.xlu0 %3459 }
 0x40e   : > { %3530 = vst.msk [vmem:[#allocation5 + $0x290] sm:$0xff] %vm2860_vm1, %v3462_v31  ;;  %3529 = vst.msk [vmem:[#allocation5 + $0x278] sm:$0xff] %vm2860_vm1, %v3460_v50 }
 0x411   : > { %v2819_v1 = vpop.permute.xlu1 %2818  ;;  %v2817_v5 = vpop.permute.xlu0 %2816 }
 0x412   : > { %2888 = vst.msk [vmem:[#allocation5 + $0x288] sm:$0xff] %vm2860_vm1, %v2819_v1  ;;  %2887 = vst.msk [vmem:[#allocation5 + $0x270] sm:$0xff] %vm2860_vm1, %v2817_v5 }
 0x415   : > { %v3654_v48 = vpop.permute.xlu1 %3653  ;;  %v3652_v13 = vpop.permute.xlu0 %3651 }
 0x416   : > { %3722 = vst.msk [vmem:[#allocation5 + $0x290] sm:$0xff] %vm3053_vm2, %v3654_v48  ;;  %3721 = vst.msk [vmem:[#allocation5 + $0x278] sm:$0xff] %vm3053_vm2, %v3652_v13 }
 0x419   : > { %v3012_v46 = vpop.permute.xlu1 %3011  ;;  %v3010_v32 = vpop.permute.xlu0 %3009 }
 0x41a   : > { %3081 = vst.msk [vmem:[#allocation5 + $0x288] sm:$0xff] %vm3053_vm2, %v3012_v46  ;;  %3080 = vst.msk [vmem:[#allocation5 + $0x270] sm:$0xff] %vm3053_vm2, %v3010_v32 }
 0x41d   : > { %v3273_v16 = vpop.permute.xlu1 %3272  ;;  %v3885_v12 = vld [vmem:[#allocation5 + $0x290] sm:$0xff]  ;;  %v3271_v22 = vpop.permute.xlu0 %3270  ;;  %v3882_v39 = vld [vmem:[#allocation5 + $0x278] sm:$0xff] }
 0x41e   : > { %3339 = vst.msk [vmem:[#allocation5 + $0x2c0] sm:$0xff] %vm2667_vm0, %v3273_v16  ;;  %3338 = vst.msk [vmem:[#allocation5 + $0x2a8] sm:$0xff] %vm2667_vm0, %v3271_v22  ;;  %v4547_v53 = vpack.c.bf16 %v3885_v12, %v3882_v39 }
 0x420   : > { %4548 = vmatprep.subr.bf16.mxu1 %v4547_v53 }
 0x421   : > { %v2630_v7 = vpop.permute.xlu1 %2629  ;;  %v3884_v41 = vld [vmem:[#allocation5 + $0x288] sm:$0xff]  ;;  %v2628_v47 = vpop.permute.xlu0 %2627  ;;  %v3881_v6 = vld [vmem:[#allocation5 + $0x270] sm:$0xff] }
 0x422   : > { %2697 = vst.msk [vmem:[#allocation5 + $0x2b8] sm:$0xff] %vm2667_vm0, %v2630_v7  ;;  %2696 = vst.msk [vmem:[#allocation5 + $0x2a0] sm:$0xff] %vm2667_vm0, %v2628_v47  ;;  %v4549_v59 = vpack.c.bf16 %v3884_v41, %v3881_v6 }
 0x424   : > { %4550 = vmatpush1.bf16.xpose.msra.mxu1 %v4549_v59 }
 0x425   : > { %v3466_v58 = vpop.permute.xlu1 %3465  ;;  %v3464_v25 = vpop.permute.xlu0 %3463 }
 0x426   : > { %3532 = vst.msk [vmem:[#allocation5 + $0x2c0] sm:$0xff] %vm2860_vm1, %v3466_v58  ;;  %3531 = vst.msk [vmem:[#allocation5 + $0x2a8] sm:$0xff] %vm2860_vm1, %v3464_v25 }
 0x429   : > { %v2823_v62 = vpop.permute.xlu1 %2822  ;;  %v2821_v49 = vpop.permute.xlu0 %2820 }
 0x42a   : > { %2890 = vst.msk [vmem:[#allocation5 + $0x2b8] sm:$0xff] %vm2860_vm1, %v2823_v62  ;;  %2889 = vst.msk [vmem:[#allocation5 + $0x2a0] sm:$0xff] %vm2860_vm1, %v2821_v49 }
 0x42d   : > { %v3658_v61 = vpop.permute.xlu1 %3657  ;;  %v3656_v21 = vpop.permute.xlu0 %3655 }
 0x42e   : > { %3724 = vst.msk [vmem:[#allocation5 + $0x2c0] sm:$0xff] %vm3053_vm2, %v3658_v61  ;;  %3723 = vst.msk [vmem:[#allocation5 + $0x2a8] sm:$0xff] %vm3053_vm2, %v3656_v21 }
 0x431   : > { %v3016_v30 = vpop.permute.xlu1 %3015  ;;  %v3014_v11 = vpop.permute.xlu0 %3013 }
 0x432   : > { %3083 = vst.msk [vmem:[#allocation5 + $0x2b8] sm:$0xff] %vm3053_vm2, %v3016_v30  ;;  %3082 = vst.msk [vmem:[#allocation5 + $0x2a0] sm:$0xff] %vm3053_vm2, %v3014_v11 }
 0x435   : > { %v3277_v56 = vpop.permute.xlu1 %3276  ;;  %v3891_v24 = vld [vmem:[#allocation5 + $0x2c0] sm:$0xff]  ;;  %v3275_v15 = vpop.permute.xlu0 %3274  ;;  %v3888_v8 = vld [vmem:[#allocation5 + $0x2a8] sm:$0xff] }
 0x436   : > { %3341 = vst.msk [vmem:[#allocation5 + $0x2f0] sm:$0xff] %vm2667_vm0, %v3277_v56  ;;  %3340 = vst.msk [vmem:[#allocation5 + $0x2d8] sm:$0xff] %vm2667_vm0, %v3275_v15  ;;  %v4551_v44 = vpack.c.bf16 %v3891_v24, %v3888_v8 }
 0x438   : > { %4552 = vmatprep.subr.bf16.mxu1 %v4551_v44 }
 0x439   : > { %v2634_v43 = vpop.permute.xlu1 %2633  ;;  %v3890_v60 = vld [vmem:[#allocation5 + $0x2b8] sm:$0xff]  ;;  %v2632_v3 = vpop.permute.xlu0 %2631  ;;  %v3887_v36 = vld [vmem:[#allocation5 + $0x2a0] sm:$0xff] }
 0x43a   : > { %2699 = vst.msk [vmem:[#allocation5 + $0x2e8] sm:$0xff] %vm2667_vm0, %v2634_v43  ;;  %2698 = vst.msk [vmem:[#allocation5 + $0x2d0] sm:$0xff] %vm2667_vm0, %v2632_v3  ;;  %v4553_v4 = vpack.c.bf16 %v3890_v60, %v3887_v36 }
 0x43c   : > { %4554 = vmatpush1.bf16.xpose.msra.mxu1 %v4553_v4 }
 0x43d   : > { %v3470_v14 = vpop.permute.xlu1 %3469  ;;  %v3468_v27 = vpop.permute.xlu0 %3467 }
 0x43e   : > { %3534 = vst.msk [vmem:[#allocation5 + $0x2f0] sm:$0xff] %vm2860_vm1, %v3470_v14  ;;  %3533 = vst.msk [vmem:[#allocation5 + $0x2d8] sm:$0xff] %vm2860_vm1, %v3468_v27 }
 0x441   : > { %v2827_v63 = vpop.permute.xlu1 %2826  ;;  %v2825_v54 = vpop.permute.xlu0 %2824 }
 0x442   : > { %2892 = vst.msk [vmem:[#allocation5 + $0x2e8] sm:$0xff] %vm2860_vm1, %v2827_v63  ;;  %2891 = vst.msk [vmem:[#allocation5 + $0x2d0] sm:$0xff] %vm2860_vm1, %v2825_v54 }
 0x445   : > { %v3662_v42 = vpop.permute.xlu1 %3661  ;;  %v3660_v35 = vpop.permute.xlu0 %3659 }
 0x446   : > { %3726 = vst.msk [vmem:[#allocation5 + $0x2f0] sm:$0xff] %vm3053_vm2, %v3662_v42  ;;  %3725 = vst.msk [vmem:[#allocation5 + $0x2d8] sm:$0xff] %vm3053_vm2, %v3660_v35 }
 0x449   : > { %v3020_v9 = vpop.permute.xlu1 %3019  ;;  %v3018_v2 = vpop.permute.xlu0 %3017 }
 0x44a   : > { %3085 = vst.msk [vmem:[#allocation5 + $0x2e8] sm:$0xff] %vm3053_vm2, %v3020_v9  ;;  %3084 = vst.msk [vmem:[#allocation5 + $0x2d0] sm:$0xff] %vm3053_vm2, %v3018_v2 }
 0x44d   : > { %v3897_v29 = vld [vmem:[#allocation5 + $0x2f0] sm:$0xff]  ;;  %v3894_v34 = vld [vmem:[#allocation5 + $0x2d8] sm:$0xff] }
 0x44e   : > { %v4555_v52 = vpack.c.bf16 %v3897_v29, %v3894_v34 }
 0x450   : > { %4556 = vmatprep.subr.bf16.mxu1 %v4555_v52 }
 0x451   : > { %v3896_v0 = vld [vmem:[#allocation5 + $0x2e8] sm:$0xff]  ;;  %v3893_v40 = vld [vmem:[#allocation5 + $0x2d0] sm:$0xff] }
 0x452   : > { %v4557_v45 = vpack.c.bf16 %v3896_v0, %v3893_v40 }
 0x454   : > { %4558 = vmatpush1.bf16.xpose.msra.mxu1 %v4557_v45 }
 0x45a   : > { %v3906_v50 = vpop.permute.xlu0 %3905  ;;  %v3911_v5 = vpop.permute.xlu1 %3910 }
 0x45b   : > { %4096 = vmatmul.mubr.f32.vlgmr.msra.gmra.mrb[0].mxu1 %v3791_v55 }
 0x45c   : > { %4101 = vmatprep.mubr.f32.mxu1 %v3795_v10 }
 0x45e   : > { %v3916_v47 = vpop.permute.xlu1 %3915  ;;  %v3921_v11 = vpop.permute.xlu0 %3920 }
 0x45f   : > { %4102 = vmatmul.mubr.f32.gmra.mrb[2].mxu1 %v3794_v23 }
 0x460   : > { %4107 = vmatprep.mubr.f32.mxu1 %v3798_v20 }
 0x463   : > { %4108 = vmatmul.mubr.f32.gmra.mrb[4].mxu1 %v3797_v38 }
 0x464   : > { %4113 = vmatprep.mubr.f32.mxu1 %v3801_v33 }
 0x467   : > { %4114 = vmatmul.mubr.f32.gmra.mrb[6].mxu1 %v3800_v17 }
 0x470   : > { %v4186_v19 = vpop.f32.mrb[32].mxu0 }
 0x471   : > { %v4188_v51 = vpop.f32.mrb[33].mxu0 }
 0x474   : > { %v4192_v37 = vpop.f32.mrb[34].mxu0 }
 0x475   : > { %v4194_v18 = vpop.f32.mrb[35].mxu0 }
 0x478   : > { %v4198_v26 = vpop.f32.mrb[36].mxu0 }
 0x479   : > { %v4200_v57 = vpop.f32.mrb[37].mxu0 }
 0x47c   : > { %v4204_v28 = vpop.f32.mrb[38].mxu0 }
 0x47d   : > { %v4206_v31 = vpop.f32.mrb[39].mxu0 }
 0x52e   : > { %v4097_v1 = vpop.f32.mrb[0].mxu1 }
 0x52f   : > { %v4098_v48 = vadd.f32 %v4097_v1, %v3906_v50  ;;  %v4099_v13 = vpop.f32.mrb[1].mxu1 }
 0x530   : > { %v4100_v46 = vadd.f32 %v4099_v13, %v3906_v50 }
 0x531   : > { %v4187_v32 = vadd.f32 %v4186_v19, %v4098_v48 }
 0x532   : > { %v4189_v16 = vadd.f32 %v4188_v51, %v4100_v46  ;;  %v4103_v12 = vpop.f32.mrb[2].mxu1 }
 0x533   : > { %v4209_v22 = vmax.f32 %v4187_v32, 0.0  ;;  %v4104_v39 = vadd.f32 %v4103_v12, %v3911_v5  ;;  %v4105_v53 = vpop.f32.mrb[3].mxu1 }
 0x534   : > { %v4210_v7 = vmax.f32 %v4189_v16, 0.0  ;;  %v4106_v41 = vadd.f32 %v4105_v53, %v3911_v5 }
 0x535   : > { %4217 = vst [vmem:[%s6963_s8] sm:$0xff] %v4209_v22  ;;  %v4193_v6 = vadd.f32 %v4192_v37, %v4104_v39 }
 0x536   : > { %4218 = vst [vmem:[%s6963_s8 + $0x8] sm:$0xff] %v4210_v7  ;;  %v4195_v59 = vadd.f32 %v4194_v18, %v4106_v41  ;;  %v4109_v58 = vpop.f32.mrb[4].mxu1 }
 0x537   : > { %v4211_v25 = vmax.f32 %v4193_v6, 0.0  ;;  %v4110_v62 = vadd.f32 %v4109_v58, %v3916_v47  ;;  %v4111_v49 = vpop.f32.mrb[5].mxu1 }
 0x538   : > { %v4212_v61 = vmax.f32 %v4195_v59, 0.0  ;;  %v4112_v21 = vadd.f32 %v4111_v49, %v3916_v47 }
 0x539   : > { %4219 = vst [vmem:[%s6963_s8 + $0x10] sm:$0xff] %v4211_v25  ;;  %v4199_v30 = vadd.f32 %v4198_v26, %v4110_v62 }
 0x53a   : > { %4220 = vst [vmem:[%s6963_s8 + $0x18] sm:$0xff] %v4212_v61  ;;  %v4201_v56 = vadd.f32 %v4200_v57, %v4112_v21  ;;  %v4115_v24 = vpop.f32.mrb[6].mxu1 }
 0x53b   : > { %v4213_v15 = vmax.f32 %v4199_v30, 0.0  ;;  %v4116_v8 = vadd.f32 %v4115_v24, %v3921_v11  ;;  %v4117_v44 = vpop.f32.mrb[7].mxu1 }
 0x53c   : > { %v4214_v43 = vmax.f32 %v4201_v56, 0.0  ;;  %v4118_v60 = vadd.f32 %v4117_v44, %v3921_v11 }
 0x53d   : > { %4221 = vst [vmem:[%s6963_s8 + $0x20] sm:$0xff] %v4213_v15  ;;  %v4205_v3 = vadd.f32 %v4204_v28, %v4116_v8 }
 0x53e   : > { %4222 = vst [vmem:[%s6963_s8 + $0x28] sm:$0xff] %v4214_v43  ;;  %v4207_v36 = vadd.f32 %v4206_v31, %v4118_v60 }
 0x53f   : > { %v4215_v4 = vmax.f32 %v4205_v3, 0.0 }
 0x540   : > { %v4216_v14 = vmax.f32 %v4207_v36, 0.0 }
 0x541   : > { %4223 = vst [vmem:[%s6963_s8 + $0x30] sm:$0xff] %v4215_v4 }
 0x542   : > { %4224 = vst [vmem:[%s6963_s8 + $0x38] sm:$0xff] %v4216_v14 }
 0x543 PF: > { %s15_s18 = sadd.s32 1, %s4654_s18  }
 0x544   : > { %p12_p4 = scmp.ge.s32.totalorder %s15_s18, 4  }
 0x546   :  { %14 = sbr.rel (!%p12_p4) target bundleno = 1 (0x1), region = 74 }

</bundles_post_ra>
